<compile_context>
chip_gen: v7x
topology: tpu7x:2x2x1
jax: 0.10.0
libtpu: 0.0.40
codegen_flags: <defaults>
</compile_context>

<pallas_src>
import functools

import jax
import jax.numpy as jnp
from jax import lax
from jax.experimental import pallas as pl
from jax.experimental.pallas import tpu as pltpu


# ---------------------------------------------------------------------------
# Small helpers
# ---------------------------------------------------------------------------
def _round_up(x, m):
    return ((x + m - 1) // m) * m


def _pad2(a, rows, cols):
    pr, pc = rows - a.shape[0], cols - a.shape[1]
    if pr == 0 and pc == 0:
        return a
    return jnp.pad(a, ((0, pr), (0, pc)))


def _epilogue(h, activation, f_out_real):
    # Epilogue math stays in f32 (v5e has no bf16 VPU/EUP path).
    if activation == "relu":
        return jnp.maximum(h, 0.0)
    if activation == "log_softmax":
        f_pad = h.shape[-1]
        if f_out_real < f_pad:
            col = lax.broadcasted_iota(jnp.int32, h.shape, 1)
            # -inf in pad columns is safe: caller slices them off.
            h = jnp.where(col < f_out_real, h, -jnp.inf)
        m = jnp.max(h, axis=-1, keepdims=True)
        z = h - m
        lse = jnp.log(jnp.sum(jnp.exp(z), axis=-1, keepdims=True))
        return z - lse
    return h


def _vmem_limit_bytes(tm, tk, f_in_pad, f_src_pad, f_out_pad, out_itemsize,
                      proj_first):
    """Scoped-VMEM budget from actual tile sizes (+ headroom), clamped."""
    est = 0
    est += 2 * tm * tk * 1                       # A blocks (int8), double buf
    est += 2 * tk * f_src_pad * 2                # streamed src blocks (bf16)
    est += 2 * tm * f_in_pad * 2                 # x_dst blocks (bf16)
    est += 2 * tm * 128 * 4                      # inv_deg (lane-padded f32)
    est += 2 * 8 * f_out_pad * 4                 # bias (sublane-padded f32)
    n_w = 1 if proj_first else 2
    est += 2 * n_w * f_in_pad * f_out_pad * 2    # resident weights (bf16)
    est += 2 * tm * f_out_pad * out_itemsize     # output blocks
    est += tm * f_src_pad * 4                    # f32 accumulator scratch
    est = int(est * 1.5) + (4 << 20)             # headroom for Mosaic internals
    return max(16 << 20, min(est, 64 << 20))     # <= v7x physical VMEM


# ---------------------------------------------------------------------------
# Pallas kernels
# ---------------------------------------------------------------------------
def _sage_layer_agg_first_kernel(a_ref, xs_ref, inv_ref, xdst_ref, wl_ref,
                                 wr_ref, b_ref, o_ref, acc_ref, *,
                                 activation, f_out_real):
    """out = ((A @ x_src) * inv_deg) @ W_l + x_dst @ W_r + b  [+ activation]."""
    k = pl.program_id(1)
    # int8 0/1 adjacency block -> bf16 for the MXU (via f32: always-supported
    # convert path; cheap VPU work hidden under the matmul).
    a_bf16 = a_ref[...].astype(jnp.float32).astype(jnp.bfloat16)
    part = jnp.dot(a_bf16, xs_ref[...], preferred_element_type=jnp.float32)

    @pl.when(k == 0)
    def _():
        acc_ref[...] = part                       # no separate memset
        # Root-weight term computed off the serial last-k tail; the output
        # block is resident across k, so stash it there.
        root = jnp.dot(xdst_ref[...], wr_ref[...],
                       preferred_element_type=jnp.float32) + b_ref[...]
        o_ref[...] = root.astype(o_ref.dtype)

    @pl.when(k > 0)
    def _():
        acc_ref[...] += part

    @pl.when(k == pl.num_programs(1) - 1)
    def _():
        agg = (acc_ref[...] * inv_ref[...]).astype(jnp.bfloat16)  # f32 mean norm
        h = jnp.dot(agg, wl_ref[...], preferred_element_type=jnp.float32)
        h = h + o_ref[...].astype(jnp.float32)                    # + root + b
        o_ref[...] = _epilogue(h, activation, f_out_real).astype(o_ref.dtype)


def _sage_layer_proj_first_kernel(a_ref, xsp_ref, inv_ref, xdst_ref, wr_ref,
                                  b_ref, o_ref, acc_ref, *,
                                  activation, f_out_real):
    """out = (A @ (x_src @ W_l)) * inv_deg + x_dst @ W_r + b  [+ activation]."""
    k = pl.program_id(1)
    a_bf16 = a_ref[...].astype(jnp.float32).astype(jnp.bfloat16)
    part = jnp.dot(a_bf16, xsp_ref[...], preferred_element_type=jnp.float32)

    @pl.when(k == 0)
    def _():
        acc_ref[...] = part
        root = jnp.dot(xdst_ref[...], wr_ref[...],
                       preferred_element_type=jnp.float32) + b_ref[...]
        o_ref[...] = root.astype(o_ref.dtype)

    @pl.when(k > 0)
    def _():
        acc_ref[...] += part

    @pl.when(k == pl.num_programs(1) - 1)
    def _():
        h = acc_ref[...] * inv_ref[...] + o_ref[...].astype(jnp.float32)
        o_ref[...] = _epilogue(h, activation, f_out_real).astype(o_ref.dtype)


def _project_kernel(x_ref, w_ref, o_ref):
    o_ref[...] = jnp.dot(x_ref[...], w_ref[...],
                         preferred_element_type=jnp.float32).astype(o_ref.dtype)


def _project_pallas(x, w, tile_rows):
    """x @ w with the weight kept resident across the row grid."""
    rows, f_in = x.shape
    f_out = w.shape[1]
    tr = min(tile_rows, rows)
    return pl.pallas_call(
        _project_kernel,
        out_shape=jax.ShapeDtypeStruct((rows, f_out), jnp.bfloat16),
        grid=(rows // tr,),
        in_specs=[
            pl.BlockSpec((tr, f_in), lambda i: (i, 0)),
            pl.BlockSpec((f_in, f_out), lambda i: (0, 0)),   # resident weights
        ],
        out_specs=pl.BlockSpec((tr, f_out), lambda i: (i, 0)),
        compiler_params=pltpu.CompilerParams(
            dimension_semantics=("parallel",)),
    )(x, w)


# ---------------------------------------------------------------------------
# One fused SAGEConv layer
# ---------------------------------------------------------------------------
def sage_conv_pallas(x_all, edge_index, n_src, n_dst, w_l, w_r, b,
                     activation, f_out_real, *, tile_m=512, tile_k=1024):
    """Fused SAGEConv layer.

    x_all  : (rows >= n_src, f_in_pad) bf16 padded feature slab; rows [0,n_dst)
             double as x_target (the dst operand is a second BlockSpec view).
    Returns the padded (m_pad, f_out_pad) output: bf16 for relu layers, f32 for
    the final log_softmax layer. Padded rows/cols are junk/zero and must be
    sliced off (or re-fed: next layer's A has zero columns there).
    """
    f_in_pad = x_all.shape[1]
    f_out_pad = w_l.shape[1]
    out_dtype = jnp.float32 if activation == "log_softmax" else jnp.bfloat16

    # v7x: cap tile_m so the "parallel" row axis has >= 2 blocks when possible
    # (2 TensorCores); on single-core v5e/v6e this only adds a few grid steps.
    tm = min(tile_m, _round_up(-(-n_dst // 2), 128))
    tk = min(tile_k, _round_up(n_src, 128))
    m_pad = _round_up(n_dst, tm)
    k_pad = _round_up(n_src, tk)

    # One padded feature slab serves both the src (K-tiled) and dst (M-tiled)
    # views — no separate x_dst copy/pad. Multiple of tk so the projection
    # kernel tiles exactly; >= m_pad so all dst blocks are in-bounds.
    rows_pad = _round_up(max(m_pad, k_pad, x_all.shape[0]), tk)
    x_pad = _pad2(x_all, rows_pad, f_in_pad)

    # Adjacency built ONCE, directly at padded shape, stored as int8 edge
    # counts in HBM (exact for multiplicity <= 127; deduplicated graphs are
    # 0/1). Degrees straight from the edge list: O(E), not an O(N^2) row-sum.
    src, dst = edge_index[0], edge_index[1]
    a_pad = (jnp.zeros((m_pad, k_pad), jnp.int32).at[dst, src].add(1)
             .astype(jnp.int8))
    deg = jnp.zeros((m_pad,), jnp.float32).at[dst].add(1.0)
    inv_pad = jnp.where(deg > 0, 1.0 / deg, 0.0).reshape(m_pad, 1)

    grid = (m_pad // tm, k_pad // tk)
    proj_first = f_out_pad < f_in_pad

    if proj_first:
        # Reorder (A @ x) @ W_l -> A @ (x @ W_l): the dominant matmul's width
        # (and the accumulator) shrinks from f_in_pad to f_out_pad.
        xs_proj = _project_pallas(x_pad, w_l, tk)
        kernel = functools.partial(_sage_layer_proj_first_kernel,
                                   activation=activation,
                                   f_out_real=f_out_real)
        in_specs = [
            pl.BlockSpec((tm, tk), lambda i, k: (i, k)),               # A int8
            pl.BlockSpec((tk, f_out_pad), lambda i, k: (k, 0)),        # x @ W_l
            pl.BlockSpec((tm, 1), lambda i, k: (i, 0)),                # 1/deg
            pl.BlockSpec((tm, f_in_pad), lambda i, k: (i, 0)),         # x_dst view
            pl.BlockSpec((f_in_pad, f_out_pad), lambda i, k: (0, 0)),  # W_r
            pl.BlockSpec((1, f_out_pad), lambda i, k: (0, 0)),         # bias
        ]
        operands = (a_pad, xs_proj, inv_pad, x_pad, w_r, b)
        f_src_pad = f_out_pad
    else:
        kernel = functools.partial(_sage_layer_agg_first_kernel,
                                   activation=activation,
                                   f_out_real=f_out_real)
        in_specs = [
            pl.BlockSpec((tm, tk), lambda i, k: (i, k)),               # A int8
            pl.BlockSpec((tk, f_in_pad), lambda i, k: (k, 0)),         # x_src view
            pl.BlockSpec((tm, 1), lambda i, k: (i, 0)),                # 1/deg
            pl.BlockSpec((tm, f_in_pad), lambda i, k: (i, 0)),         # x_dst view
            pl.BlockSpec((f_in_pad, f_out_pad), lambda i, k: (0, 0)),  # W_l
            pl.BlockSpec((f_in_pad, f_out_pad), lambda i, k: (0, 0)),  # W_r
            pl.BlockSpec((1, f_out_pad), lambda i, k: (0, 0)),         # bias
        ]
        operands = (a_pad, x_pad, inv_pad, x_pad, w_l, w_r, b)
        f_src_pad = f_in_pad

    vmem_limit = _vmem_limit_bytes(tm, tk, f_in_pad, f_src_pad, f_out_pad,
                                   jnp.dtype(out_dtype).itemsize, proj_first)

    out = pl.pallas_call(
        kernel,
        out_shape=jax.ShapeDtypeStruct((m_pad, f_out_pad), out_dtype),
        grid=grid,
        in_specs=in_specs,
        out_specs=pl.BlockSpec((tm, f_out_pad), lambda i, k: (i, 0)),
        scratch_shapes=[pltpu.VMEM((tm, f_src_pad), jnp.float32)],
        compiler_params=pltpu.CompilerParams(
            dimension_semantics=("parallel", "arbitrary"),
            vmem_limit_bytes=vmem_limit),
    )(*operands)
    return out


# ---------------------------------------------------------------------------
# Plain-JAX glue: parameter padding, multi-layer driver
# ---------------------------------------------------------------------------
def pad_params(params, feat_dims):
    padded = []
    for i, (w_l, w_r, b) in enumerate(params):
        fi_p = _round_up(feat_dims[i], 128)
        fo_p = _round_up(feat_dims[i + 1], 128)
        padded.append((_pad2(w_l, fi_p, fo_p).astype(jnp.bfloat16),
                       _pad2(w_r, fi_p, fo_p).astype(jnp.bfloat16),
                       _pad2(b, 1, fo_p)))                       # bias in f32
    return padded


def sage_forward(x, edge_indices, params, *, sizes, feat_dims, num_layers,
                 tile_m=512, tile_k=1024):
    params_p = pad_params(params, feat_dims)
    h = _pad2(x, x.shape[0], _round_up(feat_dims[0], 128)).astype(jnp.bfloat16)
    out = None
    for i in range(num_layers):
        n_src, n_dst = sizes[i]
        w_l, w_r, b = params_p[i]
        activation = "relu" if i != num_layers - 1 else "log_softmax"
        out = sage_conv_pallas(h, edge_indices[i], n_src, n_dst, w_l, w_r, b,
                               activation, feat_dims[i + 1],
                               tile_m=tile_m, tile_k=tile_k)
        if i != num_layers - 1:
            # F.dropout(p=0.5) is identity in eval mode (self.training == False).
            # Hidden layers are already bf16 from the kernel: no extra cast,
            # padded rows flow through (zero A columns kill them next layer).
            h = out
    return out[:sizes[-1][1], :feat_dims[num_layers]]


# ---------------------------------------------------------------------------
# Pure-JAX f32 reference (for sanity checking the kernels)
# ---------------------------------------------------------------------------
def sage_forward_ref(x, edge_indices, params, sizes, num_layers):
    for i in range(num_layers):
        n_src, n_dst = sizes[i]
        src, dst = edge_indices[i][0], edge_indices[i][1]
        a = jnp.zeros((n_dst, n_src), jnp.float32).at[dst, src].add(1.0)
        deg = jnp.sum(a, axis=1, keepdims=True)
        inv_deg = jnp.where(deg > 0, 1.0 / deg, 0.0)
        w_l, w_r, b = params[i]
        x_target = x[:n_dst]
        agg = (a @ x) * inv_deg
        h = agg @ w_l + x_target @ w_r + b
        if i != num_layers - 1:
            h = jnp.maximum(h, 0.0)
        else:
            h = jax.nn.log_softmax(h, axis=-1)
        x = h
    return x


if __name__ == "__main__":
    key = jax.random.PRNGKey(0)

    in_channels, hidden_channels, out_channels = 16, 192, 8
    num_layers = 3
    # sampled-subgraph node counts per hop (bipartite layers): N0->N1->N2->N3
    node_counts = [640, 384, 256, 64]
    num_edges = [4096, 2048, 768]

    feat_dims = tuple([in_channels] + [hidden_channels] * (num_layers - 1)
                      + [out_channels])

    # deterministic parameters (lin_l with bias, lin_r without; pre-transposed
    # to (F_in, F_out))
    params = []
    for i in range(num_layers):
        f_in, f_out = feat_dims[i], feat_dims[i + 1]
        key, k1, k2, k3 = jax.random.split(key, 4)
        w_l = jax.random.normal(k1, (f_in, f_out), jnp.float32) * 0.1
        w_r = jax.random.normal(k2, (f_in, f_out), jnp.float32) * 0.1
        b = jax.random.normal(k3, (1, f_out), jnp.float32) * 0.01
        params.append((w_l, w_r, b))

    # deterministic input features and sampled adjacencies
    key, kx = jax.random.split(key)
    x = jax.random.normal(kx, (node_counts[0], in_channels), jnp.float32)

    edge_indices, sizes = [], []
    for i in range(num_layers):
        n_src, n_dst = node_counts[i], node_counts[i + 1]
        key, ks, kd = jax.random.split(key, 3)
        src = jax.random.randint(ks, (num_edges[i],), 0, n_src, jnp.int32)
        dst = jax.random.randint(kd, (num_edges[i],), 0, n_dst, jnp.int32)
        edge_indices.append(jnp.stack([src, dst], axis=0))  # (2, E)
        sizes.append((n_src, n_dst))
    sizes = tuple(sizes)

    @jax.jit
    def run(x, edge_indices, params):
        # Small tiles so the demo exercises the multi-tile accumulation path;
        # production defaults are tile_m=512, tile_k=1024 (v6e can go larger;
        # vmem_limit_bytes is derived from the tile budget either way).
        return sage_forward(x, edge_indices, params, sizes=sizes,
                            feat_dims=feat_dims, num_layers=num_layers,
                            tile_m=128, tile_k=128)

    out = jax.block_until_ready(run(x, edge_indices, params))
    ref = jax.block_until_ready(
        sage_forward_ref(x, edge_indices, params, sizes, num_layers))

    assert out.shape == (node_counts[-1], out_channels), out.shape
    # bf16 matmul operands / bf16 hidden activations (f32 accumulation) =>
    # loosened tolerance vs the pure-f32 reference.
    max_err = float(jnp.max(jnp.abs(out - ref)))
    assert jnp.allclose(out, ref, atol=5e-2, rtol=5e-2), f"max_abs_err={max_err}"

    print("KERNEL_OK")
</pallas_src>

<mosaic_0001>
module attributes {stable_mosaic.version = 11 : i64} {
  func.func private @main(%arg0: i32) attributes {dimension_semantics = [#tpu.dimension_semantics<core_parallel>], iteration_bounds = array<i64: 2>, tpu.core_type = #tpu.core_type<sc_scalar_subcore>, window_params = []} {
    return
  }
}

module attributes {stable_mosaic.version = 11 : i64} {
  func.func private @main(%arg0: i32) attributes {dimension_semantics = [#tpu.dimension_semantics<core_parallel>], iteration_bounds = array<i64: 2>, tpu.core_type = #tpu.core_type<sc_scalar_subcore>, window_params = []} {
    return
  }
}

module attributes {stable_mosaic.version = 11 : i64} {
  func.func @_sage_layer_agg_first_kernel(%arg0: i32, %arg1: i32, %arg2: memref<128x128xi8, #tpu.memory_space<vmem>>, %arg3: memref<128x128xbf16, #tpu.memory_space<vmem>>, %arg4: memref<128x1xf32, #tpu.memory_space<vmem>>, %arg5: memref<128x128xbf16, #tpu.memory_space<vmem>>, %arg6: memref<128x256xbf16, #tpu.memory_space<vmem>>, %arg7: memref<128x256xbf16, #tpu.memory_space<vmem>>, %arg8: memref<1x256xf32, #tpu.memory_space<vmem>>, %arg9: memref<128x256xbf16, #tpu.memory_space<vmem>>, %arg10: memref<128x128xf32, #tpu.memory_space<vmem>>) attributes {dimension_semantics = [#tpu.dimension_semantics<parallel>, #tpu.dimension_semantics<arbitrary>], iteration_bounds = array<i64: 3, 5>, scalar_prefetch = 0 : i64, scratch_operands = 1 : i64, tpu.core_type = #tpu.core_type<tc>, window_params = [{transform_indices = @transform_0, window_bounds = array<i64: 128, 128>}, {transform_indices = @transform_1, window_bounds = array<i64: 128, 128>}, {transform_indices = @transform_2, window_bounds = array<i64: 128, 1>}, {transform_indices = @transform_3, window_bounds = array<i64: 128, 128>}, {pipeline_mode = #tpu.pipeline_mode<synchronous>, transform_indices = @transform_4, window_bounds = array<i64: 128, 256>}, {pipeline_mode = #tpu.pipeline_mode<synchronous>, transform_indices = @transform_5, window_bounds = array<i64: 128, 256>}, {pipeline_mode = #tpu.pipeline_mode<synchronous>, transform_indices = @transform_6, window_bounds = array<i64: 1, 256>}, {transform_indices = @transform_7, window_bounds = array<i64: 128, 256>}]} {
    %c0 = arith.constant 0 : index
    %c0_0 = arith.constant 0 : index
    %0 = vector.load %arg2[%c0, %c0_0] : memref<128x128xi8, #tpu.memory_space<vmem>>, vector<128x128xi8>
    %1 = arith.sitofp %0 : vector<128x128xi8> to vector<128x128xf32>
    %2 = arith.truncf %1 : vector<128x128xf32> to vector<128x128xbf16>
    %c0_1 = arith.constant 0 : index
    %c0_2 = arith.constant 0 : index
    %3 = vector.load %arg3[%c0_1, %c0_2] : memref<128x128xbf16, #tpu.memory_space<vmem>>, vector<128x128xbf16>
    %cst = arith.constant dense<0.000000e+00> : vector<128x128xf32>
    %4 = tpu.matmul %2, %3, %cst {dimension_numbers = #tpu.dot_dimension_numbers<[1], [0], [0], [1], [0, 0, 1, 1], [], []>} : vector<128x128xbf16>, vector<128x128xbf16>, vector<128x128xf32> -> vector<128x128xf32>
    %c0_i32 = arith.constant 0 : i32
    %5 = arith.cmpi eq, %arg1, %c0_i32 : i32
    %6 = arith.extui %5 : i1 to i32
    %c0_i32_3 = arith.constant 0 : i32
    %7 = arith.cmpi ne, %6, %c0_i32_3 : i32
    scf.if %7 {
      %c0_7 = arith.constant 0 : index
      %c0_8 = arith.constant 0 : index
      %14 = vector.load %arg10[%c0_7, %c0_8] : memref<128x128xf32, #tpu.memory_space<vmem>>, vector<128x128xf32>
      tpu.vector_store %arg10[%c0_7, %c0_8], %4 {strides = array<i32>} : memref<128x128xf32, #tpu.memory_space<vmem>>, vector<128x128xf32>,
      %c0_9 = arith.constant 0 : index
      %c0_10 = arith.constant 0 : index
      %15 = vector.load %arg5[%c0_9, %c0_10] : memref<128x128xbf16, #tpu.memory_space<vmem>>, vector<128x128xbf16>
      %c0_11 = arith.constant 0 : index
      %c0_12 = arith.constant 0 : index
      %16 = vector.load %arg7[%c0_11, %c0_12] : memref<128x256xbf16, #tpu.memory_space<vmem>>, vector<128x256xbf16>
      %cst_13 = arith.constant dense<0.000000e+00> : vector<128x256xf32>
      %17 = tpu.matmul %15, %16, %cst_13 {dimension_numbers = #tpu.dot_dimension_numbers<[1], [0], [0], [1], [0, 0, 1, 1], [], []>} : vector<128x128xbf16>, vector<128x256xbf16>, vector<128x256xf32> -> vector<128x256xf32>
      %c0_14 = arith.constant 0 : index
      %c0_15 = arith.constant 0 : index
      %18 = vector.load %arg8[%c0_14, %c0_15] : memref<1x256xf32, #tpu.memory_space<vmem>>, vector<1x256xf32>
      %19 = vector.broadcast %18 : vector<1x256xf32> to vector<128x256xf32>
      %20 = arith.addf %17, %19 : vector<128x256xf32>
      %21 = arith.truncf %20 : vector<128x256xf32> to vector<128x256xbf16>
      %c0_16 = arith.constant 0 : index
      %c0_17 = arith.constant 0 : index
      %22 = vector.load %arg9[%c0_16, %c0_17] : memref<128x256xbf16, #tpu.memory_space<vmem>>, vector<128x256xbf16>
      tpu.vector_store %arg9[%c0_16, %c0_17], %21 {strides = array<i32>} : memref<128x256xbf16, #tpu.memory_space<vmem>>, vector<128x256xbf16>,
    } else {
    }
    %c0_i32_4 = arith.constant 0 : i32
    %8 = arith.cmpi sgt, %arg1, %c0_i32_4 : i32
    %9 = arith.extui %8 : i1 to i32
    %c0_i32_5 = arith.constant 0 : i32
    %10 = arith.cmpi ne, %9, %c0_i32_5 : i32
    scf.if %10 {
      %c0_7 = arith.constant 0 : index
      %c0_8 = arith.constant 0 : index
      %14 = vector.load %arg10[%c0_7, %c0_8] : memref<128x128xf32, #tpu.memory_space<vmem>>, vector<128x128xf32>
      %15 = arith.addf %14, %4 : vector<128x128xf32>
      %c0_9 = arith.constant 0 : index
      %c0_10 = arith.constant 0 : index
      %16 = vector.load %arg10[%c0_9, %c0_10] : memref<128x128xf32, #tpu.memory_space<vmem>>, vector<128x128xf32>
      tpu.vector_store %arg10[%c0_9, %c0_10], %15 {strides = array<i32>} : memref<128x128xf32, #tpu.memory_space<vmem>>, vector<128x128xf32>,
    } else {
    }
    %c4_i32 = arith.constant 4 : i32
    %11 = arith.cmpi eq, %arg1, %c4_i32 : i32
    %12 = arith.extui %11 : i1 to i32
    %c0_i32_6 = arith.constant 0 : i32
    %13 = arith.cmpi ne, %12, %c0_i32_6 : i32
    scf.if %13 {
      %c0_7 = arith.constant 0 : index
      %c0_8 = arith.constant 0 : index
      %14 = vector.load %arg10[%c0_7, %c0_8] : memref<128x128xf32, #tpu.memory_space<vmem>>, vector<128x128xf32>
      %c0_9 = arith.constant 0 : index
      %c0_10 = arith.constant 0 : index
      %15 = vector.load %arg4[%c0_9, %c0_10] : memref<128x1xf32, #tpu.memory_space<vmem>>, vector<128x1xf32>
      %16 = vector.broadcast %15 : vector<128x1xf32> to vector<128x128xf32>
      %17 = arith.mulf %14, %16 : vector<128x128xf32>
      %18 = arith.truncf %17 : vector<128x128xf32> to vector<128x128xbf16>
      %c0_11 = arith.constant 0 : index
      %c0_12 = arith.constant 0 : index
      %19 = vector.load %arg6[%c0_11, %c0_12] : memref<128x256xbf16, #tpu.memory_space<vmem>>, vector<128x256xbf16>
      %cst_13 = arith.constant dense<0.000000e+00> : vector<128x256xf32>
      %20 = tpu.matmul %18, %19, %cst_13 {dimension_numbers = #tpu.dot_dimension_numbers<[1], [0], [0], [1], [0, 0, 1, 1], [], []>} : vector<128x128xbf16>, vector<128x256xbf16>, vector<128x256xf32> -> vector<128x256xf32>
      %c0_14 = arith.constant 0 : index
      %c0_15 = arith.constant 0 : index
      %21 = vector.load %arg9[%c0_14, %c0_15] : memref<128x256xbf16, #tpu.memory_space<vmem>>, vector<128x256xbf16>
      %22 = arith.extf %21 : vector<128x256xbf16> to vector<128x256xf32>
      %23 = arith.addf %20, %22 : vector<128x256xf32>
      %cst_16 = arith.constant 0.000000e+00 : f32
      %24 = vector.broadcast %cst_16 : f32 to vector<128x256xf32>
      %25 = arith.maximumf %23, %24 : vector<128x256xf32>
      %26 = arith.truncf %25 : vector<128x256xf32> to vector<128x256xbf16>
      %c0_17 = arith.constant 0 : index
      %c0_18 = arith.constant 0 : index
      %27 = vector.load %arg9[%c0_17, %c0_18] : memref<128x256xbf16, #tpu.memory_space<vmem>>, vector<128x256xbf16>
      tpu.vector_store %arg9[%c0_17, %c0_18], %26 {strides = array<i32>} : memref<128x256xbf16, #tpu.memory_space<vmem>>, vector<128x256xbf16>,
    } else {
    }
    return
  }
  func.func @transform_0(%arg0: i32, %arg1: i32) -> (i32, i32) {
    %c0_i32 = arith.constant 0 : i32
    return %arg0, %arg1 : i32, i32
  }
  func.func @transform_1(%arg0: i32, %arg1: i32) -> (i32, i32) {
    %c0_i32 = arith.constant 0 : i32
    %c0_i32_0 = arith.constant 0 : i32
    return %arg1, %c0_i32 : i32, i32
  }
  func.func @transform_2(%arg0: i32, %arg1: i32) -> (i32, i32) {
    %c0_i32 = arith.constant 0 : i32
    %c0_i32_0 = arith.constant 0 : i32
    return %arg0, %c0_i32 : i32, i32
  }
  func.func @transform_3(%arg0: i32, %arg1: i32) -> (i32, i32) {
    %c0_i32 = arith.constant 0 : i32
    %c0_i32_0 = arith.constant 0 : i32
    return %arg0, %c0_i32 : i32, i32
  }
  func.func @transform_4(%arg0: i32, %arg1: i32) -> (i32, i32) {
    %c0_i32 = arith.constant 0 : i32
    %c0_i32_0 = arith.constant 0 : i32
    %c0_i32_1 = arith.constant 0 : i32
    return %c0_i32, %c0_i32_0 : i32, i32
  }
  func.func @transform_5(%arg0: i32, %arg1: i32) -> (i32, i32) {
    %c0_i32 = arith.constant 0 : i32
    %c0_i32_0 = arith.constant 0 : i32
    %c0_i32_1 = arith.constant 0 : i32
    return %c0_i32, %c0_i32_0 : i32, i32
  }
  func.func @transform_6(%arg0: i32, %arg1: i32) -> (i32, i32) {
    %c0_i32 = arith.constant 0 : i32
    %c0_i32_0 = arith.constant 0 : i32
    %c0_i32_1 = arith.constant 0 : i32
    return %c0_i32, %c0_i32_0 : i32, i32
  }
  func.func @transform_7(%arg0: i32, %arg1: i32) -> (i32, i32) {
    %c0_i32 = arith.constant 0 : i32
    %c0_i32_0 = arith.constant 0 : i32
    return %arg0, %c0_i32 : i32, i32
  }
}

module attributes {stable_mosaic.version = 11 : i64} {
  func.func @_sage_layer_agg_first_kernel(%arg0: i32, %arg1: i32, %arg2: memref<128x128xi8, #tpu.memory_space<vmem>>, %arg3: memref<128x256xbf16, #tpu.memory_space<vmem>>, %arg4: memref<128x1xf32, #tpu.memory_space<vmem>>, %arg5: memref<128x256xbf16, #tpu.memory_space<vmem>>, %arg6: memref<256x256xbf16, #tpu.memory_space<vmem>>, %arg7: memref<256x256xbf16, #tpu.memory_space<vmem>>, %arg8: memref<1x256xf32, #tpu.memory_space<vmem>>, %arg9: memref<128x256xbf16, #tpu.memory_space<vmem>>, %arg10: memref<128x256xf32, #tpu.memory_space<vmem>>) attributes {dimension_semantics = [#tpu.dimension_semantics<parallel>, #tpu.dimension_semantics<arbitrary>], iteration_bounds = array<i64: 2, 3>, scalar_prefetch = 0 : i64, scratch_operands = 1 : i64, tpu.core_type = #tpu.core_type<tc>, window_params = [{transform_indices = @transform_0, window_bounds = array<i64: 128, 128>}, {transform_indices = @transform_1, window_bounds = array<i64: 128, 256>}, {transform_indices = @transform_2, window_bounds = array<i64: 128, 1>}, {transform_indices = @transform_3, window_bounds = array<i64: 128, 256>}, {pipeline_mode = #tpu.pipeline_mode<synchronous>, transform_indices = @transform_4, window_bounds = array<i64: 256, 256>}, {pipeline_mode = #tpu.pipeline_mode<synchronous>, transform_indices = @transform_5, window_bounds = array<i64: 256, 256>}, {pipeline_mode = #tpu.pipeline_mode<synchronous>, transform_indices = @transform_6, window_bounds = array<i64: 1, 256>}, {transform_indices = @transform_7, window_bounds = array<i64: 128, 256>}]} {
    %c0 = arith.constant 0 : index
    %c0_0 = arith.constant 0 : index
    %0 = vector.load %arg2[%c0, %c0_0] : memref<128x128xi8, #tpu.memory_space<vmem>>, vector<128x128xi8>
    %1 = arith.sitofp %0 : vector<128x128xi8> to vector<128x128xf32>
    %2 = arith.truncf %1 : vector<128x128xf32> to vector<128x128xbf16>
    %c0_1 = arith.constant 0 : index
    %c0_2 = arith.constant 0 : index
    %3 = vector.load %arg3[%c0_1, %c0_2] : memref<128x256xbf16, #tpu.memory_space<vmem>>, vector<128x256xbf16>
    %cst = arith.constant dense<0.000000e+00> : vector<128x256xf32>
    %4 = tpu.matmul %2, %3, %cst {dimension_numbers = #tpu.dot_dimension_numbers<[1], [0], [0], [1], [0, 0, 1, 1], [], []>} : vector<128x128xbf16>, vector<128x256xbf16>, vector<128x256xf32> -> vector<128x256xf32>
    %c0_i32 = arith.constant 0 : i32
    %5 = arith.cmpi eq, %arg1, %c0_i32 : i32
    %6 = arith.extui %5 : i1 to i32
    %c0_i32_3 = arith.constant 0 : i32
    %7 = arith.cmpi ne, %6, %c0_i32_3 : i32
    scf.if %7 {
      %c0_7 = arith.constant 0 : index
      %c0_8 = arith.constant 0 : index
      %14 = vector.load %arg10[%c0_7, %c0_8] : memref<128x256xf32, #tpu.memory_space<vmem>>, vector<128x256xf32>
      tpu.vector_store %arg10[%c0_7, %c0_8], %4 {strides = array<i32>} : memref<128x256xf32, #tpu.memory_space<vmem>>, vector<128x256xf32>,
      %c0_9 = arith.constant 0 : index
      %c0_10 = arith.constant 0 : index
      %15 = vector.load %arg5[%c0_9, %c0_10] : memref<128x256xbf16, #tpu.memory_space<vmem>>, vector<128x256xbf16>
      %c0_11 = arith.constant 0 : index
      %c0_12 = arith.constant 0 : index
      %16 = vector.load %arg7[%c0_11, %c0_12] : memref<256x256xbf16, #tpu.memory_space<vmem>>, vector<256x256xbf16>
      %cst_13 = arith.constant dense<0.000000e+00> : vector<128x256xf32>
      %17 = tpu.matmul %15, %16, %cst_13 {dimension_numbers = #tpu.dot_dimension_numbers<[1], [0], [0], [1], [0, 0, 1, 1], [], []>} : vector<128x256xbf16>, vector<256x256xbf16>, vector<128x256xf32> -> vector<128x256xf32>
      %c0_14 = arith.constant 0 : index
      %c0_15 = arith.constant 0 : index
      %18 = vector.load %arg8[%c0_14, %c0_15] : memref<1x256xf32, #tpu.memory_space<vmem>>, vector<1x256xf32>
      %19 = vector.broadcast %18 : vector<1x256xf32> to vector<128x256xf32>
      %20 = arith.addf %17, %19 : vector<128x256xf32>
      %21 = arith.truncf %20 : vector<128x256xf32> to vector<128x256xbf16>
      %c0_16 = arith.constant 0 : index
      %c0_17 = arith.constant 0 : index
      %22 = vector.load %arg9[%c0_16, %c0_17] : memref<128x256xbf16, #tpu.memory_space<vmem>>, vector<128x256xbf16>
      tpu.vector_store %arg9[%c0_16, %c0_17], %21 {strides = array<i32>} : memref<128x256xbf16, #tpu.memory_space<vmem>>, vector<128x256xbf16>,
    } else {
    }
    %c0_i32_4 = arith.constant 0 : i32
    %8 = arith.cmpi sgt, %arg1, %c0_i32_4 : i32
    %9 = arith.extui %8 : i1 to i32
    %c0_i32_5 = arith.constant 0 : i32
    %10 = arith.cmpi ne, %9, %c0_i32_5 : i32
    scf.if %10 {
      %c0_7 = arith.constant 0 : index
      %c0_8 = arith.constant 0 : index
      %14 = vector.load %arg10[%c0_7, %c0_8] : memref<128x256xf32, #tpu.memory_space<vmem>>, vector<128x256xf32>
      %15 = arith.addf %14, %4 : vector<128x256xf32>
      %c0_9 = arith.constant 0 : index
      %c0_10 = arith.constant 0 : index
      %16 = vector.load %arg10[%c0_9, %c0_10] : memref<128x256xf32, #tpu.memory_space<vmem>>, vector<128x256xf32>
      tpu.vector_store %arg10[%c0_9, %c0_10], %15 {strides = array<i32>} : memref<128x256xf32, #tpu.memory_space<vmem>>, vector<128x256xf32>,
    } else {
    }
    %c2_i32 = arith.constant 2 : i32
    %11 = arith.cmpi eq, %arg1, %c2_i32 : i32
    %12 = arith.extui %11 : i1 to i32
    %c0_i32_6 = arith.constant 0 : i32
    %13 = arith.cmpi ne, %12, %c0_i32_6 : i32
    scf.if %13 {
      %c0_7 = arith.constant 0 : index
      %c0_8 = arith.constant 0 : index
      %14 = vector.load %arg10[%c0_7, %c0_8] : memref<128x256xf32, #tpu.memory_space<vmem>>, vector<128x256xf32>
      %c0_9 = arith.constant 0 : index
      %c0_10 = arith.constant 0 : index
      %15 = vector.load %arg4[%c0_9, %c0_10] : memref<128x1xf32, #tpu.memory_space<vmem>>, vector<128x1xf32>
      %16 = vector.broadcast %15 : vector<128x1xf32> to vector<128x256xf32>
      %17 = arith.mulf %14, %16 : vector<128x256xf32>
      %18 = arith.truncf %17 : vector<128x256xf32> to vector<128x256xbf16>
      %c0_11 = arith.constant 0 : index
      %c0_12 = arith.constant 0 : index
      %19 = vector.load %arg6[%c0_11, %c0_12] : memref<256x256xbf16, #tpu.memory_space<vmem>>, vector<256x256xbf16>
      %cst_13 = arith.constant dense<0.000000e+00> : vector<128x256xf32>
      %20 = tpu.matmul %18, %19, %cst_13 {dimension_numbers = #tpu.dot_dimension_numbers<[1], [0], [0], [1], [0, 0, 1, 1], [], []>} : vector<128x256xbf16>, vector<256x256xbf16>, vector<128x256xf32> -> vector<128x256xf32>
      %c0_14 = arith.constant 0 : index
      %c0_15 = arith.constant 0 : index
      %21 = vector.load %arg9[%c0_14, %c0_15] : memref<128x256xbf16, #tpu.memory_space<vmem>>, vector<128x256xbf16>
      %22 = arith.extf %21 : vector<128x256xbf16> to vector<128x256xf32>
      %23 = arith.addf %20, %22 : vector<128x256xf32>
      %cst_16 = arith.constant 0.000000e+00 : f32
      %24 = vector.broadcast %cst_16 : f32 to vector<128x256xf32>
      %25 = arith.maximumf %23, %24 : vector<128x256xf32>
      %26 = arith.truncf %25 : vector<128x256xf32> to vector<128x256xbf16>
      %c0_17 = arith.constant 0 : index
      %c0_18 = arith.constant 0 : index
      %27 = vector.load %arg9[%c0_17, %c0_18] : memref<128x256xbf16, #tpu.memory_space<vmem>>, vector<128x256xbf16>
      tpu.vector_store %arg9[%c0_17, %c0_18], %26 {strides = array<i32>} : memref<128x256xbf16, #tpu.memory_space<vmem>>, vector<128x256xbf16>,
    } else {
    }
    return
  }
  func.func @transform_0(%arg0: i32, %arg1: i32) -> (i32, i32) {
    %c0_i32 = arith.constant 0 : i32
    return %arg0, %arg1 : i32, i32
  }
  func.func @transform_1(%arg0: i32, %arg1: i32) -> (i32, i32) {
    %c0_i32 = arith.constant 0 : i32
    %c0_i32_0 = arith.constant 0 : i32
    return %arg1, %c0_i32 : i32, i32
  }
  func.func @transform_2(%arg0: i32, %arg1: i32) -> (i32, i32) {
    %c0_i32 = arith.constant 0 : i32
    %c0_i32_0 = arith.constant 0 : i32
    return %arg0, %c0_i32 : i32, i32
  }
  func.func @transform_3(%arg0: i32, %arg1: i32) -> (i32, i32) {
    %c0_i32 = arith.constant 0 : i32
    %c0_i32_0 = arith.constant 0 : i32
    return %arg0, %c0_i32 : i32, i32
  }
  func.func @transform_4(%arg0: i32, %arg1: i32) -> (i32, i32) {
    %c0_i32 = arith.constant 0 : i32
    %c0_i32_0 = arith.constant 0 : i32
    %c0_i32_1 = arith.constant 0 : i32
    return %c0_i32, %c0_i32_0 : i32, i32
  }
  func.func @transform_5(%arg0: i32, %arg1: i32) -> (i32, i32) {
    %c0_i32 = arith.constant 0 : i32
    %c0_i32_0 = arith.constant 0 : i32
    %c0_i32_1 = arith.constant 0 : i32
    return %c0_i32, %c0_i32_0 : i32, i32
  }
  func.func @transform_6(%arg0: i32, %arg1: i32) -> (i32, i32) {
    %c0_i32 = arith.constant 0 : i32
    %c0_i32_0 = arith.constant 0 : i32
    %c0_i32_1 = arith.constant 0 : i32
    return %c0_i32, %c0_i32_0 : i32, i32
  }
  func.func @transform_7(%arg0: i32, %arg1: i32) -> (i32, i32) {
    %c0_i32 = arith.constant 0 : i32
    %c0_i32_0 = arith.constant 0 : i32
    return %arg0, %c0_i32 : i32, i32
  }
}

module attributes {stable_mosaic.version = 11 : i64} {
  func.func @_project_kernel(%arg0: i32, %arg1: memref<128x256xbf16, #tpu.memory_space<vmem>>, %arg2: memref<256x128xbf16, #tpu.memory_space<vmem>>, %arg3: memref<128x128xbf16, #tpu.memory_space<vmem>>) attributes {dimension_semantics = [#tpu.dimension_semantics<parallel>], iteration_bounds = array<i64: 2>, scalar_prefetch = 0 : i64, scratch_operands = 0 : i64, tpu.core_type = #tpu.core_type<tc>, window_params = [{transform_indices = @transform_0, window_bounds = array<i64: 128, 256>}, {pipeline_mode = #tpu.pipeline_mode<synchronous>, transform_indices = @transform_1, window_bounds = array<i64: 256, 128>}, {transform_indices = @transform_2, window_bounds = array<i64: 128, 128>}]} {
    %c0 = arith.constant 0 : index
    %c0_0 = arith.constant 0 : index
    %0 = vector.load %arg1[%c0, %c0_0] : memref<128x256xbf16, #tpu.memory_space<vmem>>, vector<128x256xbf16>
    %c0_1 = arith.constant 0 : index
    %c0_2 = arith.constant 0 : index
    %1 = vector.load %arg2[%c0_1, %c0_2] : memref<256x128xbf16, #tpu.memory_space<vmem>>, vector<256x128xbf16>
    %cst = arith.constant dense<0.000000e+00> : vector<128x128xf32>
    %2 = tpu.matmul %0, %1, %cst {dimension_numbers = #tpu.dot_dimension_numbers<[1], [0], [0], [1], [0, 0, 1, 1], [], []>} : vector<128x256xbf16>, vector<256x128xbf16>, vector<128x128xf32> -> vector<128x128xf32>
    %3 = arith.truncf %2 : vector<128x128xf32> to vector<128x128xbf16>
    %c0_3 = arith.constant 0 : index
    %c0_4 = arith.constant 0 : index
    %4 = vector.load %arg3[%c0_3, %c0_4] : memref<128x128xbf16, #tpu.memory_space<vmem>>, vector<128x128xbf16>
    tpu.vector_store %arg3[%c0_3, %c0_4], %3 {strides = array<i32>} : memref<128x128xbf16, #tpu.memory_space<vmem>>, vector<128x128xbf16>,
    return
  }
  func.func @transform_0(%arg0: i32) -> (i32, i32) {
    %c0_i32 = arith.constant 0 : i32
    %c0_i32_0 = arith.constant 0 : i32
    return %arg0, %c0_i32 : i32, i32
  }
  func.func @transform_1(%arg0: i32) -> (i32, i32) {
    %c0_i32 = arith.constant 0 : i32
    %c0_i32_0 = arith.constant 0 : i32
    %c0_i32_1 = arith.constant 0 : i32
    return %c0_i32, %c0_i32_0 : i32, i32
  }
  func.func @transform_2(%arg0: i32) -> (i32, i32) {
    %c0_i32 = arith.constant 0 : i32
    %c0_i32_0 = arith.constant 0 : i32
    return %arg0, %c0_i32 : i32, i32
  }
}

module attributes {stable_mosaic.version = 11 : i64} {
  func.func @_sage_layer_proj_first_kernel(%arg0: i32, %arg1: i32, %arg2: memref<128x128xi8, #tpu.memory_space<vmem>>, %arg3: memref<128x128xbf16, #tpu.memory_space<vmem>>, %arg4: memref<128x1xf32, #tpu.memory_space<vmem>>, %arg5: memref<128x256xbf16, #tpu.memory_space<vmem>>, %arg6: memref<256x128xbf16, #tpu.memory_space<vmem>>, %arg7: memref<1x128xf32, #tpu.memory_space<vmem>>, %arg8: memref<128x128xf32, #tpu.memory_space<vmem>>, %arg9: memref<128x128xf32, #tpu.memory_space<vmem>>) attributes {dimension_semantics = [#tpu.dimension_semantics<parallel>, #tpu.dimension_semantics<arbitrary>], iteration_bounds = array<i64: 1, 2>, scalar_prefetch = 0 : i64, scratch_operands = 1 : i64, tpu.core_type = #tpu.core_type<tc>, window_params = [{transform_indices = @transform_0, window_bounds = array<i64: 128, 128>}, {transform_indices = @transform_1, window_bounds = array<i64: 128, 128>}, {transform_indices = @transform_2, window_bounds = array<i64: 128, 1>}, {transform_indices = @transform_3, window_bounds = array<i64: 128, 256>}, {pipeline_mode = #tpu.pipeline_mode<synchronous>, transform_indices = @transform_4, window_bounds = array<i64: 256, 128>}, {pipeline_mode = #tpu.pipeline_mode<synchronous>, transform_indices = @transform_5, window_bounds = array<i64: 1, 128>}, {transform_indices = @transform_6, window_bounds = array<i64: 128, 128>}]} {
    %c0 = arith.constant 0 : index
    %c0_0 = arith.constant 0 : index
    %0 = vector.load %arg2[%c0, %c0_0] : memref<128x128xi8, #tpu.memory_space<vmem>>, vector<128x128xi8>
    %1 = arith.sitofp %0 : vector<128x128xi8> to vector<128x128xf32>
    %2 = arith.truncf %1 : vector<128x128xf32> to vector<128x128xbf16>
    %c0_1 = arith.constant 0 : index
    %c0_2 = arith.constant 0 : index
    %3 = vector.load %arg3[%c0_1, %c0_2] : memref<128x128xbf16, #tpu.memory_space<vmem>>, vector<128x128xbf16>
    %cst = arith.constant dense<0.000000e+00> : vector<128x128xf32>
    %4 = tpu.matmul %2, %3, %cst {dimension_numbers = #tpu.dot_dimension_numbers<[1], [0], [0], [1], [0, 0, 1, 1], [], []>} : vector<128x128xbf16>, vector<128x128xbf16>, vector<128x128xf32> -> vector<128x128xf32>
    %c0_i32 = arith.constant 0 : i32
    %5 = arith.cmpi eq, %arg1, %c0_i32 : i32
    %6 = arith.extui %5 : i1 to i32
    %c0_i32_3 = arith.constant 0 : i32
    %7 = arith.cmpi ne, %6, %c0_i32_3 : i32
    scf.if %7 {
      %c0_7 = arith.constant 0 : index
      %c0_8 = arith.constant 0 : index
      %14 = vector.load %arg9[%c0_7, %c0_8] : memref<128x128xf32, #tpu.memory_space<vmem>>, vector<128x128xf32>
      tpu.vector_store %arg9[%c0_7, %c0_8], %4 {strides = array<i32>} : memref<128x128xf32, #tpu.memory_space<vmem>>, vector<128x128xf32>,
      %c0_9 = arith.constant 0 : index
      %c0_10 = arith.constant 0 : index
      %15 = vector.load %arg5[%c0_9, %c0_10] : memref<128x256xbf16, #tpu.memory_space<vmem>>, vector<128x256xbf16>
      %c0_11 = arith.constant 0 : index
      %c0_12 = arith.constant 0 : index
      %16 = vector.load %arg6[%c0_11, %c0_12] : memref<256x128xbf16, #tpu.memory_space<vmem>>, vector<256x128xbf16>
      %cst_13 = arith.constant dense<0.000000e+00> : vector<128x128xf32>
      %17 = tpu.matmul %15, %16, %cst_13 {dimension_numbers = #tpu.dot_dimension_numbers<[1], [0], [0], [1], [0, 0, 1, 1], [], []>} : vector<128x256xbf16>, vector<256x128xbf16>, vector<128x128xf32> -> vector<128x128xf32>
      %c0_14 = arith.constant 0 : index
      %c0_15 = arith.constant 0 : index
      %18 = vector.load %arg7[%c0_14, %c0_15] : memref<1x128xf32, #tpu.memory_space<vmem>>, vector<1x128xf32>
      %19 = vector.broadcast %18 : vector<1x128xf32> to vector<128x128xf32>
      %20 = arith.addf %17, %19 : vector<128x128xf32>
      %c0_16 = arith.constant 0 : index
      %c0_17 = arith.constant 0 : index
      %21 = vector.load %arg8[%c0_16, %c0_17] : memref<128x128xf32, #tpu.memory_space<vmem>>, vector<128x128xf32>
      tpu.vector_store %arg8[%c0_16, %c0_17], %20 {strides = array<i32>} : memref<128x128xf32, #tpu.memory_space<vmem>>, vector<128x128xf32>,
    } else {
    }
    %c0_i32_4 = arith.constant 0 : i32
    %8 = arith.cmpi sgt, %arg1, %c0_i32_4 : i32
    %9 = arith.extui %8 : i1 to i32
    %c0_i32_5 = arith.constant 0 : i32
    %10 = arith.cmpi ne, %9, %c0_i32_5 : i32
    scf.if %10 {
      %c0_7 = arith.constant 0 : index
      %c0_8 = arith.constant 0 : index
      %14 = vector.load %arg9[%c0_7, %c0_8] : memref<128x128xf32, #tpu.memory_space<vmem>>, vector<128x128xf32>
      %15 = arith.addf %14, %4 : vector<128x128xf32>
      %c0_9 = arith.constant 0 : index
      %c0_10 = arith.constant 0 : index
      %16 = vector.load %arg9[%c0_9, %c0_10] : memref<128x128xf32, #tpu.memory_space<vmem>>, vector<128x128xf32>
      tpu.vector_store %arg9[%c0_9, %c0_10], %15 {strides = array<i32>} : memref<128x128xf32, #tpu.memory_space<vmem>>, vector<128x128xf32>,
    } else {
    }
    %c1_i32 = arith.constant 1 : i32
    %11 = arith.cmpi eq, %arg1, %c1_i32 : i32
    %12 = arith.extui %11 : i1 to i32
    %c0_i32_6 = arith.constant 0 : i32
    %13 = arith.cmpi ne, %12, %c0_i32_6 : i32
    scf.if %13 {
      %c0_7 = arith.constant 0 : index
      %c0_8 = arith.constant 0 : index
      %14 = vector.load %arg9[%c0_7, %c0_8] : memref<128x128xf32, #tpu.memory_space<vmem>>, vector<128x128xf32>
      %c0_9 = arith.constant 0 : index
      %c0_10 = arith.constant 0 : index
      %15 = vector.load %arg4[%c0_9, %c0_10] : memref<128x1xf32, #tpu.memory_space<vmem>>, vector<128x1xf32>
      %16 = vector.broadcast %15 : vector<128x1xf32> to vector<128x128xf32>
      %17 = arith.mulf %14, %16 : vector<128x128xf32>
      %c0_11 = arith.constant 0 : index
      %c0_12 = arith.constant 0 : index
      %18 = vector.load %arg8[%c0_11, %c0_12] : memref<128x128xf32, #tpu.memory_space<vmem>>, vector<128x128xf32>
      %19 = arith.addf %17, %18 : vector<128x128xf32>
      %20 = tpu.iota {dimensions = array<i32: 1>} : vector<128x128xi32>
      %c8_i32 = arith.constant 8 : i32
      %21 = vector.broadcast %c8_i32 : i32 to vector<128x128xi32>
      %22 = arith.cmpi slt, %20, %21 : vector<128x128xi32>
      %cst_13 = arith.constant 0xFF800000 : f32
      %23 = vector.broadcast %cst_13 : f32 to vector<128x128xf32>
      %24 = arith.select %22, %19, %23 : vector<128x128xi1>, vector<128x128xf32>
      %cst_14 = arith.constant dense<0xFF800000> : vector<128xf32>
      %25 = vector.multi_reduction <maximumf>, %24, %cst_14 [1] : vector<128x128xf32> to vector<128xf32>
      %26 = vector.shape_cast %25 : vector<128xf32> to vector<128x1xf32>
      %27 = vector.broadcast %26 : vector<128x1xf32> to vector<128x128xf32>
      %28 = arith.subf %24, %27 : vector<128x128xf32>
      %29 = math.exp %28 : vector<128x128xf32>
      %cst_15 = arith.constant dense<0.000000e+00> : vector<128xf32>
      %30 = vector.multi_reduction <add>, %29, %cst_15 [1] : vector<128x128xf32> to vector<128xf32>
      %31 = vector.shape_cast %30 : vector<128xf32> to vector<128x1xf32>
      %32 = math.log %31 : vector<128x1xf32>
      %33 = vector.broadcast %32 : vector<128x1xf32> to vector<128x128xf32>
      %34 = arith.subf %28, %33 : vector<128x128xf32>
      %c0_16 = arith.constant 0 : index
      %c0_17 = arith.constant 0 : index
      %35 = vector.load %arg8[%c0_16, %c0_17] : memref<128x128xf32, #tpu.memory_space<vmem>>, vector<128x128xf32>
      tpu.vector_store %arg8[%c0_16, %c0_17], %34 {strides = array<i32>} : memref<128x128xf32, #tpu.memory_space<vmem>>, vector<128x128xf32>,
    } else {
    }
    return
  }
  func.func @transform_0(%arg0: i32, %arg1: i32) -> (i32, i32) {
    %c0_i32 = arith.constant 0 : i32
    return %arg0, %arg1 : i32, i32
  }
  func.func @transform_1(%arg0: i32, %arg1: i32) -> (i32, i32) {
    %c0_i32 = arith.constant 0 : i32
    %c0_i32_0 = arith.constant 0 : i32
    return %arg1, %c0_i32 : i32, i32
  }
  func.func @transform_2(%arg0: i32, %arg1: i32) -> (i32, i32) {
    %c0_i32 = arith.constant 0 : i32
    %c0_i32_0 = arith.constant 0 : i32
    return %arg0, %c0_i32 : i32, i32
  }
  func.func @transform_3(%arg0: i32, %arg1: i32) -> (i32, i32) {
    %c0_i32 = arith.constant 0 : i32
    %c0_i32_0 = arith.constant 0 : i32
    return %arg0, %c0_i32 : i32, i32
  }
  func.func @transform_4(%arg0: i32, %arg1: i32) -> (i32, i32) {
    %c0_i32 = arith.constant 0 : i32
    %c0_i32_0 = arith.constant 0 : i32
    %c0_i32_1 = arith.constant 0 : i32
    return %c0_i32, %c0_i32_0 : i32, i32
  }
  func.func @transform_5(%arg0: i32, %arg1: i32) -> (i32, i32) {
    %c0_i32 = arith.constant 0 : i32
    %c0_i32_0 = arith.constant 0 : i32
    %c0_i32_1 = arith.constant 0 : i32
    return %c0_i32, %c0_i32_0 : i32, i32
  }
  func.func @transform_6(%arg0: i32, %arg1: i32) -> (i32, i32) {
    %c0_i32 = arith.constant 0 : i32
    %c0_i32_0 = arith.constant 0 : i32
    return %arg0, %c0_i32 : i32, i32
  }
}

</mosaic_0001>

<bundles_post_ra>
// kernel: run.4
= control target key start
LH: loop header
LB: loop body
LE: loop exit
PB: predicated region body
PF: predicated region fallthrough
CT: control target
= control target key end

     0   :  { %s2578_s0 = inlined_call_operand.vmem [shape: s8[384,640], index: 0, kind: input, shape index: {}]   ;;  %s2579_s1 = inlined_call_operand.vmem [shape: bf16[640,128], index: 1, kind: input, shape index: {}, may-alias: {1,3}]   ;;  %s2580_s2 = inlined_call_operand.vmem [shape: f32[384,1], index: 2, kind: input, shape index: {}]   ;;  %s2581_s3 = inlined_call_operand.vmem [shape: bf16[640,128], index: 3, kind: input, shape index: {}, may-alias: {1,3}]   ;;  %s2582_s4 = inlined_call_operand.vmem [shape: bf16[128,256], index: 4, kind: input, shape index: {}]   ;;  %s2583_s5 = inlined_call_operand.vmem [shape: bf16[128,256], index: 5, kind: input, shape index: {}]   ;;  %s2584_s6 = inlined_call_operand.vmem [shape: f32[1,256], index: 6, kind: input, shape index: {}]   ;;  %s2585_s7 = inlined_call_operand.vmem [shape: bf16[384,256], index: 7, kind: output, shape index: {}]  }
   0x1   :  { %2586 = sst [smem:[#allocation4_spill]] %s2578_s0 }
   0x2   :  { %s2166_s24 = smov 0   ;;  %s2168_s25 = smov 0  }
   0x3   :  { %s2170_s26 = smov 0   ;;  %s2172_s27 = smov 0  }
   0x4   :  { %s2174_s28 = smov 0   ;;  %s2176_s29 = smov 0  }
   0x5   :  { %s2178_s30 = smov 0  }
   0x6 LB: > { %s26_s8 = sadd.s32 1, %s2114_s28  ;;  %s29_s9 = sadd.s32 1, %s2118_s29  ;;  %s2122_s30 = sphi %s2178_s30, %s17_s30   ;;  %s2118_s29 = sphi %s2176_s29, %s2593_s29   ;;  %s2114_s28 = sphi %s2174_s28, %s2592_s28   ;;  %s2110_s27 = sphi %s2172_s27, %s2591_s27   ;;  %s2106_s26 = sphi %s2170_s26, %s2590_s26   ;;  %s2102_s25 = sphi %s2168_s25, %s2589_s25   ;;  %s2098_s24 = sphi %s2166_s24, %s2588_s24  }
   0x7   : > { %p27_p0 = scmp.ge.s32.totalorder %s26_s8, 5  ;;  %p45_p1 = scmp.ne.s32.totalorder %s2102_s25, %s2098_s24 }
   0x8   : > { %p46_p2 = scmp.eq.s32.totalorder %s2122_s30, 0  ;;  %s38_s13 = sadd.s32 1, %s2102_s25 }
   0x9   : > { %s2595_s8 = smov (%p27_p0, %s26_s8), 0  ;;  %s2597_s9 = smov (!%p27_p0, %s29_s9), %s2118_s29 }
   0xa   : > { %p47_p3 = por %p46_p2, %p45_p1  ;;  %p31_p4 = scmp.ge.s32.totalorder %s2597_s9, 3 }
   0xb   : > { %s34_s10 = ssub.s32 %s2114_s28, %s2595_s8  ;;  %p1713_p6 = scmp.ge.s32.totalorder %s2122_s30, 15 }
   0xc   : > { %s2599_s9 = smov (%p31_p4, %s2597_s9), 0 }
   0xd   : > { %s33_s11 = ssub.s32 %s2118_s29, %s2599_s9  ;;  %247 = sbr.rel (%p1713_p6) target bundleno = 32 (0x20), region = 28 }
   0xe   : > { %s35_s12 = sor.u32 %s34_s10, %s33_s11 }
   0xf   : > { %p36_p5 = scmp.eq.s32.totalorder %s35_s12, 0 }
  0x11   : > { %s2217_s14 = scalar_select %p36_p5, %s2102_s25, %s38_s13  }
  0x14   : > { %250 = sbr.rel (!%p47_p3) target bundleno = 32 (0x20), region = 32  ;;  %s252_s15 = sand.u32 (%p47_p3), 1, %s2102_s25  }
  0x15   : > { %s1943_s16 = smul.u32 (%p47_p3), 20, %s2118_s29  ;;  %s1714_s17 = sshll.u32 (%p47_p3), %s252_s15, 5 }
  0x16   : > { %s2587_s0 = sld [smem:[#allocation4_spill]] (%p47_p3)  ;;  %s254_s23 = scalar_lea.vmem (%p47_p3), [#allocation3], %s1714_s17 }
  0x17   : > { %s257_s18 = sadd.s32 (%p47_p3), %s2114_s28, %s1943_s16 }
  0x18   : > { %s1717_s19 = sshll.u32 (%p47_p3), %s257_s18, 3 }
  0x1c   : > { %s259_s22 = scalar_lea.vmem %s2587_s0, %s1717_s19 }
  0x1d   : > { %v293_v0 = vld [vmem:[%s259_s22] sm:$0xff]  ;;  %v295_v1 = vld [vmem:[%s259_s22 + $0x28] sm:$0xff]  ;;  %v297_v2 = vld [vmem:[%s259_s22 + $0x50] sm:$0xff] }
  0x1e   : > { %294 = vst [vmem:[%s254_s23] sm:$0xff] %v293_v0  ;;  %296 = vst [vmem:[%s254_s23 + $0x8] sm:$0xff] %v295_v1  ;;  %v299_v3 = vld [vmem:[%s259_s22 + $0x78] sm:$0xff] }
  0x1f   : > { %298 = vst [vmem:[%s254_s23 + $0x10] sm:$0xff] %v297_v2  ;;  %300 = vst [vmem:[%s254_s23 + $0x18] sm:$0xff] %v299_v3 }
  0x20 PF: > { %p1718_p7 = scmp.ge.s32.totalorder %s2122_s30, 1  ;;  %p332_p8 = scmp.lt.s32.totalorder %s2122_s30, 16 }
  0x22   : > { %p333_p9 = pnand %p1718_p7, %p332_p8 }
  0x23   : > { %s1720_s10 = sshll.u32 (!%p333_p9), %s2106_s26, 4  ;;  %s1722_s11 = sshll.u32 (!%p333_p9), %s2110_s27, 4 }
  0x24   : > { %336 = sbr.rel (%p333_p9) target bundleno = 936 (0x3a8), region = 82  ;;  %p388_p10 = scmp.lt.s32.totalorder (!%p333_p9), %s1720_s10, 79 }
  0x25   : > { %p394_p11 = scmp.lt.s32.totalorder (!%p333_p9), %s1722_s11, 47  ;;  %p400_p12 = scmp.lt.s32.totalorder (!%p333_p9), %s1722_s11, 79 }
  0x26   : > { %s339_s15 = sand.u32 (!%p333_p9), 1, %s2098_s24   ;;  %p1737_p13 = scmp.ne.s32.totalorder (!%p333_p9), %s2106_s26, 0 }
  0x27   : > { %s1719_s24 = sshll.u32 (!%p333_p9), %s339_s15, 5 }
  0x28   : > { %s2255_s17 = scalar_lea.vmem (!%p333_p9), [#allocation3], %s1719_s24 }
  0x29   : > { %v413_v8 = vld [vmem:[%s2255_s17] sm:$0xff] (!%p333_p9)  ;;  %v415_v9 = vld [vmem:[%s2255_s17 + $0x10] sm:$0xff] (!%p333_p9)  ;;  %v414_v16 = vld [vmem:[%s2255_s17 + $0x8] sm:$0xff] (!%p333_p9) }
  0x2a   : > { %v417_v10 = vunpack.c.l.s8.bf16 (!%p333_p9), %v413_v8  ;;  %v421_v11 = vunpack.c.l.s8.bf16 (!%p333_p9), %v415_v9  ;;  %v416_v17 = vld [vmem:[%s2255_s17 + $0x18] sm:$0xff] (!%p333_p9)  ;;  %v418_v18 = vunpack.c.h.s8.bf16 (!%p333_p9), %v413_v8  ;;  %v422_v19 = vunpack.c.h.s8.bf16 (!%p333_p9), %v415_v9 }
  0x2b   : > { %s2601_s10 = smov (!%p388_p10, %s1720_s10), 79  ;;  %v419_v20 = vunpack.c.l.s8.bf16 %v414_v16  ;;  %v423_v21 = vunpack.c.l.s8.bf16 %v416_v17  ;;  %v420_v22 = vunpack.c.h.s8.bf16 %v414_v16  ;;  %v424_v23 = vunpack.c.h.s8.bf16 %v416_v17  ;;  %v2010_v40 = vld [vmem:[%s2583_s5 + $0x4] ss:$8 sps:$4 sm:$0xff] (!%p1737_p13)   ;;  %v2012_v41 = vld [vmem:[%s2583_s5] ss:$8 sps:$4 sm:$0xff] (!%p1737_p13)  }
  0x2c   : > { %s395_s12 = scalar_select %p394_p11, %s1722_s11, 47  ;;  %1879 = vmatprep.mubr.bf16.mxu0 %v417_v10  ;;  %1887 = vmatprep.mubr.bf16.mxu1 %v421_v11 }
  0x2d   : > { %s1721_s13 = sshll.u32 %s2601_s10, 2  ;;  %s2603_s11 = smov (!%p400_p12, %s1722_s11), 79  ;;  %v2124_v42 = vmov (!%p1737_p13), 0   ;;  %v2013_v43 = vld [vmem:[%s2583_s5 + $0x14] ss:$8 sps:$4 sm:$0xff] (!%p1737_p13)   ;;  %v640_v1 = vlaneseq (!%p1737_p13) }
  0x2e   : > { %s2234_s18 = scalar_lea.vmem %s2579_s1, %s1721_s13  ;;  %s1723_s19 = sshll.u32 %s395_s12, 3  ;;  %v2015_v44 = vld [vmem:[%s2583_s5 + $0x10] ss:$8 sps:$4 sm:$0xff] (!%p1737_p13)   ;;  %v2016_v45 = vld [vmem:[%s2583_s5 + $0x24] ss:$8 sps:$4 sm:$0xff] (!%p1737_p13)  }
  0x2f   : > { %s2239_s27 = scalar_lea.vmem %s2580_s2, %s1723_s19  ;;  %s2244_s0 = scalar_lea.vmem %s2585_s7, %s1723_s19  ;;  %v2002_v4 = vld [vmem:[%s2234_s18] sm:$0xff]   ;;  %v2003_v5 = vld [vmem:[%s2234_s18 + $0x8] sm:$0xff]   ;;  %v2004_v6 = vld [vmem:[%s2234_s18 + $0x10] sm:$0xff]   ;;  %v641_v2 = vshrl.u32 (!%p1737_p13), %v640_v1, 7 }
  0x30   : > { %1863 = vmatprep.subr.bf16.mxu0 %v2002_v4  ;;  %1895 = vmatprep.subr.bf16.mxu1 %v2002_v4  ;;  %s1725_s10 = sshll.u32 %s2603_s11, 2  ;;  %v2005_v7 = vld [vmem:[%s2234_s18 + $0x18] sm:$0xff]   ;;  %v2006_v12 = vld [vmem:[%s2234_s18 + $0x20] sm:$0xff]   ;;  %v2007_v13 = vld [vmem:[%s2234_s18 + $0x28] sm:$0xff]  }
  0x31   : > { %1864 = vmatpush3.bf16.msra.mxu0 %v2002_v4  ;;  %1903 = vmatpush3.bf16.msra.mxu1 %v2002_v4  ;;  %s2251_s16 = scalar_lea.vmem %s2581_s3, %s1725_s10  ;;  %v2008_v14 = vld [vmem:[%s2234_s18 + $0x30] sm:$0xff]   ;;  %v2009_v15 = vld [vmem:[%s2234_s18 + $0x38] sm:$0xff]   ;;  %v2018_v46 = vld [vmem:[%s2583_s5 + $0x20] ss:$8 sps:$4 sm:$0xff] (!%p1737_p13)   ;;  %v642_v3 = vsub.s32 (!%p1737_p13), 0, %v641_v2 }
  0x32   : > { %1865 = vmatprep.subr.bf16.mxu0 %v2003_v5  ;;  %1896 = vmatprep.subr.bf16.mxu1 %v2003_v5  ;;  %v2019_v47 = vld [vmem:[%s2583_s5 + $0x34] ss:$8 sps:$4 sm:$0xff] (!%p1737_p13)   ;;  %v2021_v48 = vld [vmem:[%s2583_s5 + $0x30] ss:$8 sps:$4 sm:$0xff] (!%p1737_p13)   ;;  %v2022_v49 = vld [vmem:[%s2583_s5 + $0x44] ss:$8 sps:$4 sm:$0xff] (!%p1737_p13)  }
  0x33   : > { %v2024_v50 = vld [vmem:[%s2583_s5 + $0x40] ss:$8 sps:$4 sm:$0xff] (!%p1737_p13)   ;;  %v2025_v51 = vld [vmem:[%s2583_s5 + $0x54] ss:$8 sps:$4 sm:$0xff] (!%p1737_p13)   ;;  %v2027_v52 = vld [vmem:[%s2583_s5 + $0x50] ss:$8 sps:$4 sm:$0xff] (!%p1737_p13)  }
  0x34   : > { %v2028_v53 = vld [vmem:[%s2583_s5 + $0x64] ss:$8 sps:$4 sm:$0xff] (!%p1737_p13)   ;;  %v2030_v54 = vld [vmem:[%s2583_s5 + $0x60] ss:$8 sps:$4 sm:$0xff] (!%p1737_p13)   ;;  %v2031_v55 = vld [vmem:[%s2583_s5 + $0x74] ss:$8 sps:$4 sm:$0xff] (!%p1737_p13)  }
  0x35   : > { %1866 = vmatpush3.bf16.msra.mxu0 %v2003_v5  ;;  %1904 = vmatpush3.bf16.msra.mxu1 %v2003_v5  ;;  %v2033_v56 = vld [vmem:[%s2583_s5 + $0x70] ss:$8 sps:$4 sm:$0xff] (!%p1737_p13)   ;;  %v2034_v57 = vld [vmem:[%s2251_s16] sm:$0xff] (!%p1737_p13)   ;;  %v2036_v59 = vld [vmem:[%s2251_s16 + $0x8] sm:$0xff] (!%p1737_p13)   ;;  %v646_v5 = vsub.s32 (!%p1737_p13), 1, %v641_v2 }
  0x36   : > { %1867 = vmatprep.subr.bf16.mxu0 %v2004_v6  ;;  %1897 = vmatprep.subr.bf16.mxu1 %v2004_v6  ;;  %v2035_v58 = vld [vmem:[%s2251_s16 + $0x20] sm:$0xff] (!%p1737_p13)   ;;  %v2037_v60 = vld [vmem:[%s2251_s16 + $0x28] sm:$0xff] (!%p1737_p13)   ;;  %v2038_v61 = vld [vmem:[%s2251_s16 + $0x10] sm:$0xff] (!%p1737_p13)  }
  0x37   : > { %v2039_v62 = vld [vmem:[%s2251_s16 + $0x30] sm:$0xff] (!%p1737_p13)   ;;  %v2040_v63 = vld [vmem:[%s2251_s16 + $0x18] sm:$0xff] (!%p1737_p13)   ;;  %v638_v4 = vld [vmem:[%s2584_s6] sm:$0x3] (!%p1737_p13) }
  0x38   : > { %v2041_v0 = vld [vmem:[%s2251_s16 + $0x38] sm:$0xff] (!%p1737_p13)  }
  0x39   : > { %1868 = vmatpush3.bf16.msra.mxu0 %v2004_v6  ;;  %1905 = vmatpush3.bf16.msra.mxu1 %v2004_v6  ;;  %v2381_v6 = vrot.slane (!%p1737_p13), %v638_v4, %v642_v3 }
  0x3a   : > { %1869 = vmatprep.subr.bf16.mxu0 %v2005_v7  ;;  %1898 = vmatprep.subr.bf16.mxu1 %v2005_v7 }
  0x3d   : > { %1870 = vmatpush3.bf16.msra.mxu0 %v2005_v7  ;;  %1906 = vmatpush3.bf16.msra.mxu1 %v2005_v7  ;;  %v2383_v7 = vrot.slane (!%p1737_p13), %v638_v4, %v646_v5 }
  0x3e   : > { %1871 = vmatprep.subr.bf16.mxu0 %v2006_v12  ;;  %1899 = vmatprep.subr.bf16.mxu1 %v2006_v12 }
  0x41   : > { %1872 = vmatpush3.bf16.msra.mxu0 %v2006_v12  ;;  %1907 = vmatpush3.bf16.msra.mxu1 %v2006_v12 }
  0x42   : > { %1873 = vmatprep.subr.bf16.mxu0 %v2007_v13  ;;  %1900 = vmatprep.subr.bf16.mxu1 %v2007_v13 }
  0x45   : > { %1874 = vmatpush3.bf16.msra.mxu0 %v2007_v13  ;;  %1908 = vmatpush3.bf16.msra.mxu1 %v2007_v13 }
  0x46   : > { %1875 = vmatprep.subr.bf16.mxu0 %v2008_v14  ;;  %1901 = vmatprep.subr.bf16.mxu1 %v2008_v14 }
  0x49   : > { %1876 = vmatpush3.bf16.msra.mxu0 %v2008_v14  ;;  %1909 = vmatpush3.bf16.msra.mxu1 %v2008_v14 }
  0x4a   : > { %1877 = vmatprep.subr.bf16.mxu0 %v2009_v15  ;;  %1902 = vmatprep.subr.bf16.mxu1 %v2009_v15 }
  0x4d   : > { %1878 = vmatpush3.bf16.msra.mxu0 %v2009_v15  ;;  %1910 = vmatpush3.bf16.msra.mxu1 %v2009_v15 }
  0x4e   : > { %778 = vmatprep.subr.bf16.mxu0 (!%p1737_p13), %v2010_v40  ;;  %1911 = vmatprep.subr.bf16.mxu1 (!%p1737_p13), %v2010_v40 }
  0x50   : > { %1880 = vmatmul.mubr.bf16.vlgmr.msra.gmra.mrb[0].mxu0 %v418_v18  ;;  %1888 = vmatmul.mubr.bf16.vlgmr.msra.gmra.mrb[0].mxu1 %v422_v19 }
  0x51   : > { %1883 = vmatprep.mubr.bf16.mxu0 %v419_v20  ;;  %1891 = vmatprep.mubr.bf16.mxu1 %v423_v21 }
  0x52   : > { %779 = vmatpush1.bf16.msra.mxu0 (!%p1737_p13), %v2012_v41  ;;  %1919 = vmatpush1.bf16.msra.mxu1 (!%p1737_p13), %v2012_v41 }
  0x53   : > { %780 = vmatprep.subr.bf16.mxu0 (!%p1737_p13), %v2013_v43  ;;  %1912 = vmatprep.subr.bf16.mxu1 (!%p1737_p13), %v2013_v43 }
  0x56   : > { %781 = vmatpush1.bf16.msra.mxu0 (!%p1737_p13), %v2015_v44  ;;  %1920 = vmatpush1.bf16.msra.mxu1 (!%p1737_p13), %v2015_v44 }
  0x57   : > { %782 = vmatprep.subr.bf16.mxu0 (!%p1737_p13), %v2016_v45  ;;  %1913 = vmatprep.subr.bf16.mxu1 (!%p1737_p13), %v2016_v45 }
  0x58   : > { %1884 = vmatmul.mubr.bf16.gmra.mrb[4].mxu0 %v420_v22  ;;  %1892 = vmatmul.mubr.bf16.gmra.mrb[4].mxu1 %v424_v23 }
  0x59   : > { %810 = vmatprep.mubr.bf16.mxu0 (!%p1737_p13), %v2124_v42  ;;  %850 = vmatprep.mubr.bf16.mxu1 (!%p1737_p13), %v2124_v42 }
  0x5a   : > { %783 = vmatpush1.bf16.msra.mxu0 (!%p1737_p13), %v2018_v46  ;;  %1921 = vmatpush1.bf16.msra.mxu1 (!%p1737_p13), %v2018_v46 }
  0x5b   : > { %784 = vmatprep.subr.bf16.mxu0 (!%p1737_p13), %v2019_v47  ;;  %1914 = vmatprep.subr.bf16.mxu1 (!%p1737_p13), %v2019_v47 }
  0x5e   : > { %785 = vmatpush1.bf16.msra.mxu0 (!%p1737_p13), %v2021_v48  ;;  %1922 = vmatpush1.bf16.msra.mxu1 (!%p1737_p13), %v2021_v48 }
  0x5f   : > { %786 = vmatprep.subr.bf16.mxu0 (!%p1737_p13), %v2022_v49  ;;  %1915 = vmatprep.subr.bf16.mxu1 (!%p1737_p13), %v2022_v49 }
  0x62   : > { %787 = vmatpush1.bf16.msra.mxu0 (!%p1737_p13), %v2024_v50  ;;  %1923 = vmatpush1.bf16.msra.mxu1 (!%p1737_p13), %v2024_v50 }
  0x63   : > { %788 = vmatprep.subr.bf16.mxu0 (!%p1737_p13), %v2025_v51  ;;  %1916 = vmatprep.subr.bf16.mxu1 (!%p1737_p13), %v2025_v51 }
  0x66   : > { %789 = vmatpush1.bf16.msra.mxu0 (!%p1737_p13), %v2027_v52  ;;  %1924 = vmatpush1.bf16.msra.mxu1 (!%p1737_p13), %v2027_v52 }
  0x67   : > { %790 = vmatprep.subr.bf16.mxu0 (!%p1737_p13), %v2028_v53  ;;  %1917 = vmatprep.subr.bf16.mxu1 (!%p1737_p13), %v2028_v53 }
  0x6a   : > { %791 = vmatpush1.bf16.msra.mxu0 (!%p1737_p13), %v2030_v54  ;;  %1925 = vmatpush1.bf16.msra.mxu1 (!%p1737_p13), %v2030_v54 }
  0x6b   : > { %792 = vmatprep.subr.bf16.mxu0 (!%p1737_p13), %v2031_v55  ;;  %1918 = vmatprep.subr.bf16.mxu1 (!%p1737_p13), %v2031_v55 }
  0x6e   : > { %793 = vmatpush1.bf16.msra.mxu0 (!%p1737_p13), %v2033_v56  ;;  %1926 = vmatpush1.bf16.msra.mxu1 (!%p1737_p13), %v2033_v56 }
 0x123   : > { %v2265_v24 = vpop.f32.mrb[0].mxu0  ;;  %v2267_v25 = vpop.f32.mrb[0].mxu1 }
 0x124   : > { %v2269_v26 = vpop.f32.mrb[1].mxu0  ;;  %v2271_v27 = vpop.f32.mrb[1].mxu1  ;;  %592 = vst [vmem:[#allocation2 + $0x10] sm:$0xff] (!%p1737_p13), %v2265_v24  ;;  %600 = vst [vmem:[#allocation2 + $0x50] sm:$0xff] (!%p1737_p13), %v2267_v25 }
 0x125   : > { %v2273_v28 = vpop.f32.mrb[2].mxu0  ;;  %v2275_v29 = vpop.f32.mrb[2].mxu1  ;;  %590 = vst [vmem:[#allocation2] sm:$0xff] (!%p1737_p13), %v2269_v26  ;;  %598 = vst [vmem:[#allocation2 + $0x40] sm:$0xff] (!%p1737_p13), %v2271_v27 }
 0x126   : > { %v2277_v30 = vpop.f32.mrb[3].mxu0  ;;  %v2279_v31 = vpop.f32.mrb[3].mxu1  ;;  %593 = vst [vmem:[#allocation2 + $0x18] sm:$0xff] (!%p1737_p13), %v2273_v28  ;;  %601 = vst [vmem:[#allocation2 + $0x58] sm:$0xff] (!%p1737_p13), %v2275_v29  ;;  %811 = vmatmul.mubr.bf16.vlgmr.msra.gmra.mrb[0].mxu0 (!%p1737_p13), %v2034_v57  ;;  %851 = vmatmul.mubr.bf16.vlgmr.msra.gmra.mrb[0].mxu1 (!%p1737_p13), %v2035_v58 }
 0x127   : > { %591 = vst [vmem:[#allocation2 + $0x8] sm:$0xff] (!%p1737_p13), %v2277_v30  ;;  %599 = vst [vmem:[#allocation2 + $0x48] sm:$0xff] (!%p1737_p13), %v2279_v31  ;;  %820 = vmatprep.mubr.bf16.mxu0 (!%p1737_p13), %v2124_v42  ;;  %860 = vmatprep.mubr.bf16.mxu1 (!%p1737_p13), %v2124_v42 }
 0x128   : > { %589 = sbr.rel (%p1737_p13) target bundleno = 538 (0x21a), region = 90 }
 0x12b   : > { %v2281_v32 = vpop.f32.mrb[4].mxu0  ;;  %v2283_v33 = vpop.f32.mrb[4].mxu1 }
 0x12c   : > { %v2285_v34 = vpop.f32.mrb[5].mxu0  ;;  %v2287_v35 = vpop.f32.mrb[5].mxu1  ;;  %596 = vst [vmem:[#allocation2 + $0x30] sm:$0xff] (!%p1737_p13), %v2281_v32  ;;  %604 = vst [vmem:[#allocation2 + $0x70] sm:$0xff] (!%p1737_p13), %v2283_v33 }
 0x12d   : > { %v2289_v36 = vpop.f32.mrb[6].mxu0  ;;  %v2291_v37 = vpop.f32.mrb[6].mxu1  ;;  %594 = vst [vmem:[#allocation2 + $0x20] sm:$0xff] (!%p1737_p13), %v2285_v34  ;;  %602 = vst [vmem:[#allocation2 + $0x60] sm:$0xff] (!%p1737_p13), %v2287_v35 }
 0x12e   : > { %v2293_v38 = vpop.f32.mrb[7].mxu0  ;;  %v2295_v39 = vpop.f32.mrb[7].mxu1  ;;  %597 = vst [vmem:[#allocation2 + $0x38] sm:$0xff] (!%p1737_p13), %v2289_v36  ;;  %605 = vst [vmem:[#allocation2 + $0x78] sm:$0xff] (!%p1737_p13), %v2291_v37  ;;  %821 = vmatmul.mubr.bf16.gmra.mrb[4].mxu0 (!%p1737_p13), %v2036_v59  ;;  %861 = vmatmul.mubr.bf16.gmra.mrb[4].mxu1 (!%p1737_p13), %v2037_v60 }
 0x12f   : > { %595 = vst [vmem:[#allocation2 + $0x28] sm:$0xff] %v2293_v38  ;;  %603 = vst [vmem:[#allocation2 + $0x68] sm:$0xff] %v2295_v39  ;;  %830 = vmatprep.mubr.bf16.mxu0 %v2124_v42  ;;  %870 = vmatprep.mubr.bf16.mxu1 %v2124_v42 }
 0x136   : > { %831 = vmatmul.mubr.bf16.gmra.mrb[8].mxu0 %v2038_v61  ;;  %871 = vmatmul.mubr.bf16.gmra.mrb[8].mxu1 %v2039_v62 }
 0x137   : > { %840 = vmatprep.mubr.bf16.mxu0 %v2124_v42  ;;  %880 = vmatprep.mubr.bf16.mxu1 %v2124_v42 }
 0x13e   : > { %841 = vmatmul.mubr.bf16.gmra.mrb[12].mxu0 %v2040_v63  ;;  %881 = vmatmul.mubr.bf16.gmra.mrb[12].mxu1 %v2041_v0 }
 0x1f9   : > { %v812_v8 = vpop.f32.mrb[0].mxu0  ;;  %v852_v9 = vpop.f32.mrb[0].mxu1 }
 0x1fa   : > { %v813_v10 = vadd.f32 %v812_v8, %v2381_v6  ;;  %v853_v11 = vadd.f32 %v852_v9, %v2381_v6  ;;  %v814_v12 = vpop.f32.mrb[1].mxu0  ;;  %v854_v13 = vpop.f32.mrb[1].mxu1 }
 0x1fb   : > { %v815_v14 = vadd.f32 %v814_v12, %v2383_v7  ;;  %v855_v15 = vadd.f32 %v854_v13, %v2383_v7  ;;  %v816_v16 = vpop.f32.mrb[2].mxu0  ;;  %v856_v17 = vpop.f32.mrb[2].mxu1 }
 0x1fc   : > { %v817_v18 = vadd.f32 %v816_v16, %v2381_v6  ;;  %v857_v19 = vadd.f32 %v856_v17, %v2381_v6  ;;  %v818_v20 = vpop.f32.mrb[3].mxu0  ;;  %v858_v21 = vpop.f32.mrb[3].mxu1 }
 0x1fd   : > { %v1815_v22 = vpack.c.bf16 %v815_v14, %v813_v10  ;;  %v1823_v23 = vpack.c.bf16 %v855_v15, %v853_v11  ;;  %v819_v40 = vadd.f32 %v818_v20, %v2383_v7  ;;  %v859_v41 = vadd.f32 %v858_v21, %v2383_v7 }
 0x1ff   : > { %987 = vst [vmem:[%s2244_s0] sm:$0xff] %v1815_v22  ;;  %995 = vst [vmem:[%s2244_s0 + $0x40] sm:$0xff] %v1823_v23  ;;  %v1816_v42 = vpack.c.bf16 %v819_v40, %v817_v18  ;;  %v1824_v43 = vpack.c.bf16 %v859_v41, %v857_v19 }
 0x201   : > { %988 = vst [vmem:[%s2244_s0 + $0x8] sm:$0xff] %v1816_v42  ;;  %996 = vst [vmem:[%s2244_s0 + $0x48] sm:$0xff] %v1824_v43  ;;  %v822_v44 = vpop.f32.mrb[4].mxu0  ;;  %v862_v45 = vpop.f32.mrb[4].mxu1 }
 0x202   : > { %v823_v46 = vadd.f32 %v822_v44, %v2381_v6  ;;  %v863_v47 = vadd.f32 %v862_v45, %v2381_v6  ;;  %v824_v48 = vpop.f32.mrb[5].mxu0  ;;  %v864_v49 = vpop.f32.mrb[5].mxu1 }
 0x203   : > { %v825_v50 = vadd.f32 %v824_v48, %v2383_v7  ;;  %v865_v51 = vadd.f32 %v864_v49, %v2383_v7  ;;  %v826_v52 = vpop.f32.mrb[6].mxu0  ;;  %v866_v53 = vpop.f32.mrb[6].mxu1 }
 0x204   : > { %v827_v54 = vadd.f32 %v826_v52, %v2381_v6  ;;  %v867_v55 = vadd.f32 %v866_v53, %v2381_v6  ;;  %v828_v56 = vpop.f32.mrb[7].mxu0  ;;  %v868_v57 = vpop.f32.mrb[7].mxu1 }
 0x205   : > { %v1817_v58 = vpack.c.bf16 %v825_v50, %v823_v46  ;;  %v1825_v59 = vpack.c.bf16 %v865_v51, %v863_v47  ;;  %v829_v60 = vadd.f32 %v828_v56, %v2383_v7  ;;  %v869_v61 = vadd.f32 %v868_v57, %v2383_v7 }
 0x207   : > { %989 = vst [vmem:[%s2244_s0 + $0x10] sm:$0xff] %v1817_v58  ;;  %997 = vst [vmem:[%s2244_s0 + $0x50] sm:$0xff] %v1825_v59  ;;  %v1818_v62 = vpack.c.bf16 %v829_v60, %v827_v54  ;;  %v1826_v63 = vpack.c.bf16 %v869_v61, %v867_v55 }
 0x209   : > { %990 = vst [vmem:[%s2244_s0 + $0x18] sm:$0xff] %v1818_v62  ;;  %998 = vst [vmem:[%s2244_s0 + $0x58] sm:$0xff] %v1826_v63  ;;  %v832_v0 = vpop.f32.mrb[8].mxu0  ;;  %v872_v1 = vpop.f32.mrb[8].mxu1 }
 0x20a   : > { %v833_v2 = vadd.f32 %v832_v0, %v2381_v6  ;;  %v873_v3 = vadd.f32 %v872_v1, %v2381_v6  ;;  %v834_v4 = vpop.f32.mrb[9].mxu0  ;;  %v874_v5 = vpop.f32.mrb[9].mxu1 }
 0x20b   : > { %v835_v8 = vadd.f32 %v834_v4, %v2383_v7  ;;  %v875_v9 = vadd.f32 %v874_v5, %v2383_v7  ;;  %v836_v10 = vpop.f32.mrb[10].mxu0  ;;  %v876_v11 = vpop.f32.mrb[10].mxu1 }
 0x20c   : > { %v837_v12 = vadd.f32 %v836_v10, %v2381_v6  ;;  %v877_v13 = vadd.f32 %v876_v11, %v2381_v6  ;;  %v838_v14 = vpop.f32.mrb[11].mxu0  ;;  %v878_v15 = vpop.f32.mrb[11].mxu1 }
 0x20d   : > { %v1819_v16 = vpack.c.bf16 %v835_v8, %v833_v2  ;;  %v1827_v17 = vpack.c.bf16 %v875_v9, %v873_v3  ;;  %v839_v18 = vadd.f32 %v838_v14, %v2383_v7  ;;  %v879_v19 = vadd.f32 %v878_v15, %v2383_v7 }
 0x20f   : > { %991 = vst [vmem:[%s2244_s0 + $0x20] sm:$0xff] %v1819_v16  ;;  %999 = vst [vmem:[%s2244_s0 + $0x60] sm:$0xff] %v1827_v17  ;;  %v1820_v20 = vpack.c.bf16 %v839_v18, %v837_v12  ;;  %v1828_v21 = vpack.c.bf16 %v879_v19, %v877_v13 }
 0x211   : > { %992 = vst [vmem:[%s2244_s0 + $0x28] sm:$0xff] %v1820_v20  ;;  %1000 = vst [vmem:[%s2244_s0 + $0x68] sm:$0xff] %v1828_v21  ;;  %v842_v22 = vpop.f32.mrb[12].mxu0  ;;  %v882_v23 = vpop.f32.mrb[12].mxu1 }
 0x212   : > { %v843_v40 = vadd.f32 %v842_v22, %v2381_v6  ;;  %v883_v41 = vadd.f32 %v882_v23, %v2381_v6  ;;  %v844_v42 = vpop.f32.mrb[13].mxu0  ;;  %v884_v43 = vpop.f32.mrb[13].mxu1 }
 0x213   : > { %v845_v44 = vadd.f32 %v844_v42, %v2383_v7  ;;  %v885_v45 = vadd.f32 %v884_v43, %v2383_v7  ;;  %v846_v46 = vpop.f32.mrb[14].mxu0  ;;  %v886_v47 = vpop.f32.mrb[14].mxu1 }
 0x214   : > { %v847_v48 = vadd.f32 %v846_v46, %v2381_v6  ;;  %v887_v49 = vadd.f32 %v886_v47, %v2381_v6  ;;  %v848_v50 = vpop.f32.mrb[15].mxu0  ;;  %v888_v51 = vpop.f32.mrb[15].mxu1 }
 0x215   : > { %v1821_v52 = vpack.c.bf16 %v845_v44, %v843_v40  ;;  %v1829_v53 = vpack.c.bf16 %v885_v45, %v883_v41  ;;  %v849_v54 = vadd.f32 %v848_v50, %v2383_v7  ;;  %v889_v55 = vadd.f32 %v888_v51, %v2383_v7 }
 0x217   : > { %993 = vst [vmem:[%s2244_s0 + $0x30] sm:$0xff] %v1821_v52  ;;  %1001 = vst [vmem:[%s2244_s0 + $0x70] sm:$0xff] %v1829_v53  ;;  %v1822_v56 = vpack.c.bf16 %v849_v54, %v847_v48  ;;  %v1830_v57 = vpack.c.bf16 %v889_v55, %v887_v49 }
 0x219   : > { %994 = vst [vmem:[%s2244_s0 + $0x38] sm:$0xff] %v1822_v56  ;;  %1002 = vst [vmem:[%s2244_s0 + $0x78] sm:$0xff] %v1830_v57 }
 0x21a PF: > { %p1778_p0 = scmp.le.s32.totalorder %s2106_s26, 0 }
 0x21b   : > { %v1007_v58 = vld [vmem:[#allocation2] sm:$0xff] (!%p1778_p0)  ;;  %v1008_v6 = vld [vmem:[#allocation2 + $0x8] sm:$0xff] (!%p1778_p0)  ;;  %v1009_v59 = vld [vmem:[#allocation2 + $0x10] sm:$0xff] (!%p1778_p0) }
 0x21c   : > { %1006 = sbr.rel (%p1778_p0) target bundleno = 551 (0x227), region = 94  ;;  %v1023_v60 = vadd.f32 (!%p1778_p0), %v1007_v58, %v2269_v26  ;;  %v1024_v61 = vadd.f32 (!%p1778_p0), %v1008_v6, %v2277_v30  ;;  %v1025_v62 = vadd.f32 (!%p1778_p0), %v2265_v24, %v1009_v59  ;;  %v1010_v7 = vld [vmem:[#allocation2 + $0x18] sm:$0xff] (!%p1778_p0)  ;;  %v1015_v8 = vld [vmem:[#allocation2 + $0x40] sm:$0xff] (!%p1778_p0)  ;;  %v1016_v9 = vld [vmem:[#allocation2 + $0x48] sm:$0xff] (!%p1778_p0) }
 0x21d   : > { %v1026_v1 = vadd.f32 (!%p1778_p0), %v2273_v28, %v1010_v7  ;;  %v1031_v24 = vadd.f32 (!%p1778_p0), %v1015_v8, %v2271_v27  ;;  %v1017_v10 = vld [vmem:[#allocation2 + $0x50] sm:$0xff] (!%p1778_p0)  ;;  %v1018_v11 = vld [vmem:[#allocation2 + $0x58] sm:$0xff] (!%p1778_p0)  ;;  %v1032_v28 = vadd.f32 (!%p1778_p0), %v1016_v9, %v2279_v31 }
 0x21e   : > { %v1013_v4 = vld [vmem:[#allocation2 + $0x30] sm:$0xff] (!%p1778_p0)  ;;  %1039 = vst [vmem:[#allocation2] sm:$0xff] (!%p1778_p0), %v1023_v60  ;;  %1040 = vst [vmem:[#allocation2 + $0x8] sm:$0xff] (!%p1778_p0), %v1024_v61 }
 0x21f   : > { %v1011_v63 = vld [vmem:[#allocation2 + $0x20] sm:$0xff] (!%p1778_p0)  ;;  %1041 = vst [vmem:[#allocation2 + $0x10] sm:$0xff] (!%p1778_p0), %v1025_v62  ;;  %v1029_v26 = vadd.f32 (!%p1778_p0), %v2281_v32, %v1013_v4  ;;  %1042 = vst [vmem:[#allocation2 + $0x18] sm:$0xff] (!%p1778_p0), %v1026_v1  ;;  %v1021_v14 = vld [vmem:[#allocation2 + $0x70] sm:$0xff] (!%p1778_p0) }
 0x220   : > { %v1027_v2 = vadd.f32 (!%p1778_p0), %v1011_v63, %v2285_v34  ;;  %v1014_v5 = vld [vmem:[#allocation2 + $0x38] sm:$0xff] (!%p1778_p0)  ;;  %v1033_v34 = vadd.f32 (!%p1778_p0), %v2267_v25, %v1017_v10  ;;  %v1019_v12 = vld [vmem:[#allocation2 + $0x60] sm:$0xff] (!%p1778_p0)  ;;  %1047 = vst [vmem:[#allocation2 + $0x40] sm:$0xff] (!%p1778_p0), %v1031_v24  ;;  %1048 = vst [vmem:[#allocation2 + $0x48] sm:$0xff] (!%p1778_p0), %v1032_v28 }
 0x221   : > { %v1012_v0 = vld [vmem:[#allocation2 + $0x28] sm:$0xff] (!%p1778_p0)  ;;  %v1030_v30 = vadd.f32 (!%p1778_p0), %v2289_v36, %v1014_v5  ;;  %1045 = vst [vmem:[#allocation2 + $0x30] sm:$0xff] (!%p1778_p0), %v1029_v26  ;;  %v1035_v27 = vadd.f32 (!%p1778_p0), %v1019_v12, %v2287_v35  ;;  %v1037_v36 = vadd.f32 (!%p1778_p0), %v2283_v33, %v1021_v14  ;;  %v1022_v15 = vld [vmem:[#allocation2 + $0x78] sm:$0xff] (!%p1778_p0) }
 0x222   : > { %v1028_v3 = vadd.f32 (!%p1778_p0), %v1012_v0, %v2293_v38  ;;  %1043 = vst [vmem:[#allocation2 + $0x20] sm:$0xff] (!%p1778_p0), %v1027_v2  ;;  %v1034_v38 = vadd.f32 (!%p1778_p0), %v2275_v29, %v1018_v11  ;;  %v1020_v13 = vld [vmem:[#allocation2 + $0x68] sm:$0xff] (!%p1778_p0)  ;;  %1049 = vst [vmem:[#allocation2 + $0x50] sm:$0xff] (!%p1778_p0), %v1033_v34  ;;  %v1038_v25 = vadd.f32 (!%p1778_p0), %v2291_v37, %v1022_v15 }
 0x223   : > { %1046 = vst [vmem:[#allocation2 + $0x38] sm:$0xff] %v1030_v30  ;;  %v1036_v32 = vadd.f32 %v1020_v13, %v2295_v39  ;;  %1051 = vst [vmem:[#allocation2 + $0x60] sm:$0xff] %v1035_v27 }
 0x224   : > { %1044 = vst [vmem:[#allocation2 + $0x28] sm:$0xff] %v1028_v3  ;;  %1050 = vst [vmem:[#allocation2 + $0x58] sm:$0xff] %v1034_v38 }
 0x225   : > { %1052 = vst [vmem:[#allocation2 + $0x68] sm:$0xff] %v1036_v32  ;;  %1053 = vst [vmem:[#allocation2 + $0x70] sm:$0xff] %v1037_v36 }
 0x226   : > { %1054 = vst [vmem:[#allocation2 + $0x78] sm:$0xff] %v1038_v25 }
 0x227 PF: > { %p1779_p1 = scmp.ne.s32.totalorder %s2106_s26, 4 }
 0x228   : > { %v1083_v29 = vld [vmem:[%s2239_s27 + $0x40] sm:$0xff] (!%p1779_p1)  ;;  %v2125_v33 = vmov (!%p1779_p1), 0   ;;  %v1084_v35 = vld [vmem:[%s2239_s27 + $0x48] sm:$0xff] (!%p1779_p1)  ;;  %v1078_v39 = vld [vmem:[%s2239_s27 + $0x18] sm:$0xff] (!%p1779_p1) }
 0x229   : > { %1058 = sbr.rel (%p1779_p1) target bundleno = 936 (0x3a8), region = 98  ;;  %v1075_v31 = vld [vmem:[%s2239_s27] sm:$0xff] (!%p1779_p1)  ;;  %2043 = vset.pattern.permute.xlu1 (!%p1779_p1), %v2125_v33  ;;  %2042 = vset.pattern.permute.xlu0 (!%p1779_p1), %v2125_v33  ;;  %v1076_v37 = vld [vmem:[%s2239_s27 + $0x8] sm:$0xff] (!%p1779_p1)  ;;  %v1077_v18 = vld [vmem:[%s2239_s27 + $0x10] sm:$0xff] (!%p1779_p1) }
 0x22a   : > { %1133 = vperm.xlu1 (!%p1779_p1), %2043, %v1083_v29   ;;  %1093 = vperm.xlu0 (!%p1779_p1), %2042, %v1075_v31   ;;  %v2044_v16 = vld [vmem:[%s2582_s4 + $0x4] ss:$8 sps:$4 sm:$0xff] (!%p1779_p1)   ;;  %v2046_v17 = vld [vmem:[%s2582_s4] ss:$8 sps:$4 sm:$0xff] (!%p1779_p1)   ;;  %v2047_v19 = vld [vmem:[%s2582_s4 + $0x14] ss:$8 sps:$4 sm:$0xff] (!%p1779_p1)  }
 0x22b   : > { %1371 = vmatprep.mubr.bf16.mxu0 (!%p1779_p1), %v2125_v33  ;;  %1411 = vmatprep.mubr.bf16.mxu1 (!%p1779_p1), %v2125_v33  ;;  %v2049_v20 = vld [vmem:[%s2582_s4 + $0x10] ss:$8 sps:$4 sm:$0xff] (!%p1779_p1)   ;;  %v2050_v23 = vld [vmem:[%s2582_s4 + $0x24] ss:$8 sps:$4 sm:$0xff] (!%p1779_p1)   ;;  %v2052_v40 = vld [vmem:[%s2582_s4 + $0x20] ss:$8 sps:$4 sm:$0xff] (!%p1779_p1)  }
 0x22c   : > { %1339 = vmatprep.subr.bf16.mxu0 (!%p1779_p1), %v2044_v16  ;;  %1927 = vmatprep.subr.bf16.mxu1 (!%p1779_p1), %v2044_v16  ;;  %v1086_v21 = vld [vmem:[%s2239_s27 + $0x58] sm:$0xff] (!%p1779_p1)  ;;  %v1085_v22 = vld [vmem:[%s2239_s27 + $0x50] sm:$0xff] (!%p1779_p1)  ;;  %v1080_v41 = vld [vmem:[%s2239_s27 + $0x28] sm:$0xff] (!%p1779_p1) }
 0x22d   : > { %1340 = vmatpush1.bf16.msra.mxu0 (!%p1779_p1), %v2046_v17  ;;  %1935 = vmatpush1.bf16.msra.mxu1 (!%p1779_p1), %v2046_v17  ;;  %v1079_v42 = vld [vmem:[%s2239_s27 + $0x20] sm:$0xff] (!%p1779_p1)  ;;  %v2053_v43 = vld [vmem:[%s2582_s4 + $0x34] ss:$8 sps:$4 sm:$0xff] (!%p1779_p1)   ;;  %v2055_v44 = vld [vmem:[%s2582_s4 + $0x30] ss:$8 sps:$4 sm:$0xff] (!%p1779_p1)  }
 0x22e   : > { %1138 = vperm.xlu1 (!%p1779_p1), %2043, %v1084_v35   ;;  %1098 = vperm.xlu0 (!%p1779_p1), %2042, %v1076_v37   ;;  %v1088_v45 = vld [vmem:[%s2239_s27 + $0x68] sm:$0xff] (!%p1779_p1)  ;;  %v1087_v46 = vld [vmem:[%s2239_s27 + $0x60] sm:$0xff] (!%p1779_p1)  ;;  %v1082_v49 = vld [vmem:[%s2239_s27 + $0x38] sm:$0xff] (!%p1779_p1) }
 0x22f   : > { %1341 = vmatprep.subr.bf16.mxu0 (!%p1779_p1), %v2047_v19  ;;  %1928 = vmatprep.subr.bf16.mxu1 (!%p1779_p1), %v2047_v19  ;;  %v2056_v47 = vld [vmem:[%s2582_s4 + $0x44] ss:$8 sps:$4 sm:$0xff] (!%p1779_p1)   ;;  %v2058_v48 = vld [vmem:[%s2582_s4 + $0x40] ss:$8 sps:$4 sm:$0xff] (!%p1779_p1)   ;;  %v1081_v50 = vld [vmem:[%s2239_s27 + $0x30] sm:$0xff] (!%p1779_p1) }
 0x230   : > { %v2059_v51 = vld [vmem:[%s2582_s4 + $0x54] ss:$8 sps:$4 sm:$0xff]   ;;  %v2061_v52 = vld [vmem:[%s2582_s4 + $0x50] ss:$8 sps:$4 sm:$0xff]   ;;  %v2062_v55 = vld [vmem:[%s2582_s4 + $0x64] ss:$8 sps:$4 sm:$0xff]  }
 0x231   : > { %1342 = vmatpush1.bf16.msra.mxu0 %v2049_v20  ;;  %1936 = vmatpush1.bf16.msra.mxu1 %v2049_v20  ;;  %v1090_v53 = vld [vmem:[%s2239_s27 + $0x78] sm:$0xff]  ;;  %v1089_v54 = vld [vmem:[%s2239_s27 + $0x70] sm:$0xff]  ;;  %v2064_v56 = vld [vmem:[%s2582_s4 + $0x60] ss:$8 sps:$4 sm:$0xff]  }
 0x232   : > { %1108 = vperm.xlu1 %2043, %v1078_v39   ;;  %1103 = vperm.xlu0 %2042, %v1077_v18   ;;  %v2065_v57 = vld [vmem:[%s2582_s4 + $0x74] ss:$8 sps:$4 sm:$0xff]   ;;  %v2067_v58 = vld [vmem:[%s2582_s4 + $0x70] ss:$8 sps:$4 sm:$0xff]   ;;  %v1067_v60 = vld [vmem:[#allocation2 + $0x40] sm:$0xff] }
 0x233   : > { %1343 = vmatprep.subr.bf16.mxu0 %v2050_v23  ;;  %1929 = vmatprep.subr.bf16.mxu1 %v2050_v23  ;;  %v1059_v61 = vld [vmem:[#allocation2] sm:$0xff]  ;;  %v1068_v62 = vld [vmem:[#allocation2 + $0x48] sm:$0xff]  ;;  %v1062_v30 = vld [vmem:[#allocation2 + $0x18] sm:$0xff] }
 0x234   : > { %v1060_v7 = vld [vmem:[#allocation2 + $0x8] sm:$0xff]  ;;  %v1061_v9 = vld [vmem:[#allocation2 + $0x10] sm:$0xff]  ;;  %v1070_v10 = vld [vmem:[#allocation2 + $0x58] sm:$0xff] }
 0x235   : > { %1344 = vmatpush1.bf16.msra.mxu0 %v2052_v40  ;;  %1937 = vmatpush1.bf16.msra.mxu1 %v2052_v40  ;;  %v1069_v11 = vld [vmem:[#allocation2 + $0x50] sm:$0xff]  ;;  %v1064_v15 = vld [vmem:[#allocation2 + $0x28] sm:$0xff]  ;;  %v1063_v29 = vld [vmem:[#allocation2 + $0x20] sm:$0xff] }
 0x236   : > { %1148 = vperm.xlu1 %2043, %v1086_v21   ;;  %1143 = vperm.xlu0 %2042, %v1085_v22   ;;  %v1072_v31 = vld [vmem:[#allocation2 + $0x68] sm:$0xff]  ;;  %v1071_v35 = vld [vmem:[#allocation2 + $0x60] sm:$0xff]  ;;  %v1066_v23 = vld [vmem:[#allocation2 + $0x38] sm:$0xff] }
 0x237   : > { %1345 = vmatprep.subr.bf16.mxu0 %v2053_v43  ;;  %1930 = vmatprep.subr.bf16.mxu1 %v2053_v43  ;;  %v1073_v43 = vld [vmem:[#allocation2 + $0x70] sm:$0xff] }
 0x239   : > { %1346 = vmatpush1.bf16.msra.mxu0 %v2055_v44  ;;  %1938 = vmatpush1.bf16.msra.mxu1 %v2055_v44 }
 0x23a   : > { %1118 = vperm.xlu1 %2043, %v1080_v41   ;;  %1113 = vperm.xlu0 %2042, %v1079_v42   ;;  %v1065_v41 = vld [vmem:[#allocation2 + $0x30] sm:$0xff]  ;;  %v1074_v42 = vld [vmem:[#allocation2 + $0x78] sm:$0xff] }
 0x23b   : > { %1347 = vmatprep.subr.bf16.mxu0 %v2056_v47  ;;  %1931 = vmatprep.subr.bf16.mxu1 %v2056_v47 }
 0x23d   : > { %1348 = vmatpush1.bf16.msra.mxu0 %v2058_v48  ;;  %1939 = vmatpush1.bf16.msra.mxu1 %v2058_v48 }
 0x23e   : > { %1158 = vperm.xlu1 %2043, %v1088_v45   ;;  %1153 = vperm.xlu0 %2042, %v1087_v46  }
 0x23f   : > { %1349 = vmatprep.subr.bf16.mxu0 %v2059_v51  ;;  %1932 = vmatprep.subr.bf16.mxu1 %v2059_v51 }
 0x241   : > { %1350 = vmatpush1.bf16.msra.mxu0 %v2061_v52  ;;  %1940 = vmatpush1.bf16.msra.mxu1 %v2061_v52  ;;  %v1211_v52 = vld [vmem:[%s2244_s0] sm:$0xff] }
 0x242   : > { %1128 = vperm.xlu1 %2043, %v1082_v49   ;;  %1123 = vperm.xlu0 %2042, %v1081_v50  }
 0x243   : > { %1351 = vmatprep.subr.bf16.mxu0 %v2062_v55  ;;  %1933 = vmatprep.subr.bf16.mxu1 %v2062_v55  ;;  %v1220_v55 = vld [vmem:[%s2244_s0 + $0x48] sm:$0xff] }
 0x245   : > { %1352 = vmatpush1.bf16.msra.mxu0 %v2064_v56  ;;  %1941 = vmatpush1.bf16.msra.mxu1 %v2064_v56  ;;  %v1227_v56 = vunpack.c.l.bf16 %v1211_v52 }
 0x246   : > { %1168 = vperm.xlu1 %2043, %v1090_v53   ;;  %1163 = vperm.xlu0 %2042, %v1089_v54   ;;  %v1219_v53 = vld [vmem:[%s2244_s0 + $0x40] sm:$0xff]  ;;  %v1212_v54 = vld [vmem:[%s2244_s0 + $0x8] sm:$0xff] }
 0x247   : > { %1353 = vmatprep.subr.bf16.mxu0 %v2065_v57  ;;  %1934 = vmatprep.subr.bf16.mxu1 %v2065_v57  ;;  %v1243_v57 = vunpack.c.l.bf16 %v1219_v53 }
 0x249   : > { %1354 = vmatpush1.bf16.msra.mxu0 %v2067_v58  ;;  %1942 = vmatpush1.bf16.msra.mxu1 %v2067_v58  ;;  %v1228_v58 = vunpack.c.h.bf16 %v1211_v52 }
 0x2a9   : > { %v1134_v6 = vpop.permute.xlu1 %1133  ;;  %v1094_v59 = vpop.permute.xlu0 %1093 }
 0x2aa   : > { %v1179_v1 = vmul.f32 %v1134_v6, %v1067_v60  ;;  %v1171_v2 = vmul.f32 %v1094_v59, %v1059_v61  ;;  %v1229_v6 = vunpack.c.l.bf16 %v1212_v54  ;;  %v1245_v59 = vunpack.c.l.bf16 %v1220_v55  ;;  %v1213_v60 = vld [vmem:[%s2244_s0 + $0x10] sm:$0xff] }
 0x2ab   : > { %v1221_v61 = vld [vmem:[%s2244_s0 + $0x50] sm:$0xff] }
 0x2ad   : > { %v1139_v63 = vpop.permute.xlu1 %1138  ;;  %v1099_v0 = vpop.permute.xlu0 %1098 }
 0x2ae   : > { %v1180_v3 = vmul.f32 %v1139_v63, %v1068_v62  ;;  %v1172_v4 = vmul.f32 %v1099_v0, %v1060_v7  ;;  %v1230_v63 = vunpack.c.h.bf16 %v1212_v54  ;;  %v1246_v0 = vunpack.c.h.bf16 %v1220_v55 }
 0x2b0   : > { %v1191_v5 = vpack.c.bf16 %v1180_v3, %v1179_v1  ;;  %v1187_v8 = vpack.c.bf16 %v1172_v4, %v1171_v2 }
 0x2b1   : > { %v1109_v26 = vpop.permute.xlu1 %1108  ;;  %v1104_v24 = vpop.permute.xlu0 %1103 }
 0x2b2   : > { %1372 = vmatmul.mubr.bf16.vlgmr.msra.gmra.mrb[0].mxu0 %v1187_v8  ;;  %1412 = vmatmul.mubr.bf16.vlgmr.msra.gmra.mrb[0].mxu1 %v1191_v5  ;;  %v1174_v28 = vmul.f32 %v1109_v26, %v1062_v30  ;;  %v1173_v34 = vmul.f32 %v1104_v24, %v1061_v9  ;;  %v1231_v24 = vunpack.c.l.bf16 %v1213_v60  ;;  %v1247_v9 = vunpack.c.l.bf16 %v1221_v61 }
 0x2b3   : > { %1381 = vmatprep.mubr.bf16.mxu0 %v2125_v33  ;;  %1421 = vmatprep.mubr.bf16.mxu1 %v2125_v33 }
 0x2b4   : > { %v1188_v27 = vpack.c.bf16 %v1174_v28, %v1173_v34 }
 0x2b5   : > { %v1149_v38 = vpop.permute.xlu1 %1148  ;;  %v1144_v12 = vpop.permute.xlu0 %1143 }
 0x2b6   : > { %v1182_v13 = vmul.f32 %v1149_v38, %v1070_v10  ;;  %v1181_v14 = vmul.f32 %v1144_v12, %v1069_v11 }
 0x2b8   : > { %v1192_v32 = vpack.c.bf16 %v1182_v13, %v1181_v14 }
 0x2b9   : > { %v1119_v36 = vpop.permute.xlu1 %1118  ;;  %v1114_v25 = vpop.permute.xlu0 %1113 }
 0x2ba   : > { %1382 = vmatmul.mubr.bf16.gmra.mrb[4].mxu0 %v1188_v27  ;;  %1422 = vmatmul.mubr.bf16.gmra.mrb[4].mxu1 %v1192_v32  ;;  %v1176_v37 = vmul.f32 %v1119_v36, %v1064_v15  ;;  %v1175_v39 = vmul.f32 %v1114_v25, %v1063_v29  ;;  %v1214_v36 = vld [vmem:[%s2244_s0 + $0x18] sm:$0xff] }
 0x2bb   : > { %1391 = vmatprep.mubr.bf16.mxu0 %v2125_v33  ;;  %1431 = vmatprep.mubr.bf16.mxu1 %v2125_v33  ;;  %v1222_v15 = vld [vmem:[%s2244_s0 + $0x58] sm:$0xff] }
 0x2bc   : > { %v1189_v20 = vpack.c.bf16 %v1176_v37, %v1175_v39 }
 0x2bd   : > { %v1159_v16 = vpop.permute.xlu1 %1158  ;;  %v1154_v17 = vpop.permute.xlu0 %1153 }
 0x2be   : > { %v1184_v18 = vmul.f32 %v1159_v16, %v1072_v31  ;;  %v1183_v19 = vmul.f32 %v1154_v17, %v1071_v35  ;;  %v1232_v31 = vunpack.c.h.bf16 %v1213_v60  ;;  %v1248_v35 = vunpack.c.h.bf16 %v1221_v61 }
 0x2c0   : > { %v1193_v21 = vpack.c.bf16 %v1184_v18, %v1183_v19  ;;  %v1233_v18 = vunpack.c.l.bf16 %v1214_v36  ;;  %v1249_v19 = vunpack.c.l.bf16 %v1222_v15 }
 0x2c1   : > { %v1129_v22 = vpop.permute.xlu1 %1128  ;;  %v1124_v40 = vpop.permute.xlu0 %1123 }
 0x2c2   : > { %1392 = vmatmul.mubr.bf16.gmra.mrb[8].mxu0 %v1189_v20  ;;  %1432 = vmatmul.mubr.bf16.gmra.mrb[8].mxu1 %v1193_v21  ;;  %v1178_v44 = vmul.f32 %v1129_v22, %v1066_v23  ;;  %v1177_v45 = vmul.f32 %v1124_v40, %v1065_v41  ;;  %v1215_v20 = vld [vmem:[%s2244_s0 + $0x20] sm:$0xff] }
 0x2c3   : > { %1401 = vmatprep.mubr.bf16.mxu0 %v2125_v33  ;;  %1441 = vmatprep.mubr.bf16.mxu1 %v2125_v33  ;;  %v1244_v33 = vunpack.c.h.bf16 %v1219_v53  ;;  %v1223_v21 = vld [vmem:[%s2244_s0 + $0x60] sm:$0xff]  ;;  %v1235_v52 = vunpack.c.l.bf16 %v1215_v20 }
 0x2c4   : > { %v1190_v50 = vpack.c.bf16 %v1178_v44, %v1177_v45  ;;  %v1251_v53 = vunpack.c.l.bf16 %v1223_v21 }
 0x2c5   : > { %v1169_v46 = vpop.permute.xlu1 %1168  ;;  %v1164_v47 = vpop.permute.xlu0 %1163 }
 0x2c6   : > { %v1186_v48 = vmul.f32 %v1169_v46, %v1074_v42  ;;  %v1185_v49 = vmul.f32 %v1164_v47, %v1073_v43  ;;  %v1234_v42 = vunpack.c.h.bf16 %v1214_v36  ;;  %v1250_v43 = vunpack.c.h.bf16 %v1222_v15 }
 0x2c8   : > { %v1194_v51 = vpack.c.bf16 %v1186_v48, %v1185_v49 }
 0x2ca   : > { %1402 = vmatmul.mubr.bf16.gmra.mrb[12].mxu0 %v1190_v50  ;;  %1442 = vmatmul.mubr.bf16.gmra.mrb[12].mxu1 %v1194_v51 }
 0x385   : > { %v1373_v62 = vpop.f32.mrb[0].mxu0  ;;  %v1413_v7 = vpop.f32.mrb[0].mxu1 }
 0x386   : > { %v1374_v1 = vadd.f32 %v1373_v62, %v1227_v56  ;;  %v1414_v2 = vadd.f32 %v1413_v7, %v1243_v57  ;;  %v1375_v3 = vpop.f32.mrb[1].mxu0  ;;  %v1415_v4 = vpop.f32.mrb[1].mxu1  ;;  %v1216_v62 = vld [vmem:[%s2244_s0 + $0x28] sm:$0xff] }
 0x387   : > { %v1376_v5 = vadd.f32 %v1375_v3, %v1228_v58  ;;  %v1416_v8 = vadd.f32 %v1415_v4, %v1244_v33  ;;  %v1377_v26 = vpop.f32.mrb[2].mxu0  ;;  %v1417_v30 = vpop.f32.mrb[2].mxu1  ;;  %v1224_v7 = vld [vmem:[%s2244_s0 + $0x68] sm:$0xff] }
 0x388   : > { %v1452_v10 = vmax.f32 %v1374_v1, 0.0  ;;  %v1468_v11 = vmax.f32 %v1414_v2, 0.0  ;;  %v1378_v28 = vadd.f32 %v1377_v26, %v1229_v6  ;;  %v1418_v34 = vadd.f32 %v1417_v30, %v1245_v59  ;;  %v1379_v38 = vpop.f32.mrb[3].mxu0  ;;  %v1419_v12 = vpop.f32.mrb[3].mxu1 }
 0x389   : > { %v1453_v13 = vmax.f32 %v1376_v5, 0.0  ;;  %v1469_v14 = vmax.f32 %v1416_v8, 0.0  ;;  %v1380_v27 = vadd.f32 %v1379_v38, %v1230_v63  ;;  %v1420_v32 = vadd.f32 %v1419_v12, %v1246_v0 }
 0x38a   : > { %v1454_v25 = vmax.f32 %v1378_v28, 0.0  ;;  %v1470_v29 = vmax.f32 %v1418_v34, 0.0  ;;  %v1236_v1 = vunpack.c.h.bf16 %v1215_v20  ;;  %v1252_v2 = vunpack.c.h.bf16 %v1223_v21 }
 0x38b   : > { %v1831_v37 = vpack.c.bf16 %v1453_v13, %v1452_v10  ;;  %v1839_v39 = vpack.c.bf16 %v1469_v14, %v1468_v11  ;;  %v1455_v16 = vmax.f32 %v1380_v27, 0.0  ;;  %v1471_v17 = vmax.f32 %v1420_v32, 0.0 }
 0x38c   : > { %v1237_v26 = vunpack.c.l.bf16 %v1216_v62  ;;  %v1253_v30 = vunpack.c.l.bf16 %v1224_v7  ;;  %v1238_v38 = vunpack.c.h.bf16 %v1216_v62  ;;  %v1254_v12 = vunpack.c.h.bf16 %v1224_v7 }
 0x38d   : > { %1580 = vst [vmem:[%s2244_s0] sm:$0xff] %v1831_v37  ;;  %1588 = vst [vmem:[%s2244_s0 + $0x40] sm:$0xff] %v1839_v39  ;;  %v1832_v22 = vpack.c.bf16 %v1455_v16, %v1454_v25  ;;  %v1840_v23 = vpack.c.bf16 %v1471_v17, %v1470_v29  ;;  %v1383_v40 = vpop.f32.mrb[4].mxu0  ;;  %v1423_v41 = vpop.f32.mrb[4].mxu1 }
 0x38e   : > { %v1384_v44 = vadd.f32 %v1383_v40, %v1231_v24  ;;  %v1424_v45 = vadd.f32 %v1423_v41, %v1247_v9  ;;  %v1385_v46 = vpop.f32.mrb[5].mxu0  ;;  %v1425_v47 = vpop.f32.mrb[5].mxu1  ;;  %v1217_v24 = vld [vmem:[%s2244_s0 + $0x30] sm:$0xff]  ;;  %v1218_v40 = vld [vmem:[%s2244_s0 + $0x38] sm:$0xff] }
 0x38f   : > { %1581 = vst [vmem:[%s2244_s0 + $0x8] sm:$0xff] %v1832_v22  ;;  %1589 = vst [vmem:[%s2244_s0 + $0x48] sm:$0xff] %v1840_v23  ;;  %v1386_v48 = vadd.f32 %v1385_v46, %v1232_v31  ;;  %v1426_v49 = vadd.f32 %v1425_v47, %v1248_v35  ;;  %v1387_v50 = vpop.f32.mrb[6].mxu0  ;;  %v1427_v51 = vpop.f32.mrb[6].mxu1  ;;  %v1225_v9 = vld [vmem:[%s2244_s0 + $0x70] sm:$0xff]  ;;  %v1239_v31 = vunpack.c.l.bf16 %v1217_v24  ;;  %v1226_v41 = vld [vmem:[%s2244_s0 + $0x78] sm:$0xff] }
 0x390   : > { %v1456_v54 = vmax.f32 %v1384_v44, 0.0  ;;  %v1472_v55 = vmax.f32 %v1424_v45, 0.0  ;;  %v1388_v56 = vadd.f32 %v1387_v50, %v1233_v18  ;;  %v1428_v57 = vadd.f32 %v1427_v51, %v1249_v19  ;;  %v1389_v58 = vpop.f32.mrb[7].mxu0  ;;  %v1429_v33 = vpop.f32.mrb[7].mxu1 }
 0x391   : > { %v1457_v6 = vmax.f32 %v1386_v48, 0.0  ;;  %v1473_v59 = vmax.f32 %v1426_v49, 0.0  ;;  %v1390_v60 = vadd.f32 %v1389_v58, %v1234_v42  ;;  %v1430_v61 = vadd.f32 %v1429_v33, %v1250_v43 }
 0x392   : > { %v1458_v63 = vmax.f32 %v1388_v56, 0.0  ;;  %v1474_v0 = vmax.f32 %v1428_v57, 0.0  ;;  %v1255_v35 = vunpack.c.l.bf16 %v1225_v9  ;;  %v1240_v44 = vunpack.c.h.bf16 %v1217_v24 }
 0x393   : > { %v1833_v3 = vpack.c.bf16 %v1457_v6, %v1456_v54  ;;  %v1841_v4 = vpack.c.bf16 %v1473_v59, %v1472_v55  ;;  %v1459_v5 = vmax.f32 %v1390_v60, 0.0  ;;  %v1475_v8 = vmax.f32 %v1430_v61, 0.0 }
 0x394   : > { %v1256_v45 = vunpack.c.h.bf16 %v1225_v9  ;;  %v1241_v50 = vunpack.c.l.bf16 %v1218_v40  ;;  %v1257_v51 = vunpack.c.l.bf16 %v1226_v41  ;;  %v1242_v56 = vunpack.c.h.bf16 %v1218_v40 }
 0x395   : > { %1582 = vst [vmem:[%s2244_s0 + $0x10] sm:$0xff] %v1833_v3  ;;  %1590 = vst [vmem:[%s2244_s0 + $0x50] sm:$0xff] %v1841_v4  ;;  %v1834_v10 = vpack.c.bf16 %v1459_v5, %v1458_v63  ;;  %v1842_v11 = vpack.c.bf16 %v1475_v8, %v1474_v0  ;;  %v1393_v28 = vpop.f32.mrb[8].mxu0  ;;  %v1433_v34 = vpop.f32.mrb[8].mxu1  ;;  %v1258_v57 = vunpack.c.h.bf16 %v1226_v41 }
 0x396   : > { %v1394_v13 = vadd.f32 %v1393_v28, %v1235_v52  ;;  %v1434_v14 = vadd.f32 %v1433_v34, %v1251_v53  ;;  %v1395_v27 = vpop.f32.mrb[9].mxu0  ;;  %v1435_v32 = vpop.f32.mrb[9].mxu1 }
 0x397   : > { %1583 = vst [vmem:[%s2244_s0 + $0x18] sm:$0xff] %v1834_v10  ;;  %1591 = vst [vmem:[%s2244_s0 + $0x58] sm:$0xff] %v1842_v11  ;;  %v1396_v36 = vadd.f32 %v1395_v27, %v1236_v1  ;;  %v1436_v15 = vadd.f32 %v1435_v32, %v1252_v2  ;;  %v1397_v25 = vpop.f32.mrb[10].mxu0  ;;  %v1437_v29 = vpop.f32.mrb[10].mxu1 }
 0x398   : > { %v1460_v37 = vmax.f32 %v1394_v13, 0.0  ;;  %v1476_v39 = vmax.f32 %v1434_v14, 0.0  ;;  %v1398_v16 = vadd.f32 %v1397_v25, %v1237_v26  ;;  %v1438_v17 = vadd.f32 %v1437_v29, %v1253_v30  ;;  %v1399_v18 = vpop.f32.mrb[11].mxu0  ;;  %v1439_v19 = vpop.f32.mrb[11].mxu1 }
 0x399   : > { %v1461_v20 = vmax.f32 %v1396_v36, 0.0  ;;  %v1477_v21 = vmax.f32 %v1436_v15, 0.0  ;;  %v1400_v22 = vadd.f32 %v1399_v18, %v1238_v38  ;;  %v1440_v23 = vadd.f32 %v1439_v19, %v1254_v12 }
 0x39a   : > { %v1462_v42 = vmax.f32 %v1398_v16, 0.0  ;;  %v1478_v43 = vmax.f32 %v1438_v17, 0.0 }
 0x39b   : > { %v1835_v46 = vpack.c.bf16 %v1461_v20, %v1460_v37  ;;  %v1843_v47 = vpack.c.bf16 %v1477_v21, %v1476_v39  ;;  %v1463_v48 = vmax.f32 %v1400_v22, 0.0  ;;  %v1479_v49 = vmax.f32 %v1440_v23, 0.0 }
 0x39d   : > { %1584 = vst [vmem:[%s2244_s0 + $0x20] sm:$0xff] %v1835_v46  ;;  %1592 = vst [vmem:[%s2244_s0 + $0x60] sm:$0xff] %v1843_v47  ;;  %v1836_v52 = vpack.c.bf16 %v1463_v48, %v1462_v42  ;;  %v1844_v53 = vpack.c.bf16 %v1479_v49, %v1478_v43  ;;  %v1403_v54 = vpop.f32.mrb[12].mxu0  ;;  %v1443_v55 = vpop.f32.mrb[12].mxu1 }
 0x39e   : > { %v1404_v58 = vadd.f32 %v1403_v54, %v1239_v31  ;;  %v1444_v33 = vadd.f32 %v1443_v55, %v1255_v35  ;;  %v1405_v6 = vpop.f32.mrb[13].mxu0  ;;  %v1445_v59 = vpop.f32.mrb[13].mxu1 }
 0x39f   : > { %1585 = vst [vmem:[%s2244_s0 + $0x28] sm:$0xff] %v1836_v52  ;;  %1593 = vst [vmem:[%s2244_s0 + $0x68] sm:$0xff] %v1844_v53  ;;  %v1406_v60 = vadd.f32 %v1405_v6, %v1240_v44  ;;  %v1446_v61 = vadd.f32 %v1445_v59, %v1256_v45  ;;  %v1407_v62 = vpop.f32.mrb[14].mxu0  ;;  %v1447_v7 = vpop.f32.mrb[14].mxu1 }
 0x3a0   : > { %v1464_v63 = vmax.f32 %v1404_v58, 0.0  ;;  %v1480_v0 = vmax.f32 %v1444_v33, 0.0  ;;  %v1408_v1 = vadd.f32 %v1407_v62, %v1241_v50  ;;  %v1448_v2 = vadd.f32 %v1447_v7, %v1257_v51  ;;  %v1409_v3 = vpop.f32.mrb[15].mxu0  ;;  %v1449_v4 = vpop.f32.mrb[15].mxu1 }
 0x3a1   : > { %v1465_v5 = vmax.f32 %v1406_v60, 0.0  ;;  %v1481_v8 = vmax.f32 %v1446_v61, 0.0  ;;  %v1410_v26 = vadd.f32 %v1409_v3, %v1242_v56  ;;  %v1450_v30 = vadd.f32 %v1449_v4, %v1258_v57 }
 0x3a2   : > { %v1466_v24 = vmax.f32 %v1408_v1, 0.0  ;;  %v1482_v9 = vmax.f32 %v1448_v2, 0.0 }
 0x3a3   : > { %v1837_v10 = vpack.c.bf16 %v1465_v5, %v1464_v63  ;;  %v1845_v11 = vpack.c.bf16 %v1481_v8, %v1480_v0  ;;  %v1467_v28 = vmax.f32 %v1410_v26, 0.0  ;;  %v1483_v34 = vmax.f32 %v1450_v30, 0.0 }
 0x3a5   : > { %1586 = vst [vmem:[%s2244_s0 + $0x30] sm:$0xff] %v1837_v10  ;;  %1594 = vst [vmem:[%s2244_s0 + $0x70] sm:$0xff] %v1845_v11  ;;  %v1838_v38 = vpack.c.bf16 %v1467_v28, %v1466_v24  ;;  %v1846_v12 = vpack.c.bf16 %v1483_v34, %v1482_v9 }
 0x3a7   : > { %1587 = vst [vmem:[%s2244_s0 + $0x38] sm:$0xff] %v1838_v38  ;;  %1595 = vst [vmem:[%s2244_s0 + $0x78] sm:$0xff] %v1846_v12 }
 0x3a8 PF: > { %s17_s30 = sadd.s32 1, %s2122_s30   ;;  %s2588_s24 = smov %s2102_s25 }
 0x3a9   : > { %p14_p2 = scmp.ge.s32.totalorder %s17_s30, 17   ;;  %s2589_s25 = smov %s2217_s14 }
 0x3aa   : > { %s2590_s26 = smov %s2114_s28  ;;  %s2591_s27 = smov %s2118_s29 }
 0x3ab   : > { %s2592_s28 = smov %s2595_s8  ;;  %s2593_s29 = smov %s2599_s9 }
 0x3ac   :  { %16 = sbr.rel (!%p14_p2) target bundleno = 6 (0x6), region = 142 }

// kernel: run.5
= control target key start
LH: loop header
LB: loop body
LE: loop exit
PB: predicated region body
PF: predicated region fallthrough
CT: control target
= control target key end

     0   :  { %s2664_s24 = smov 0   ;;  %s2666_s25 = smov 0   ;;  %s3236_s0 = inlined_call_operand.vmem [shape: s8[256,384], index: 0, kind: input, shape index: {}]   ;;  %s3237_s1 = inlined_call_operand.vmem [shape: bf16[384,256], index: 1, kind: input, shape index: {}, may-alias: {1,3}]   ;;  %s3238_s2 = inlined_call_operand.vmem [shape: f32[256,1], index: 2, kind: input, shape index: {}]   ;;  %s3239_s3 = inlined_call_operand.vmem [shape: bf16[384,256], index: 3, kind: input, shape index: {}, may-alias: {1,3}]   ;;  %s3240_s4 = inlined_call_operand.vmem [shape: bf16[256,256], index: 4, kind: input, shape index: {}]   ;;  %s3241_s5 = inlined_call_operand.vmem [shape: bf16[256,256], index: 5, kind: input, shape index: {}]   ;;  %s3242_s6 = inlined_call_operand.vmem [shape: f32[1,256], index: 6, kind: input, shape index: {}]   ;;  %s3243_s7 = inlined_call_operand.vmem [shape: bf16[256,256], index: 7, kind: output, shape index: {}]  }
   0x1   :  { %s2668_s26 = smov 0   ;;  %s2670_s27 = smov 0  }
   0x2   :  { %s2672_s28 = smov 0   ;;  %s2674_s29 = smov 0  }
   0x3   :  { %s2676_s30 = smov 0  }
   0x4 LB: > { %s26_s8 = sadd.s32 1, %s2612_s28  ;;  %s29_s9 = sadd.s32 1, %s2616_s29  ;;  %s2620_s30 = sphi %s2676_s30, %s17_s30   ;;  %s2616_s29 = sphi %s2674_s29, %s3249_s29   ;;  %s2612_s28 = sphi %s2672_s28, %s3248_s28   ;;  %s2608_s27 = sphi %s2670_s27, %s3247_s27   ;;  %s2604_s26 = sphi %s2668_s26, %s3246_s26   ;;  %s2600_s25 = sphi %s2666_s25, %s3245_s25   ;;  %s2596_s24 = sphi %s2664_s24, %s3244_s24  }
   0x5   : > { %p27_p0 = scmp.ge.s32.totalorder %s26_s8, 3  ;;  %p45_p1 = scmp.ne.s32.totalorder %s2600_s25, %s2596_s24 }
   0x6   : > { %p46_p2 = scmp.eq.s32.totalorder %s2620_s30, 0  ;;  %s38_s13 = sadd.s32 1, %s2600_s25 }
   0x7   : > { %s3251_s8 = smov (%p27_p0, %s26_s8), 0  ;;  %s3253_s9 = smov (!%p27_p0, %s29_s9), %s2616_s29 }
   0x8   : > { %p47_p3 = por %p46_p2, %p45_p1  ;;  %p31_p4 = scmp.ge.s32.totalorder %s3253_s9, 2 }
   0x9   : > { %s34_s10 = ssub.s32 %s2612_s28, %s3251_s8  ;;  %p2095_p6 = scmp.ge.s32.totalorder %s2620_s30, 6 }
   0xa   : > { %s3255_s9 = smov (%p31_p4, %s3253_s9), 0 }
   0xb   : > { %s33_s11 = ssub.s32 %s2616_s29, %s3255_s9  ;;  %247 = sbr.rel (%p2095_p6) target bundleno = 27 (0x1b), region = 28 }
   0xc   : > { %s35_s12 = sor.u32 %s34_s10, %s33_s11 }
   0xd   : > { %p36_p5 = scmp.eq.s32.totalorder %s35_s12, 0 }
   0xf   : > { %s2715_s14 = scalar_select %p36_p5, %s2600_s25, %s38_s13  }
  0x12   : > { %250 = sbr.rel (!%p47_p3) target bundleno = 27 (0x1b), region = 32  ;;  %s252_s15 = sand.u32 (%p47_p3), 1, %s2600_s25  }
  0x13   : > { %s2361_s16 = smul.u32 (%p47_p3), 12, %s2616_s29  ;;  %s2096_s17 = sshll.u32 (%p47_p3), %s252_s15, 5 }
  0x14   : > { %s254_s23 = scalar_lea.vmem (%p47_p3), [#allocation3], %s2096_s17 }
  0x15   : > { %s257_s18 = sadd.s32 (%p47_p3), %s2612_s28, %s2361_s16 }
  0x16   : > { %s2099_s19 = sshll.u32 (%p47_p3), %s257_s18, 3 }
  0x17   : > { %s259_s22 = scalar_lea.vmem (%p47_p3), %s3236_s0, %s2099_s19 }
  0x18   : > { %v293_v0 = vld [vmem:[%s259_s22] sm:$0xff] (%p47_p3)  ;;  %v295_v1 = vld [vmem:[%s259_s22 + $0x18] sm:$0xff] (%p47_p3)  ;;  %v297_v2 = vld [vmem:[%s259_s22 + $0x30] sm:$0xff] (%p47_p3) }
  0x19   : > { %294 = vst [vmem:[%s254_s23] sm:$0xff] %v293_v0  ;;  %296 = vst [vmem:[%s254_s23 + $0x8] sm:$0xff] %v295_v1  ;;  %v299_v3 = vld [vmem:[%s259_s22 + $0x48] sm:$0xff] }
  0x1a   : > { %298 = vst [vmem:[%s254_s23 + $0x10] sm:$0xff] %v297_v2  ;;  %300 = vst [vmem:[%s254_s23 + $0x18] sm:$0xff] %v299_v3 }
  0x1b PF: > { %p2100_p7 = scmp.ge.s32.totalorder %s2620_s30, 1  ;;  %p334_p8 = scmp.lt.s32.totalorder %s2620_s30, 7 }
  0x1d   : > { %p335_p9 = pnand %p2100_p7, %p334_p8 }
  0x1e   : > { %s2102_s10 = sshll.u32 (!%p335_p9), %s2604_s26, 4  ;;  %s2105_s11 = sshll.u32 (!%p335_p9), %s2608_s27, 4  ;;  %v2622_v4 = vmov (!%p335_p9), 0  }
  0x1f   : > { %338 = sbr.rel (%p335_p9) target bundleno = 939 (0x3ab), region = 82  ;;  %p392_p10 = scmp.lt.s32.totalorder (!%p335_p9), %s2102_s10, 47  ;;  %559 = vmatprep.mubr.bf16.mxu0 (!%p335_p9), %v2622_v4  ;;  %599 = vmatprep.mubr.bf16.mxu1 (!%p335_p9), %v2622_v4 }
  0x20   : > { %p399_p11 = scmp.lt.s32.totalorder (!%p335_p9), %s2105_s11, 31  ;;  %p405_p12 = scmp.lt.s32.totalorder (!%p335_p9), %s2105_s11, 47 }
  0x21   : > { %p2129_p13 = scmp.ne.s32.totalorder (!%p335_p9), %s2604_s26, 0 }
  0x26   : > { %s3257_s10 = smov (!%p392_p10, %s2102_s10), 47  ;;  %v2444_v1 = vld [vmem:[%s3241_s5 + $0x4] ss:$8 sps:$4 sm:$0xff] (!%p2129_p13)   ;;  %v2446_v2 = vld [vmem:[%s3241_s5] ss:$8 sps:$4 sm:$0xff] (!%p2129_p13)  }
  0x27   : > { %s400_s12 = scalar_select %p399_p11, %s2105_s11, 31 }
  0x28   : > { %s2246_s13 = sshll.u32 %s3257_s10, 3  ;;  %s3259_s11 = smov (!%p405_p12, %s2105_s11), 47  ;;  %v2447_v3 = vld [vmem:[%s3241_s5 + $0x14] ss:$8 sps:$4 sm:$0xff] (!%p2129_p13)  }
  0x29   : > { %s2733_s17 = scalar_lea.vmem %s3237_s1, %s2246_s13  ;;  %s2106_s27 = sshll.u32 %s400_s12, 3 }
  0x2a   : > { %s2738_s20 = scalar_lea.vmem %s3238_s2, %s2106_s27  ;;  %s2743_s23 = scalar_lea.vmem %s3243_s7, %s2106_s27  ;;  %v2420_v5 = vld [vmem:[%s2733_s17 + $0x4] ss:$8 sps:$4 sm:$0xff]   ;;  %v2422_v6 = vld [vmem:[%s2733_s17] ss:$8 sps:$4 sm:$0xff]   ;;  %v2423_v7 = vld [vmem:[%s2733_s17 + $0x14] ss:$8 sps:$4 sm:$0xff]  }
  0x2b   : > { %527 = vmatprep.subr.bf16.mxu0 %v2420_v5  ;;  %2281 = vmatprep.subr.bf16.mxu1 %v2420_v5  ;;  %s2247_s10 = sshll.u32 %s3259_s11, 3  ;;  %v2425_v8 = vld [vmem:[%s2733_s17 + $0x10] ss:$8 sps:$4 sm:$0xff]   ;;  %v2426_v9 = vld [vmem:[%s2733_s17 + $0x24] ss:$8 sps:$4 sm:$0xff]   ;;  %s341_s11 = sand.u32 1, %s2596_s24  }
  0x2c   : > { %528 = vmatpush1.bf16.msra.mxu0 %v2422_v6  ;;  %2289 = vmatpush1.bf16.msra.mxu1 %v2422_v6  ;;  %s2752_s15 = scalar_lea.vmem %s3239_s3, %s2247_s10  ;;  %v2428_v10 = vld [vmem:[%s2733_s17 + $0x20] ss:$8 sps:$4 sm:$0xff]   ;;  %v2429_v11 = vld [vmem:[%s2733_s17 + $0x34] ss:$8 sps:$4 sm:$0xff]   ;;  %v2431_v12 = vld [vmem:[%s2733_s17 + $0x30] ss:$8 sps:$4 sm:$0xff]  }
  0x2d   : > { %529 = vmatprep.subr.bf16.mxu0 %v2423_v7  ;;  %2282 = vmatprep.subr.bf16.mxu1 %v2423_v7  ;;  %v2432_v13 = vld [vmem:[%s2733_s17 + $0x44] ss:$8 sps:$4 sm:$0xff]   ;;  %v2434_v14 = vld [vmem:[%s2733_s17 + $0x40] ss:$8 sps:$4 sm:$0xff]   ;;  %v2435_v15 = vld [vmem:[%s2733_s17 + $0x54] ss:$8 sps:$4 sm:$0xff]  }
  0x2e   : > { %v2437_v16 = vld [vmem:[%s2733_s17 + $0x50] ss:$8 sps:$4 sm:$0xff]   ;;  %v2438_v17 = vld [vmem:[%s2733_s17 + $0x64] ss:$8 sps:$4 sm:$0xff]   ;;  %s2101_s16 = sshll.u32 %s341_s11, 5 }
  0x2f   : > { %v2440_v18 = vld [vmem:[%s2733_s17 + $0x60] ss:$8 sps:$4 sm:$0xff]   ;;  %v2441_v19 = vld [vmem:[%s2733_s17 + $0x74] ss:$8 sps:$4 sm:$0xff]   ;;  %v2443_v20 = vld [vmem:[%s2733_s17 + $0x70] ss:$8 sps:$4 sm:$0xff]  }
  0x30   : > { %530 = vmatpush1.bf16.msra.mxu0 %v2425_v8  ;;  %2290 = vmatpush1.bf16.msra.mxu1 %v2425_v8  ;;  %s343_s27 = scalar_lea.vmem [#allocation3], %s2101_s16  ;;  %v2450_v5 = vld [vmem:[%s3241_s5 + $0x24] ss:$8 sps:$4 sm:$0xff] (!%p2129_p13)   ;;  %v2452_v6 = vld [vmem:[%s3241_s5 + $0x20] ss:$8 sps:$4 sm:$0xff] (!%p2129_p13)  }
  0x31   : > { %531 = vmatprep.subr.bf16.mxu0 %v2426_v9  ;;  %2283 = vmatprep.subr.bf16.mxu1 %v2426_v9  ;;  %v419_v21 = vld [vmem:[%s343_s27] sm:$0xff]  ;;  %v421_v22 = vld [vmem:[%s343_s27 + $0x10] sm:$0xff]  ;;  %v420_v27 = vld [vmem:[%s343_s27 + $0x8] sm:$0xff] }
  0x32   : > { %v423_v23 = vunpack.c.l.s8.bf16 %v419_v21  ;;  %v427_v24 = vunpack.c.l.s8.bf16 %v421_v22  ;;  %v424_v25 = vunpack.c.h.s8.bf16 %v419_v21  ;;  %v428_v26 = vunpack.c.h.s8.bf16 %v421_v22  ;;  %v422_v28 = vld [vmem:[%s343_s27 + $0x18] sm:$0xff]  ;;  %v2456_v9 = vld [vmem:[%s3241_s5 + $0x44] ss:$8 sps:$4 sm:$0xff] (!%p2129_p13)  }
  0x33   : > { %v425_v29 = vunpack.c.l.s8.bf16 %v420_v27  ;;  %v429_v30 = vunpack.c.l.s8.bf16 %v422_v28  ;;  %v426_v31 = vunpack.c.h.s8.bf16 %v420_v27  ;;  %v430_v32 = vunpack.c.h.s8.bf16 %v422_v28  ;;  %v2453_v7 = vld [vmem:[%s3241_s5 + $0x34] ss:$8 sps:$4 sm:$0xff] (!%p2129_p13)   ;;  %v2455_v8 = vld [vmem:[%s3241_s5 + $0x30] ss:$8 sps:$4 sm:$0xff] (!%p2129_p13)   ;;  %v2480_v27 = vld [vmem:[%s3241_s5 + $0xc4] ss:$8 sps:$4 sm:$0xff] (!%p2129_p13)  }
  0x34   : > { %532 = vmatpush1.bf16.msra.mxu0 %v2428_v10  ;;  %2291 = vmatpush1.bf16.msra.mxu1 %v2428_v10  ;;  %v2458_v10 = vld [vmem:[%s3241_s5 + $0x40] ss:$8 sps:$4 sm:$0xff] (!%p2129_p13)   ;;  %v2471_v21 = vld [vmem:[%s3241_s5 + $0x94] ss:$8 sps:$4 sm:$0xff] (!%p2129_p13)   ;;  %v2473_v22 = vld [vmem:[%s3241_s5 + $0x90] ss:$8 sps:$4 sm:$0xff] (!%p2129_p13)  }
  0x35   : > { %533 = vmatprep.subr.bf16.mxu0 %v2429_v11  ;;  %2284 = vmatprep.subr.bf16.mxu1 %v2429_v11  ;;  %v2459_v11 = vld [vmem:[%s3241_s5 + $0x54] ss:$8 sps:$4 sm:$0xff] (!%p2129_p13)   ;;  %v2482_v28 = vld [vmem:[%s3241_s5 + $0xc0] ss:$8 sps:$4 sm:$0xff] (!%p2129_p13)  }
  0x38   : > { %534 = vmatpush1.bf16.msra.mxu0 %v2431_v12  ;;  %2292 = vmatpush1.bf16.msra.mxu1 %v2431_v12  ;;  %v2461_v12 = vld [vmem:[%s3241_s5 + $0x50] ss:$8 sps:$4 sm:$0xff] (!%p2129_p13)  }
  0x39   : > { %535 = vmatprep.subr.bf16.mxu0 %v2432_v13  ;;  %2285 = vmatprep.subr.bf16.mxu1 %v2432_v13  ;;  %v2462_v13 = vld [vmem:[%s3241_s5 + $0x64] ss:$8 sps:$4 sm:$0xff] (!%p2129_p13)  }
  0x3c   : > { %536 = vmatpush1.bf16.msra.mxu0 %v2434_v14  ;;  %2293 = vmatpush1.bf16.msra.mxu1 %v2434_v14  ;;  %v2494_v14 = vld [vmem:[%s2752_s15 + $0x4] ss:$8 sps:$4 sm:$0xff] (!%p2129_p13)  }
  0x3d   : > { %537 = vmatprep.subr.bf16.mxu0 %v2435_v15  ;;  %2286 = vmatprep.subr.bf16.mxu1 %v2435_v15  ;;  %v2464_v15 = vld [vmem:[%s3241_s5 + $0x60] ss:$8 sps:$4 sm:$0xff] (!%p2129_p13)  }
  0x40   : > { %538 = vmatpush1.bf16.msra.mxu0 %v2437_v16  ;;  %2294 = vmatpush1.bf16.msra.mxu1 %v2437_v16  ;;  %v2497_v16 = vld [vmem:[%s2752_s15 + $0x44] ss:$8 sps:$4 sm:$0xff] (!%p2129_p13)  }
  0x41   : > { %539 = vmatprep.subr.bf16.mxu0 %v2438_v17  ;;  %2287 = vmatprep.subr.bf16.mxu1 %v2438_v17  ;;  %v2465_v17 = vld [vmem:[%s3241_s5 + $0x74] ss:$8 sps:$4 sm:$0xff] (!%p2129_p13)  }
  0x44   : > { %540 = vmatpush1.bf16.msra.mxu0 %v2440_v18  ;;  %2295 = vmatpush1.bf16.msra.mxu1 %v2440_v18  ;;  %v2467_v18 = vld [vmem:[%s3241_s5 + $0x70] ss:$8 sps:$4 sm:$0xff] (!%p2129_p13)  }
  0x45   : > { %541 = vmatprep.subr.bf16.mxu0 %v2441_v19  ;;  %2288 = vmatprep.subr.bf16.mxu1 %v2441_v19  ;;  %v2468_v19 = vld [vmem:[%s3241_s5 + $0x84] ss:$8 sps:$4 sm:$0xff] (!%p2129_p13)  }
  0x48   : > { %542 = vmatpush1.bf16.msra.mxu0 %v2443_v20  ;;  %2296 = vmatpush1.bf16.msra.mxu1 %v2443_v20  ;;  %v2470_v20 = vld [vmem:[%s3241_s5 + $0x80] ss:$8 sps:$4 sm:$0xff] (!%p2129_p13)  }
  0x49   : > { %976 = vmatprep.subr.bf16.mxu0 (!%p2129_p13), %v2444_v1  ;;  %2297 = vmatprep.subr.bf16.mxu1 (!%p2129_p13), %v2444_v1  ;;  %v2489_v1 = vld [vmem:[%s3241_s5 + $0xf4] ss:$8 sps:$4 sm:$0xff] (!%p2129_p13)  }
  0x4b   : > { %560 = vmatmul.mubr.bf16.vlgmr.msra.gmra.mrb[0].mxu0 %v423_v23  ;;  %600 = vmatmul.mubr.bf16.vlgmr.msra.gmra.mrb[0].mxu1 %v427_v24  ;;  %v2474_v23 = vld [vmem:[%s3241_s5 + $0xa4] ss:$8 sps:$4 sm:$0xff] (!%p2129_p13)   ;;  %v2476_v24 = vld [vmem:[%s3241_s5 + $0xa0] ss:$8 sps:$4 sm:$0xff] (!%p2129_p13)  }
  0x4c   : > { %569 = vmatprep.mubr.bf16.mxu0 %v2622_v4  ;;  %609 = vmatprep.mubr.bf16.mxu1 %v2622_v4 }
  0x4d   : > { %977 = vmatpush1.bf16.msra.mxu0 (!%p2129_p13), %v2446_v2  ;;  %2313 = vmatpush1.bf16.msra.mxu1 (!%p2129_p13), %v2446_v2  ;;  %v2491_v2 = vld [vmem:[%s3241_s5 + $0xf0] ss:$8 sps:$4 sm:$0xff] (!%p2129_p13)  }
  0x4e   : > { %978 = vmatprep.subr.bf16.mxu0 (!%p2129_p13), %v2447_v3  ;;  %2298 = vmatprep.subr.bf16.mxu1 (!%p2129_p13), %v2447_v3  ;;  %v2492_v3 = vld [vmem:[%s2752_s15] ss:$8 sps:$4 sm:$0xff] (!%p2129_p13)  }
  0x53   : > { %570 = vmatmul.mubr.bf16.gmra.mrb[4].mxu0 %v424_v25  ;;  %610 = vmatmul.mubr.bf16.gmra.mrb[4].mxu1 %v428_v26  ;;  %v2477_v25 = vld [vmem:[%s3241_s5 + $0xb4] ss:$8 sps:$4 sm:$0xff] (!%p2129_p13)   ;;  %v2479_v26 = vld [vmem:[%s3241_s5 + $0xb0] ss:$8 sps:$4 sm:$0xff] (!%p2129_p13)  }
  0x54   : > { %579 = vmatprep.mubr.bf16.mxu0 %v2622_v4  ;;  %619 = vmatprep.mubr.bf16.mxu1 %v2622_v4 }
  0x5b   : > { %580 = vmatmul.mubr.bf16.gmra.mrb[8].mxu0 %v425_v29  ;;  %620 = vmatmul.mubr.bf16.gmra.mrb[8].mxu1 %v429_v30  ;;  %v2483_v29 = vld [vmem:[%s3241_s5 + $0xd4] ss:$8 sps:$4 sm:$0xff] (!%p2129_p13)   ;;  %v2485_v30 = vld [vmem:[%s3241_s5 + $0xd0] ss:$8 sps:$4 sm:$0xff] (!%p2129_p13)  }
  0x5c   : > { %589 = vmatprep.mubr.bf16.mxu0 %v2622_v4  ;;  %629 = vmatprep.mubr.bf16.mxu1 %v2622_v4  ;;  %v2449_v4 = vld [vmem:[%s3241_s5 + $0x10] ss:$8 sps:$4 sm:$0xff] (!%p2129_p13)  }
  0x5d   : > { %979 = vmatpush1.bf16.msra.mxu0 (!%p2129_p13), %v2449_v4  ;;  %2314 = vmatpush1.bf16.msra.mxu1 (!%p2129_p13), %v2449_v4  ;;  %v2495_v4 = vld [vmem:[%s2752_s15 + $0x40] ss:$8 sps:$4 sm:$0xff] (!%p2129_p13)  }
  0x5e   : > { %980 = vmatprep.subr.bf16.mxu0 (!%p2129_p13), %v2450_v5  ;;  %2299 = vmatprep.subr.bf16.mxu1 (!%p2129_p13), %v2450_v5  ;;  %v2498_v5 = vld [vmem:[%s2752_s15 + $0x14] ss:$8 sps:$4 sm:$0xff] (!%p2129_p13)  }
  0x61   : > { %981 = vmatpush1.bf16.msra.mxu0 (!%p2129_p13), %v2452_v6  ;;  %2315 = vmatpush1.bf16.msra.mxu1 (!%p2129_p13), %v2452_v6  ;;  %v2500_v6 = vld [vmem:[%s2752_s15 + $0x54] ss:$8 sps:$4 sm:$0xff] (!%p2129_p13)  }
  0x62   : > { %982 = vmatprep.subr.bf16.mxu0 (!%p2129_p13), %v2453_v7  ;;  %2300 = vmatprep.subr.bf16.mxu1 (!%p2129_p13), %v2453_v7  ;;  %v2502_v7 = vld [vmem:[%s2752_s15 + $0x10] ss:$8 sps:$4 sm:$0xff] (!%p2129_p13)  }
  0x63   : > { %590 = vmatmul.mubr.bf16.gmra.mrb[12].mxu0 %v426_v31  ;;  %630 = vmatmul.mubr.bf16.gmra.mrb[12].mxu1 %v430_v32  ;;  %v2486_v31 = vld [vmem:[%s3241_s5 + $0xe4] ss:$8 sps:$4 sm:$0xff] (!%p2129_p13)   ;;  %v2488_v32 = vld [vmem:[%s3241_s5 + $0xe0] ss:$8 sps:$4 sm:$0xff] (!%p2129_p13)  }
  0x64   : > { %1008 = vmatprep.mubr.bf16.mxu0 (!%p2129_p13), %v2494_v14  ;;  %1048 = vmatprep.mubr.bf16.mxu1 (!%p2129_p13), %v2497_v16  ;;  %v2512_v14 = vld [vmem:[%s2752_s15 + $0x74] ss:$8 sps:$4 sm:$0xff] (!%p2129_p13)   ;;  %v2515_v16 = vld [vmem:[%s2752_s15 + $0x70] ss:$8 sps:$4 sm:$0xff] (!%p2129_p13)  }
  0x65   : > { %983 = vmatpush1.bf16.msra.mxu0 (!%p2129_p13), %v2455_v8  ;;  %2316 = vmatpush1.bf16.msra.mxu1 (!%p2129_p13), %v2455_v8  ;;  %v2503_v8 = vld [vmem:[%s2752_s15 + $0x50] ss:$8 sps:$4 sm:$0xff] (!%p2129_p13)  }
  0x66   : > { %984 = vmatprep.subr.bf16.mxu0 (!%p2129_p13), %v2456_v9  ;;  %2301 = vmatprep.subr.bf16.mxu1 (!%p2129_p13), %v2456_v9  ;;  %v2504_v9 = vld [vmem:[%s2752_s15 + $0x24] ss:$8 sps:$4 sm:$0xff] (!%p2129_p13)  }
  0x69   : > { %985 = vmatpush1.bf16.msra.mxu0 (!%p2129_p13), %v2458_v10  ;;  %2317 = vmatpush1.bf16.msra.mxu1 (!%p2129_p13), %v2458_v10  ;;  %v2506_v10 = vld [vmem:[%s2752_s15 + $0x64] ss:$8 sps:$4 sm:$0xff] (!%p2129_p13)  }
  0x6a   : > { %986 = vmatprep.subr.bf16.mxu0 (!%p2129_p13), %v2459_v11  ;;  %2302 = vmatprep.subr.bf16.mxu1 (!%p2129_p13), %v2459_v11  ;;  %v2508_v11 = vld [vmem:[%s2752_s15 + $0x20] ss:$8 sps:$4 sm:$0xff] (!%p2129_p13)  }
  0x6d   : > { %987 = vmatpush1.bf16.msra.mxu0 (!%p2129_p13), %v2461_v12  ;;  %2318 = vmatpush1.bf16.msra.mxu1 (!%p2129_p13), %v2461_v12  ;;  %v2509_v12 = vld [vmem:[%s2752_s15 + $0x60] ss:$8 sps:$4 sm:$0xff] (!%p2129_p13)  }
  0x6e   : > { %988 = vmatprep.subr.bf16.mxu0 (!%p2129_p13), %v2462_v13  ;;  %2303 = vmatprep.subr.bf16.mxu1 (!%p2129_p13), %v2462_v13  ;;  %v2510_v13 = vld [vmem:[%s2752_s15 + $0x34] ss:$8 sps:$4 sm:$0xff] (!%p2129_p13)  }
  0x71   : > { %989 = vmatpush1.bf16.msra.mxu0 (!%p2129_p13), %v2464_v15  ;;  %2319 = vmatpush1.bf16.msra.mxu1 (!%p2129_p13), %v2464_v15  ;;  %v2514_v15 = vld [vmem:[%s2752_s15 + $0x30] ss:$8 sps:$4 sm:$0xff] (!%p2129_p13)  }
  0x72   : > { %990 = vmatprep.subr.bf16.mxu0 (!%p2129_p13), %v2465_v17  ;;  %2304 = vmatprep.subr.bf16.mxu1 (!%p2129_p13), %v2465_v17  ;;  %v726_v17 = vlaneseq (!%p2129_p13) }
  0x75   : > { %991 = vmatpush1.bf16.msra.mxu0 (!%p2129_p13), %v2467_v18  ;;  %2320 = vmatpush1.bf16.msra.mxu1 (!%p2129_p13), %v2467_v18  ;;  %v727_v18 = vshrl.u32 (!%p2129_p13), %v726_v17, 7 }
  0x76   : > { %992 = vmatprep.subr.bf16.mxu0 (!%p2129_p13), %v2468_v19  ;;  %2305 = vmatprep.subr.bf16.mxu1 (!%p2129_p13), %v2468_v19 }
  0x77   : > { %v728_v19 = vsub.s32 (!%p2129_p13), 0, %v727_v18 }
  0x79   : > { %993 = vmatpush1.bf16.msra.mxu0 (!%p2129_p13), %v2470_v20  ;;  %2321 = vmatpush1.bf16.msra.mxu1 (!%p2129_p13), %v2470_v20  ;;  %v724_v20 = vld [vmem:[%s3242_s6] sm:$0x3] (!%p2129_p13) }
  0x7a   : > { %994 = vmatprep.subr.bf16.mxu0 (!%p2129_p13), %v2471_v21  ;;  %2306 = vmatprep.subr.bf16.mxu1 (!%p2129_p13), %v2471_v21  ;;  %v732_v21 = vsub.s32 (!%p2129_p13), 1, %v727_v18 }
  0x7d   : > { %995 = vmatpush1.bf16.msra.mxu0 (!%p2129_p13), %v2473_v22  ;;  %2322 = vmatpush1.bf16.msra.mxu1 (!%p2129_p13), %v2473_v22  ;;  %v2985_v22 = vrot.slane (!%p2129_p13), %v724_v20, %v728_v19 }
  0x7e   : > { %996 = vmatprep.subr.bf16.mxu0 (!%p2129_p13), %v2474_v23  ;;  %2307 = vmatprep.subr.bf16.mxu1 (!%p2129_p13), %v2474_v23  ;;  %v2987_v23 = vrot.slane (!%p2129_p13), %v724_v20, %v732_v21 }
  0x81   : > { %997 = vmatpush1.bf16.msra.mxu0 (!%p2129_p13), %v2476_v24  ;;  %2323 = vmatpush1.bf16.msra.mxu1 (!%p2129_p13), %v2476_v24 }
  0x82   : > { %998 = vmatprep.subr.bf16.mxu0 (!%p2129_p13), %v2477_v25  ;;  %2308 = vmatprep.subr.bf16.mxu1 (!%p2129_p13), %v2477_v25 }
  0x85   : > { %999 = vmatpush1.bf16.msra.mxu0 (!%p2129_p13), %v2479_v26  ;;  %2324 = vmatpush1.bf16.msra.mxu1 (!%p2129_p13), %v2479_v26 }
  0x86   : > { %1000 = vmatprep.subr.bf16.mxu0 (!%p2129_p13), %v2480_v27  ;;  %2309 = vmatprep.subr.bf16.mxu1 (!%p2129_p13), %v2480_v27 }
  0x89   : > { %1001 = vmatpush1.bf16.msra.mxu0 (!%p2129_p13), %v2482_v28  ;;  %2325 = vmatpush1.bf16.msra.mxu1 (!%p2129_p13), %v2482_v28 }
  0x8a   : > { %1002 = vmatprep.subr.bf16.mxu0 (!%p2129_p13), %v2483_v29  ;;  %2310 = vmatprep.subr.bf16.mxu1 (!%p2129_p13), %v2483_v29 }
  0x8d   : > { %1003 = vmatpush1.bf16.msra.mxu0 (!%p2129_p13), %v2485_v30  ;;  %2326 = vmatpush1.bf16.msra.mxu1 (!%p2129_p13), %v2485_v30 }
  0x8e   : > { %1004 = vmatprep.subr.bf16.mxu0 (!%p2129_p13), %v2486_v31  ;;  %2311 = vmatprep.subr.bf16.mxu1 (!%p2129_p13), %v2486_v31 }
  0x91   : > { %1005 = vmatpush1.bf16.msra.mxu0 (!%p2129_p13), %v2488_v32  ;;  %2327 = vmatpush1.bf16.msra.mxu1 (!%p2129_p13), %v2488_v32 }
  0x92   : > { %1006 = vmatprep.subr.bf16.mxu0 (!%p2129_p13), %v2489_v1  ;;  %2312 = vmatprep.subr.bf16.mxu1 (!%p2129_p13), %v2489_v1 }
  0x95   : > { %1007 = vmatpush1.bf16.msra.mxu0 (!%p2129_p13), %v2491_v2  ;;  %2328 = vmatpush1.bf16.msra.mxu1 (!%p2129_p13), %v2491_v2 }
 0x11e   : > { %v2773_v33 = vpop.f32.mrb[0].mxu0  ;;  %v2775_v34 = vpop.f32.mrb[0].mxu1 }
 0x11f   : > { %v2777_v35 = vpop.f32.mrb[1].mxu0  ;;  %v2779_v36 = vpop.f32.mrb[1].mxu1  ;;  %644 = vst [vmem:[#allocation2] sm:$0xff] (!%p2129_p13), %v2773_v33  ;;  %660 = vst [vmem:[#allocation2 + $0x80] sm:$0xff] (!%p2129_p13), %v2775_v34 }
 0x120   : > { %v2781_v37 = vpop.f32.mrb[2].mxu0  ;;  %v2783_v38 = vpop.f32.mrb[2].mxu1  ;;  %645 = vst [vmem:[#allocation2 + $0x8] sm:$0xff] (!%p2129_p13), %v2777_v35  ;;  %661 = vst [vmem:[#allocation2 + $0x88] sm:$0xff] (!%p2129_p13), %v2779_v36 }
 0x121   : > { %v2785_v39 = vpop.f32.mrb[3].mxu0  ;;  %v2787_v40 = vpop.f32.mrb[3].mxu1  ;;  %646 = vst [vmem:[#allocation2 + $0x10] sm:$0xff] (!%p2129_p13), %v2781_v37  ;;  %662 = vst [vmem:[#allocation2 + $0x90] sm:$0xff] (!%p2129_p13), %v2783_v38  ;;  %1009 = vmatmul.mubr.bf16.vlgmr.msra.gmra.mrb[0].mxu0 (!%p2129_p13), %v2492_v3  ;;  %1049 = vmatmul.mubr.bf16.vlgmr.msra.gmra.mrb[0].mxu1 (!%p2129_p13), %v2495_v4 }
 0x122   : > { %647 = vst [vmem:[#allocation2 + $0x18] sm:$0xff] (!%p2129_p13), %v2785_v39  ;;  %663 = vst [vmem:[#allocation2 + $0x98] sm:$0xff] (!%p2129_p13), %v2787_v40  ;;  %1018 = vmatprep.mubr.bf16.mxu0 (!%p2129_p13), %v2498_v5  ;;  %1058 = vmatprep.mubr.bf16.mxu1 (!%p2129_p13), %v2500_v6 }
 0x126   : > { %v2789_v41 = vpop.f32.mrb[4].mxu0  ;;  %v2791_v42 = vpop.f32.mrb[4].mxu1 }
 0x127   : > { %v2793_v43 = vpop.f32.mrb[5].mxu0  ;;  %v2795_v44 = vpop.f32.mrb[5].mxu1  ;;  %648 = vst [vmem:[#allocation2 + $0x20] sm:$0xff] (!%p2129_p13), %v2789_v41  ;;  %664 = vst [vmem:[#allocation2 + $0xa0] sm:$0xff] (!%p2129_p13), %v2791_v42 }
 0x128   : > { %v2797_v45 = vpop.f32.mrb[6].mxu0  ;;  %v2799_v46 = vpop.f32.mrb[6].mxu1  ;;  %649 = vst [vmem:[#allocation2 + $0x28] sm:$0xff] (!%p2129_p13), %v2793_v43  ;;  %665 = vst [vmem:[#allocation2 + $0xa8] sm:$0xff] (!%p2129_p13), %v2795_v44 }
 0x129   : > { %v2801_v47 = vpop.f32.mrb[7].mxu0  ;;  %v2803_v48 = vpop.f32.mrb[7].mxu1  ;;  %650 = vst [vmem:[#allocation2 + $0x30] sm:$0xff] (!%p2129_p13), %v2797_v45  ;;  %666 = vst [vmem:[#allocation2 + $0xb0] sm:$0xff] (!%p2129_p13), %v2799_v46  ;;  %1019 = vmatmul.mubr.bf16.gmra.mrb[4].mxu0 (!%p2129_p13), %v2502_v7  ;;  %1059 = vmatmul.mubr.bf16.gmra.mrb[4].mxu1 (!%p2129_p13), %v2503_v8 }
 0x12a   : > { %651 = vst [vmem:[#allocation2 + $0x38] sm:$0xff] (!%p2129_p13), %v2801_v47  ;;  %667 = vst [vmem:[#allocation2 + $0xb8] sm:$0xff] (!%p2129_p13), %v2803_v48  ;;  %1028 = vmatprep.mubr.bf16.mxu0 (!%p2129_p13), %v2504_v9  ;;  %1068 = vmatprep.mubr.bf16.mxu1 (!%p2129_p13), %v2506_v10 }
 0x12e   : > { %v2805_v49 = vpop.f32.mrb[8].mxu0  ;;  %v2807_v50 = vpop.f32.mrb[8].mxu1 }
 0x12f   : > { %v2809_v51 = vpop.f32.mrb[9].mxu0  ;;  %v2811_v52 = vpop.f32.mrb[9].mxu1  ;;  %652 = vst [vmem:[#allocation2 + $0x40] sm:$0xff] (!%p2129_p13), %v2805_v49  ;;  %668 = vst [vmem:[#allocation2 + $0xc0] sm:$0xff] (!%p2129_p13), %v2807_v50 }
 0x130   : > { %v2813_v53 = vpop.f32.mrb[10].mxu0  ;;  %v2815_v54 = vpop.f32.mrb[10].mxu1  ;;  %653 = vst [vmem:[#allocation2 + $0x48] sm:$0xff] (!%p2129_p13), %v2809_v51  ;;  %669 = vst [vmem:[#allocation2 + $0xc8] sm:$0xff] (!%p2129_p13), %v2811_v52 }
 0x131   : > { %v2817_v55 = vpop.f32.mrb[11].mxu0  ;;  %v2819_v56 = vpop.f32.mrb[11].mxu1  ;;  %654 = vst [vmem:[#allocation2 + $0x50] sm:$0xff] (!%p2129_p13), %v2813_v53  ;;  %670 = vst [vmem:[#allocation2 + $0xd0] sm:$0xff] (!%p2129_p13), %v2815_v54  ;;  %1029 = vmatmul.mubr.bf16.gmra.mrb[8].mxu0 (!%p2129_p13), %v2508_v11  ;;  %1069 = vmatmul.mubr.bf16.gmra.mrb[8].mxu1 (!%p2129_p13), %v2509_v12 }
 0x132   : > { %655 = vst [vmem:[#allocation2 + $0x58] sm:$0xff] (!%p2129_p13), %v2817_v55  ;;  %671 = vst [vmem:[#allocation2 + $0xd8] sm:$0xff] (!%p2129_p13), %v2819_v56  ;;  %1038 = vmatprep.mubr.bf16.mxu0 (!%p2129_p13), %v2510_v13  ;;  %1078 = vmatprep.mubr.bf16.mxu1 (!%p2129_p13), %v2512_v14 }
 0x133   : > { %643 = sbr.rel (%p2129_p13) target bundleno = 533 (0x215), region = 90 }
 0x136   : > { %v2821_v57 = vpop.f32.mrb[12].mxu0  ;;  %v2823_v58 = vpop.f32.mrb[12].mxu1 }
 0x137   : > { %v2825_v59 = vpop.f32.mrb[13].mxu0  ;;  %v2827_v60 = vpop.f32.mrb[13].mxu1  ;;  %656 = vst [vmem:[#allocation2 + $0x60] sm:$0xff] (!%p2129_p13), %v2821_v57  ;;  %672 = vst [vmem:[#allocation2 + $0xe0] sm:$0xff] (!%p2129_p13), %v2823_v58 }
 0x138   : > { %v2829_v61 = vpop.f32.mrb[14].mxu0  ;;  %v2831_v62 = vpop.f32.mrb[14].mxu1  ;;  %657 = vst [vmem:[#allocation2 + $0x68] sm:$0xff] (!%p2129_p13), %v2825_v59  ;;  %673 = vst [vmem:[#allocation2 + $0xe8] sm:$0xff] (!%p2129_p13), %v2827_v60 }
 0x139   : > { %v2833_v63 = vpop.f32.mrb[15].mxu0  ;;  %v2835_v0 = vpop.f32.mrb[15].mxu1  ;;  %658 = vst [vmem:[#allocation2 + $0x70] sm:$0xff] (!%p2129_p13), %v2829_v61  ;;  %674 = vst [vmem:[#allocation2 + $0xf0] sm:$0xff] (!%p2129_p13), %v2831_v62  ;;  %1039 = vmatmul.mubr.bf16.gmra.mrb[12].mxu0 (!%p2129_p13), %v2514_v15  ;;  %1079 = vmatmul.mubr.bf16.gmra.mrb[12].mxu1 (!%p2129_p13), %v2515_v16 }
 0x13a   : > { %659 = vst [vmem:[#allocation2 + $0x78] sm:$0xff] %v2833_v63  ;;  %675 = vst [vmem:[#allocation2 + $0xf8] sm:$0xff] %v2835_v0 }
 0x1f4   : > { %v1010_v24 = vpop.f32.mrb[0].mxu0  ;;  %v1050_v25 = vpop.f32.mrb[0].mxu1 }
 0x1f5   : > { %v1011_v26 = vadd.f32 %v1010_v24, %v2985_v22  ;;  %v1051_v27 = vadd.f32 %v1050_v25, %v2985_v22  ;;  %v1012_v28 = vpop.f32.mrb[1].mxu0  ;;  %v1052_v29 = vpop.f32.mrb[1].mxu1 }
 0x1f6   : > { %v1013_v30 = vadd.f32 %v1012_v28, %v2987_v23  ;;  %v1053_v31 = vadd.f32 %v1052_v29, %v2987_v23  ;;  %v1014_v32 = vpop.f32.mrb[2].mxu0  ;;  %v1054_v1 = vpop.f32.mrb[2].mxu1 }
 0x1f7   : > { %v1015_v2 = vadd.f32 %v1014_v32, %v2985_v22  ;;  %v1055_v3 = vadd.f32 %v1054_v1, %v2985_v22  ;;  %v1016_v4 = vpop.f32.mrb[3].mxu0  ;;  %v1056_v5 = vpop.f32.mrb[3].mxu1 }
 0x1f8   : > { %v2249_v6 = vpack.c.bf16 %v1013_v30, %v1011_v26  ;;  %v2257_v7 = vpack.c.bf16 %v1053_v31, %v1051_v27  ;;  %v1017_v8 = vadd.f32 %v1016_v4, %v2987_v23  ;;  %v1057_v9 = vadd.f32 %v1056_v5, %v2987_v23 }
 0x1fa   : > { %1185 = vst [vmem:[%s2743_s23] sm:$0xff] %v2249_v6  ;;  %1193 = vst [vmem:[%s2743_s23 + $0x40] sm:$0xff] %v2257_v7  ;;  %v2250_v10 = vpack.c.bf16 %v1017_v8, %v1015_v2  ;;  %v2258_v11 = vpack.c.bf16 %v1057_v9, %v1055_v3 }
 0x1fc   : > { %1186 = vst [vmem:[%s2743_s23 + $0x8] sm:$0xff] %v2250_v10  ;;  %1194 = vst [vmem:[%s2743_s23 + $0x48] sm:$0xff] %v2258_v11  ;;  %v1020_v12 = vpop.f32.mrb[4].mxu0  ;;  %v1060_v13 = vpop.f32.mrb[4].mxu1 }
 0x1fd   : > { %v1021_v14 = vadd.f32 %v1020_v12, %v2985_v22  ;;  %v1061_v15 = vadd.f32 %v1060_v13, %v2985_v22  ;;  %v1022_v16 = vpop.f32.mrb[5].mxu0  ;;  %v1062_v17 = vpop.f32.mrb[5].mxu1 }
 0x1fe   : > { %v1023_v18 = vadd.f32 %v1022_v16, %v2987_v23  ;;  %v1063_v19 = vadd.f32 %v1062_v17, %v2987_v23  ;;  %v1024_v20 = vpop.f32.mrb[6].mxu0  ;;  %v1064_v21 = vpop.f32.mrb[6].mxu1 }
 0x1ff   : > { %v1025_v24 = vadd.f32 %v1024_v20, %v2985_v22  ;;  %v1065_v25 = vadd.f32 %v1064_v21, %v2985_v22  ;;  %v1026_v26 = vpop.f32.mrb[7].mxu0  ;;  %v1066_v27 = vpop.f32.mrb[7].mxu1 }
 0x200   : > { %v2251_v28 = vpack.c.bf16 %v1023_v18, %v1021_v14  ;;  %v2259_v29 = vpack.c.bf16 %v1063_v19, %v1061_v15  ;;  %v1027_v30 = vadd.f32 %v1026_v26, %v2987_v23  ;;  %v1067_v31 = vadd.f32 %v1066_v27, %v2987_v23 }
 0x202   : > { %1187 = vst [vmem:[%s2743_s23 + $0x10] sm:$0xff] %v2251_v28  ;;  %1195 = vst [vmem:[%s2743_s23 + $0x50] sm:$0xff] %v2259_v29  ;;  %v2252_v32 = vpack.c.bf16 %v1027_v30, %v1025_v24  ;;  %v2260_v1 = vpack.c.bf16 %v1067_v31, %v1065_v25 }
 0x204   : > { %1188 = vst [vmem:[%s2743_s23 + $0x18] sm:$0xff] %v2252_v32  ;;  %1196 = vst [vmem:[%s2743_s23 + $0x58] sm:$0xff] %v2260_v1  ;;  %v1030_v2 = vpop.f32.mrb[8].mxu0  ;;  %v1070_v3 = vpop.f32.mrb[8].mxu1 }
 0x205   : > { %v1031_v4 = vadd.f32 %v1030_v2, %v2985_v22  ;;  %v1071_v5 = vadd.f32 %v1070_v3, %v2985_v22  ;;  %v1032_v6 = vpop.f32.mrb[9].mxu0  ;;  %v1072_v7 = vpop.f32.mrb[9].mxu1 }
 0x206   : > { %v1033_v8 = vadd.f32 %v1032_v6, %v2987_v23  ;;  %v1073_v9 = vadd.f32 %v1072_v7, %v2987_v23  ;;  %v1034_v10 = vpop.f32.mrb[10].mxu0  ;;  %v1074_v11 = vpop.f32.mrb[10].mxu1 }
 0x207   : > { %v1035_v12 = vadd.f32 %v1034_v10, %v2985_v22  ;;  %v1075_v13 = vadd.f32 %v1074_v11, %v2985_v22  ;;  %v1036_v14 = vpop.f32.mrb[11].mxu0  ;;  %v1076_v15 = vpop.f32.mrb[11].mxu1 }
 0x208   : > { %v2253_v16 = vpack.c.bf16 %v1033_v8, %v1031_v4  ;;  %v2261_v17 = vpack.c.bf16 %v1073_v9, %v1071_v5  ;;  %v1037_v18 = vadd.f32 %v1036_v14, %v2987_v23  ;;  %v1077_v19 = vadd.f32 %v1076_v15, %v2987_v23 }
 0x20a   : > { %1189 = vst [vmem:[%s2743_s23 + $0x20] sm:$0xff] %v2253_v16  ;;  %1197 = vst [vmem:[%s2743_s23 + $0x60] sm:$0xff] %v2261_v17  ;;  %v2254_v20 = vpack.c.bf16 %v1037_v18, %v1035_v12  ;;  %v2262_v21 = vpack.c.bf16 %v1077_v19, %v1075_v13 }
 0x20c   : > { %1190 = vst [vmem:[%s2743_s23 + $0x28] sm:$0xff] %v2254_v20  ;;  %1198 = vst [vmem:[%s2743_s23 + $0x68] sm:$0xff] %v2262_v21  ;;  %v1040_v24 = vpop.f32.mrb[12].mxu0  ;;  %v1080_v25 = vpop.f32.mrb[12].mxu1 }
 0x20d   : > { %v1041_v26 = vadd.f32 %v1040_v24, %v2985_v22  ;;  %v1081_v27 = vadd.f32 %v1080_v25, %v2985_v22  ;;  %v1042_v28 = vpop.f32.mrb[13].mxu0  ;;  %v1082_v29 = vpop.f32.mrb[13].mxu1 }
 0x20e   : > { %v1043_v30 = vadd.f32 %v1042_v28, %v2987_v23  ;;  %v1083_v31 = vadd.f32 %v1082_v29, %v2987_v23  ;;  %v1044_v32 = vpop.f32.mrb[14].mxu0  ;;  %v1084_v1 = vpop.f32.mrb[14].mxu1 }
 0x20f   : > { %v1045_v2 = vadd.f32 %v1044_v32, %v2985_v22  ;;  %v1085_v3 = vadd.f32 %v1084_v1, %v2985_v22  ;;  %v1046_v4 = vpop.f32.mrb[15].mxu0  ;;  %v1086_v5 = vpop.f32.mrb[15].mxu1 }
 0x210   : > { %v2255_v6 = vpack.c.bf16 %v1043_v30, %v1041_v26  ;;  %v2263_v7 = vpack.c.bf16 %v1083_v31, %v1081_v27  ;;  %v1047_v8 = vadd.f32 %v1046_v4, %v2987_v23  ;;  %v1087_v9 = vadd.f32 %v1086_v5, %v2987_v23 }
 0x212   : > { %1191 = vst [vmem:[%s2743_s23 + $0x30] sm:$0xff] %v2255_v6  ;;  %1199 = vst [vmem:[%s2743_s23 + $0x70] sm:$0xff] %v2263_v7  ;;  %v2256_v10 = vpack.c.bf16 %v1047_v8, %v1045_v2  ;;  %v2264_v11 = vpack.c.bf16 %v1087_v9, %v1085_v3 }
 0x214   : > { %1192 = vst [vmem:[%s2743_s23 + $0x38] sm:$0xff] %v2256_v10  ;;  %1200 = vst [vmem:[%s2743_s23 + $0x78] sm:$0xff] %v2264_v11 }
 0x215 PF: > { %p2194_p0 = scmp.le.s32.totalorder %s2604_s26, 0 }
 0x216   : > { %v1205_v12 = vld [vmem:[#allocation2] sm:$0xff] (!%p2194_p0)  ;;  %v1206_v22 = vld [vmem:[#allocation2 + $0x8] sm:$0xff] (!%p2194_p0)  ;;  %v1207_v13 = vld [vmem:[#allocation2 + $0x10] sm:$0xff] (!%p2194_p0) }
 0x217   : > { %1204 = sbr.rel (%p2194_p0) target bundleno = 553 (0x229), region = 94  ;;  %v1237_v14 = vadd.f32 (!%p2194_p0), %v1205_v12, %v2773_v33  ;;  %v1238_v15 = vadd.f32 (!%p2194_p0), %v1206_v22, %v2777_v35  ;;  %v1239_v16 = vadd.f32 (!%p2194_p0), %v1207_v13, %v2781_v37  ;;  %v1208_v23 = vld [vmem:[#allocation2 + $0x18] sm:$0xff] (!%p2194_p0)  ;;  %v1209_v17 = vld [vmem:[#allocation2 + $0x20] sm:$0xff] (!%p2194_p0)  ;;  %v1210_v18 = vld [vmem:[#allocation2 + $0x28] sm:$0xff] (!%p2194_p0) }
 0x218   : > { %v1240_v19 = vadd.f32 (!%p2194_p0), %v1208_v23, %v2785_v39  ;;  %v1241_v20 = vadd.f32 (!%p2194_p0), %v1209_v17, %v2789_v41  ;;  %v1242_v21 = vadd.f32 (!%p2194_p0), %v1210_v18, %v2793_v43  ;;  %v1211_v24 = vld [vmem:[#allocation2 + $0x30] sm:$0xff] (!%p2194_p0)  ;;  %v1212_v25 = vld [vmem:[#allocation2 + $0x38] sm:$0xff] (!%p2194_p0)  ;;  %v1213_v26 = vld [vmem:[#allocation2 + $0x40] sm:$0xff] (!%p2194_p0) }
 0x219   : > { %1269 = vst [vmem:[#allocation2] sm:$0xff] (!%p2194_p0), %v1237_v14  ;;  %1270 = vst [vmem:[#allocation2 + $0x8] sm:$0xff] (!%p2194_p0), %v1238_v15  ;;  %v1243_v33 = vadd.f32 (!%p2194_p0), %v1211_v24, %v2797_v45  ;;  %v1244_v35 = vadd.f32 (!%p2194_p0), %v1212_v25, %v2801_v47  ;;  %v1245_v37 = vadd.f32 (!%p2194_p0), %v1213_v26, %v2805_v49  ;;  %v1214_v27 = vld [vmem:[#allocation2 + $0x48] sm:$0xff] (!%p2194_p0)  ;;  %v1215_v28 = vld [vmem:[#allocation2 + $0x50] sm:$0xff] (!%p2194_p0) }
 0x21a   : > { %1271 = vst [vmem:[#allocation2 + $0x10] sm:$0xff] (!%p2194_p0), %v1239_v16  ;;  %v1216_v29 = vld [vmem:[#allocation2 + $0x58] sm:$0xff] (!%p2194_p0)  ;;  %1272 = vst [vmem:[#allocation2 + $0x18] sm:$0xff] (!%p2194_p0), %v1240_v19  ;;  %v1246_v39 = vadd.f32 (!%p2194_p0), %v1214_v27, %v2809_v51  ;;  %v1247_v41 = vadd.f32 (!%p2194_p0), %v1215_v28, %v2813_v53  ;;  %v1217_v30 = vld [vmem:[#allocation2 + $0x60] sm:$0xff] (!%p2194_p0) }
 0x21b   : > { %1273 = vst [vmem:[#allocation2 + $0x20] sm:$0xff] (!%p2194_p0), %v1241_v20  ;;  %1274 = vst [vmem:[#allocation2 + $0x28] sm:$0xff] (!%p2194_p0), %v1242_v21  ;;  %v1248_v43 = vadd.f32 (!%p2194_p0), %v1216_v29, %v2817_v55  ;;  %v1218_v31 = vld [vmem:[#allocation2 + $0x68] sm:$0xff] (!%p2194_p0)  ;;  %v1219_v32 = vld [vmem:[#allocation2 + $0x70] sm:$0xff] (!%p2194_p0)  ;;  %v1249_v45 = vadd.f32 (!%p2194_p0), %v1217_v30, %v2821_v57 }
 0x21c   : > { %1275 = vst [vmem:[#allocation2 + $0x30] sm:$0xff] (!%p2194_p0), %v1243_v33  ;;  %1276 = vst [vmem:[#allocation2 + $0x38] sm:$0xff] (!%p2194_p0), %v1244_v35  ;;  %v1250_v47 = vadd.f32 (!%p2194_p0), %v1218_v31, %v2825_v59  ;;  %v1251_v49 = vadd.f32 (!%p2194_p0), %v1219_v32, %v2829_v61  ;;  %v1220_v1 = vld [vmem:[#allocation2 + $0x78] sm:$0xff] (!%p2194_p0)  ;;  %v1221_v2 = vld [vmem:[#allocation2 + $0x80] sm:$0xff] (!%p2194_p0) }
 0x21d   : > { %1277 = vst [vmem:[#allocation2 + $0x40] sm:$0xff] (!%p2194_p0), %v1245_v37  ;;  %v1222_v3 = vld [vmem:[#allocation2 + $0x88] sm:$0xff] (!%p2194_p0)  ;;  %1278 = vst [vmem:[#allocation2 + $0x48] sm:$0xff] (!%p2194_p0), %v1246_v39  ;;  %v1252_v51 = vadd.f32 (!%p2194_p0), %v1220_v1, %v2833_v63  ;;  %v1253_v53 = vadd.f32 (!%p2194_p0), %v1221_v2, %v2775_v34  ;;  %v1223_v4 = vld [vmem:[#allocation2 + $0x90] sm:$0xff] (!%p2194_p0) }
 0x21e   : > { %1279 = vst [vmem:[#allocation2 + $0x50] sm:$0xff] %v1247_v41  ;;  %1280 = vst [vmem:[#allocation2 + $0x58] sm:$0xff] %v1248_v43  ;;  %v1254_v55 = vadd.f32 %v1222_v3, %v2779_v36  ;;  %v1224_v5 = vld [vmem:[#allocation2 + $0x98] sm:$0xff]  ;;  %v1225_v6 = vld [vmem:[#allocation2 + $0xa0] sm:$0xff]  ;;  %v1255_v57 = vadd.f32 %v1223_v4, %v2783_v38 }
 0x21f   : > { %1281 = vst [vmem:[#allocation2 + $0x60] sm:$0xff] %v1249_v45  ;;  %1282 = vst [vmem:[#allocation2 + $0x68] sm:$0xff] %v1250_v47  ;;  %v1256_v59 = vadd.f32 %v1224_v5, %v2787_v40  ;;  %v1257_v61 = vadd.f32 %v1225_v6, %v2791_v42  ;;  %v1226_v7 = vld [vmem:[#allocation2 + $0xa8] sm:$0xff]  ;;  %v1227_v8 = vld [vmem:[#allocation2 + $0xb0] sm:$0xff] }
 0x220   : > { %1283 = vst [vmem:[#allocation2 + $0x70] sm:$0xff] %v1251_v49  ;;  %v1228_v9 = vld [vmem:[#allocation2 + $0xb8] sm:$0xff]  ;;  %1284 = vst [vmem:[#allocation2 + $0x78] sm:$0xff] %v1252_v51  ;;  %v1258_v34 = vadd.f32 %v1226_v7, %v2795_v44  ;;  %v1259_v36 = vadd.f32 %v1227_v8, %v2799_v46  ;;  %v1229_v10 = vld [vmem:[#allocation2 + $0xc0] sm:$0xff] }
 0x221   : > { %1285 = vst [vmem:[#allocation2 + $0x80] sm:$0xff] %v1253_v53  ;;  %1286 = vst [vmem:[#allocation2 + $0x88] sm:$0xff] %v1254_v55  ;;  %v1260_v63 = vadd.f32 %v1228_v9, %v2803_v48  ;;  %v1230_v11 = vld [vmem:[#allocation2 + $0xc8] sm:$0xff]  ;;  %v1231_v12 = vld [vmem:[#allocation2 + $0xd0] sm:$0xff]  ;;  %v1261_v38 = vadd.f32 %v1229_v10, %v2807_v50 }
 0x222   : > { %1287 = vst [vmem:[#allocation2 + $0x90] sm:$0xff] %v1255_v57  ;;  %1288 = vst [vmem:[#allocation2 + $0x98] sm:$0xff] %v1256_v59  ;;  %v1262_v40 = vadd.f32 %v1230_v11, %v2811_v52  ;;  %v1263_v42 = vadd.f32 %v1231_v12, %v2815_v54  ;;  %v1232_v22 = vld [vmem:[#allocation2 + $0xd8] sm:$0xff]  ;;  %v1233_v13 = vld [vmem:[#allocation2 + $0xe0] sm:$0xff] }
 0x223   : > { %1289 = vst [vmem:[#allocation2 + $0xa0] sm:$0xff] %v1257_v61  ;;  %v1234_v14 = vld [vmem:[#allocation2 + $0xe8] sm:$0xff]  ;;  %1290 = vst [vmem:[#allocation2 + $0xa8] sm:$0xff] %v1258_v34  ;;  %v1264_v44 = vadd.f32 %v1232_v22, %v2819_v56  ;;  %v1265_v46 = vadd.f32 %v1233_v13, %v2823_v58  ;;  %v1235_v15 = vld [vmem:[#allocation2 + $0xf0] sm:$0xff] }
 0x224   : > { %1291 = vst [vmem:[#allocation2 + $0xb0] sm:$0xff] %v1259_v36  ;;  %1292 = vst [vmem:[#allocation2 + $0xb8] sm:$0xff] %v1260_v63  ;;  %v1266_v48 = vadd.f32 %v1234_v14, %v2827_v60  ;;  %v1236_v16 = vld [vmem:[#allocation2 + $0xf8] sm:$0xff]  ;;  %v1267_v50 = vadd.f32 %v1235_v15, %v2831_v62 }
 0x225   : > { %1293 = vst [vmem:[#allocation2 + $0xc0] sm:$0xff] %v1261_v38  ;;  %1294 = vst [vmem:[#allocation2 + $0xc8] sm:$0xff] %v1262_v40  ;;  %v1268_v52 = vadd.f32 %v1236_v16, %v2835_v0 }
 0x226   : > { %1295 = vst [vmem:[#allocation2 + $0xd0] sm:$0xff] %v1263_v42  ;;  %1296 = vst [vmem:[#allocation2 + $0xd8] sm:$0xff] %v1264_v44 }
 0x227   : > { %1297 = vst [vmem:[#allocation2 + $0xe0] sm:$0xff] %v1265_v46  ;;  %1298 = vst [vmem:[#allocation2 + $0xe8] sm:$0xff] %v1266_v48 }
 0x228   : > { %1299 = vst [vmem:[#allocation2 + $0xf0] sm:$0xff] %v1267_v50  ;;  %1300 = vst [vmem:[#allocation2 + $0xf8] sm:$0xff] %v1268_v52 }
 0x229 PF: > { %p2195_p1 = scmp.ne.s32.totalorder %s2604_s26, 2 }
 0x22a   : > { %v1345_v54 = vld [vmem:[%s2738_s20 + $0x40] sm:$0xff] (!%p2195_p1)  ;;  %v2623_v58 = vmov (!%p2195_p1), 0   ;;  %v1346_v60 = vld [vmem:[%s2738_s20 + $0x48] sm:$0xff] (!%p2195_p1)  ;;  %v1340_v0 = vld [vmem:[%s2738_s20 + $0x18] sm:$0xff] (!%p2195_p1) }
 0x22b   : > { %1304 = sbr.rel (%p2195_p1) target bundleno = 939 (0x3ab), region = 98  ;;  %v1337_v56 = vld [vmem:[%s2738_s20] sm:$0xff] (!%p2195_p1)  ;;  %2517 = vset.pattern.permute.xlu1 (!%p2195_p1), %v2623_v58  ;;  %2516 = vset.pattern.permute.xlu0 (!%p2195_p1), %v2623_v58  ;;  %v1338_v62 = vld [vmem:[%s2738_s20 + $0x8] sm:$0xff] (!%p2195_p1)  ;;  %v1339_v18 = vld [vmem:[%s2738_s20 + $0x10] sm:$0xff] (!%p2195_p1) }
 0x22c   : > { %1395 = vperm.xlu1 (!%p2195_p1), %2517, %v1345_v54   ;;  %1355 = vperm.xlu0 (!%p2195_p1), %2516, %v1337_v56   ;;  %v2518_v23 = vld [vmem:[%s3240_s4 + $0x4] ss:$8 sps:$4 sm:$0xff] (!%p2195_p1)   ;;  %v2520_v17 = vld [vmem:[%s3240_s4] ss:$8 sps:$4 sm:$0xff] (!%p2195_p1)   ;;  %v2521_v19 = vld [vmem:[%s3240_s4 + $0x14] ss:$8 sps:$4 sm:$0xff] (!%p2195_p1)  }
 0x22d   : > { %1721 = vmatprep.subr.bf16.mxu0 (!%p2195_p1), %v2518_v23  ;;  %2329 = vmatprep.subr.bf16.mxu1 (!%p2195_p1), %v2518_v23  ;;  %v2523_v20 = vld [vmem:[%s3240_s4 + $0x10] ss:$8 sps:$4 sm:$0xff] (!%p2195_p1)   ;;  %v2524_v25 = vld [vmem:[%s3240_s4 + $0x24] ss:$8 sps:$4 sm:$0xff] (!%p2195_p1)   ;;  %v2526_v26 = vld [vmem:[%s3240_s4 + $0x20] ss:$8 sps:$4 sm:$0xff] (!%p2195_p1)  }
 0x22e   : > { %1722 = vmatpush1.bf16.msra.mxu0 (!%p2195_p1), %v2520_v17  ;;  %2345 = vmatpush1.bf16.msra.mxu1 (!%p2195_p1), %v2520_v17  ;;  %v1348_v21 = vld [vmem:[%s2738_s20 + $0x58] sm:$0xff] (!%p2195_p1)  ;;  %v1347_v24 = vld [vmem:[%s2738_s20 + $0x50] sm:$0xff] (!%p2195_p1)  ;;  %v1342_v33 = vld [vmem:[%s2738_s20 + $0x28] sm:$0xff] (!%p2195_p1) }
 0x22f   : > { %1723 = vmatprep.subr.bf16.mxu0 (!%p2195_p1), %v2521_v19  ;;  %2330 = vmatprep.subr.bf16.mxu1 (!%p2195_p1), %v2521_v19  ;;  %v1341_v35 = vld [vmem:[%s2738_s20 + $0x20] sm:$0xff] (!%p2195_p1)  ;;  %v2527_v37 = vld [vmem:[%s3240_s4 + $0x34] ss:$8 sps:$4 sm:$0xff] (!%p2195_p1)   ;;  %v2529_v27 = vld [vmem:[%s3240_s4 + $0x30] ss:$8 sps:$4 sm:$0xff] (!%p2195_p1)  }
 0x230   : > { %1400 = vperm.xlu1 (!%p2195_p1), %2517, %v1346_v60   ;;  %1360 = vperm.xlu0 (!%p2195_p1), %2516, %v1338_v62   ;;  %v1350_v28 = vld [vmem:[%s2738_s20 + $0x68] sm:$0xff] (!%p2195_p1)  ;;  %v1349_v29 = vld [vmem:[%s2738_s20 + $0x60] sm:$0xff] (!%p2195_p1)  ;;  %v1344_v43 = vld [vmem:[%s2738_s20 + $0x38] sm:$0xff] (!%p2195_p1) }
 0x231   : > { %v2530_v39 = vld [vmem:[%s3240_s4 + $0x44] ss:$8 sps:$4 sm:$0xff] (!%p2195_p1)   ;;  %v2532_v41 = vld [vmem:[%s3240_s4 + $0x40] ss:$8 sps:$4 sm:$0xff] (!%p2195_p1)   ;;  %v1343_v30 = vld [vmem:[%s2738_s20 + $0x30] sm:$0xff] (!%p2195_p1) }
 0x232   : > { %1724 = vmatpush1.bf16.msra.mxu0 %v2523_v20  ;;  %2346 = vmatpush1.bf16.msra.mxu1 %v2523_v20  ;;  %v2533_v31 = vld [vmem:[%s3240_s4 + $0x54] ss:$8 sps:$4 sm:$0xff]   ;;  %v2535_v32 = vld [vmem:[%s3240_s4 + $0x50] ss:$8 sps:$4 sm:$0xff]   ;;  %v2536_v49 = vld [vmem:[%s3240_s4 + $0x64] ss:$8 sps:$4 sm:$0xff]  }
 0x233   : > { %1725 = vmatprep.subr.bf16.mxu0 %v2524_v25  ;;  %2331 = vmatprep.subr.bf16.mxu1 %v2524_v25  ;;  %v1352_v45 = vld [vmem:[%s2738_s20 + $0x78] sm:$0xff]  ;;  %v1351_v47 = vld [vmem:[%s2738_s20 + $0x70] sm:$0xff]  ;;  %v2538_v1 = vld [vmem:[%s3240_s4 + $0x60] ss:$8 sps:$4 sm:$0xff]  }
 0x234   : > { %1370 = vperm.xlu1 %2517, %v1340_v0   ;;  %1365 = vperm.xlu0 %2516, %v1339_v18   ;;  %v2539_v2 = vld [vmem:[%s3240_s4 + $0x74] ss:$8 sps:$4 sm:$0xff]   ;;  %v2541_v3 = vld [vmem:[%s3240_s4 + $0x70] ss:$8 sps:$4 sm:$0xff]   ;;  %v2542_v51 = vld [vmem:[%s3240_s4 + $0x84] ss:$8 sps:$4 sm:$0xff]  }
 0x235   : > { %v2544_v53 = vld [vmem:[%s3240_s4 + $0x80] ss:$8 sps:$4 sm:$0xff]   ;;  %v2545_v55 = vld [vmem:[%s3240_s4 + $0x94] ss:$8 sps:$4 sm:$0xff]   ;;  %v2547_v4 = vld [vmem:[%s3240_s4 + $0x90] ss:$8 sps:$4 sm:$0xff]  }
 0x236   : > { %1726 = vmatpush1.bf16.msra.mxu0 %v2526_v26  ;;  %2347 = vmatpush1.bf16.msra.mxu1 %v2526_v26  ;;  %v2548_v5 = vld [vmem:[%s3240_s4 + $0xa4] ss:$8 sps:$4 sm:$0xff]   ;;  %v2550_v6 = vld [vmem:[%s3240_s4 + $0xa0] ss:$8 sps:$4 sm:$0xff]   ;;  %v2551_v57 = vld [vmem:[%s3240_s4 + $0xb4] ss:$8 sps:$4 sm:$0xff]  }
 0x237   : > { %1727 = vmatprep.subr.bf16.mxu0 %v2527_v37  ;;  %2332 = vmatprep.subr.bf16.mxu1 %v2527_v37  ;;  %v2553_v59 = vld [vmem:[%s3240_s4 + $0xb0] ss:$8 sps:$4 sm:$0xff]   ;;  %v2554_v61 = vld [vmem:[%s3240_s4 + $0xc4] ss:$8 sps:$4 sm:$0xff]   ;;  %v2556_v7 = vld [vmem:[%s3240_s4 + $0xc0] ss:$8 sps:$4 sm:$0xff]  }
 0x238   : > { %1410 = vperm.xlu1 %2517, %v1348_v21   ;;  %1405 = vperm.xlu0 %2516, %v1347_v24   ;;  %v2557_v8 = vld [vmem:[%s3240_s4 + $0xd4] ss:$8 sps:$4 sm:$0xff]   ;;  %v2559_v9 = vld [vmem:[%s3240_s4 + $0xd0] ss:$8 sps:$4 sm:$0xff]   ;;  %v2560_v34 = vld [vmem:[%s3240_s4 + $0xe4] ss:$8 sps:$4 sm:$0xff]  }
 0x239   : > { %v2562_v36 = vld [vmem:[%s3240_s4 + $0xe0] ss:$8 sps:$4 sm:$0xff]   ;;  %v2563_v63 = vld [vmem:[%s3240_s4 + $0xf4] ss:$8 sps:$4 sm:$0xff]   ;;  %v2565_v10 = vld [vmem:[%s3240_s4 + $0xf0] ss:$8 sps:$4 sm:$0xff]  }
 0x23a   : > { %1728 = vmatpush1.bf16.msra.mxu0 %v2529_v27  ;;  %2348 = vmatpush1.bf16.msra.mxu1 %v2529_v27  ;;  %v1321_v12 = vld [vmem:[#allocation2 + $0x80] sm:$0xff]  ;;  %v1322_v38 = vld [vmem:[#allocation2 + $0x88] sm:$0xff]  ;;  %v1323_v13 = vld [vmem:[#allocation2 + $0x90] sm:$0xff] }
 0x23b   : > { %1729 = vmatprep.subr.bf16.mxu0 %v2530_v39  ;;  %2333 = vmatprep.subr.bf16.mxu1 %v2530_v39  ;;  %v1305_v42 = vld [vmem:[#allocation2] sm:$0xff]  ;;  %v1306_v22 = vld [vmem:[#allocation2 + $0x8] sm:$0xff]  ;;  %v1324_v14 = vld [vmem:[#allocation2 + $0x98] sm:$0xff] }
 0x23c   : > { %1380 = vperm.xlu1 %2517, %v1342_v33   ;;  %1375 = vperm.xlu0 %2516, %v1341_v35   ;;  %v1307_v44 = vld [vmem:[#allocation2 + $0x10] sm:$0xff]  ;;  %v1308_v46 = vld [vmem:[#allocation2 + $0x18] sm:$0xff]  ;;  %v1310_v23 = vld [vmem:[#allocation2 + $0x28] sm:$0xff] }
 0x23d   : > { %v1312_v0 = vld [vmem:[#allocation2 + $0x38] sm:$0xff]  ;;  %v1311_v25 = vld [vmem:[#allocation2 + $0x30] sm:$0xff]  ;;  %v1309_v33 = vld [vmem:[#allocation2 + $0x20] sm:$0xff] }
 0x23e   : > { %1730 = vmatpush1.bf16.msra.mxu0 %v2532_v41  ;;  %2349 = vmatpush1.bf16.msra.mxu1 %v2532_v41  ;;  %v1327_v37 = vld [vmem:[#allocation2 + $0xb0] sm:$0xff]  ;;  %v1328_v27 = vld [vmem:[#allocation2 + $0xb8] sm:$0xff] }
 0x23f   : > { %1731 = vmatprep.subr.bf16.mxu0 %v2533_v31  ;;  %2334 = vmatprep.subr.bf16.mxu1 %v2533_v31 }
 0x240   : > { %1420 = vperm.xlu1 %2517, %v1350_v28   ;;  %1415 = vperm.xlu0 %2516, %v1349_v29   ;;  %v1325_v28 = vld [vmem:[#allocation2 + $0xa0] sm:$0xff]  ;;  %v1326_v29 = vld [vmem:[#allocation2 + $0xa8] sm:$0xff] }
 0x242   : > { %1732 = vmatpush1.bf16.msra.mxu0 %v2535_v32  ;;  %2350 = vmatpush1.bf16.msra.mxu1 %v2535_v32 }
 0x243   : > { %1733 = vmatprep.subr.bf16.mxu0 %v2536_v49  ;;  %2335 = vmatprep.subr.bf16.mxu1 %v2536_v49 }
 0x244   : > { %1390 = vperm.xlu1 %2517, %v1344_v43   ;;  %1385 = vperm.xlu0 %2516, %v1343_v30  }
 0x246   : > { %1734 = vmatpush1.bf16.msra.mxu0 %v2538_v1  ;;  %2351 = vmatpush1.bf16.msra.mxu1 %v2538_v1  ;;  %v1316_v1 = vld [vmem:[#allocation2 + $0x58] sm:$0xff] }
 0x247   : > { %1735 = vmatprep.subr.bf16.mxu0 %v2539_v2  ;;  %2336 = vmatprep.subr.bf16.mxu1 %v2539_v2  ;;  %v1314_v2 = vld [vmem:[#allocation2 + $0x48] sm:$0xff] }
 0x248   : > { %1430 = vperm.xlu1 %2517, %v1352_v45   ;;  %1425 = vperm.xlu0 %2516, %v1351_v47  }
 0x24a   : > { %1736 = vmatpush1.bf16.msra.mxu0 %v2541_v3  ;;  %2352 = vmatpush1.bf16.msra.mxu1 %v2541_v3 }
 0x24b   : > { %1737 = vmatprep.subr.bf16.mxu0 %v2542_v51  ;;  %2337 = vmatprep.subr.bf16.mxu1 %v2542_v51 }
 0x24e   : > { %1738 = vmatpush1.bf16.msra.mxu0 %v2544_v53  ;;  %2353 = vmatpush1.bf16.msra.mxu1 %v2544_v53 }
 0x24f   : > { %1739 = vmatprep.subr.bf16.mxu0 %v2545_v55  ;;  %2338 = vmatprep.subr.bf16.mxu1 %v2545_v55 }
 0x252   : > { %1740 = vmatpush1.bf16.msra.mxu0 %v2547_v4  ;;  %2354 = vmatpush1.bf16.msra.mxu1 %v2547_v4 }
 0x253   : > { %1741 = vmatprep.subr.bf16.mxu0 %v2548_v5  ;;  %2339 = vmatprep.subr.bf16.mxu1 %v2548_v5  ;;  %v1315_v5 = vld [vmem:[#allocation2 + $0x50] sm:$0xff] }
 0x256   : > { %1742 = vmatpush1.bf16.msra.mxu0 %v2550_v6  ;;  %2355 = vmatpush1.bf16.msra.mxu1 %v2550_v6 }
 0x257   : > { %1743 = vmatprep.subr.bf16.mxu0 %v2551_v57  ;;  %2340 = vmatprep.subr.bf16.mxu1 %v2551_v57  ;;  %v1313_v57 = vld [vmem:[#allocation2 + $0x40] sm:$0xff] }
 0x25a   : > { %1744 = vmatpush1.bf16.msra.mxu0 %v2553_v59  ;;  %2356 = vmatpush1.bf16.msra.mxu1 %v2553_v59 }
 0x25b   : > { %1745 = vmatprep.subr.bf16.mxu0 %v2554_v61  ;;  %2341 = vmatprep.subr.bf16.mxu1 %v2554_v61  ;;  %v1331_v61 = vld [vmem:[#allocation2 + $0xd0] sm:$0xff] }
 0x25e   : > { %1746 = vmatpush1.bf16.msra.mxu0 %v2556_v7  ;;  %2357 = vmatpush1.bf16.msra.mxu1 %v2556_v7  ;;  %v1332_v7 = vld [vmem:[#allocation2 + $0xd8] sm:$0xff] }
 0x25f   : > { %1747 = vmatprep.subr.bf16.mxu0 %v2557_v8  ;;  %2342 = vmatprep.subr.bf16.mxu1 %v2557_v8  ;;  %v1329_v8 = vld [vmem:[#allocation2 + $0xc0] sm:$0xff] }
 0x262   : > { %1748 = vmatpush1.bf16.msra.mxu0 %v2559_v9  ;;  %2358 = vmatpush1.bf16.msra.mxu1 %v2559_v9  ;;  %v1330_v9 = vld [vmem:[#allocation2 + $0xc8] sm:$0xff] }
 0x263   : > { %1749 = vmatprep.subr.bf16.mxu0 %v2560_v34  ;;  %2343 = vmatprep.subr.bf16.mxu1 %v2560_v34 }
 0x266   : > { %1750 = vmatpush1.bf16.msra.mxu0 %v2562_v36  ;;  %2359 = vmatpush1.bf16.msra.mxu1 %v2562_v36 }
 0x267   : > { %1751 = vmatprep.subr.bf16.mxu0 %v2563_v63  ;;  %2344 = vmatprep.subr.bf16.mxu1 %v2563_v63 }
 0x26a   : > { %1752 = vmatpush1.bf16.msra.mxu0 %v2565_v10  ;;  %2360 = vmatpush1.bf16.msra.mxu1 %v2565_v10 }
 0x2ab   : > { %v1396_v11 = vpop.permute.xlu1 %1395  ;;  %v1356_v40 = vpop.permute.xlu0 %1355 }
 0x2ac   : > { %v1449_v48 = vmul.f32 %v1396_v11, %v1321_v12  ;;  %v1450_v15 = vmul.f32 %v1396_v11, %v1322_v38  ;;  %v1433_v16 = vmul.f32 %v1356_v40, %v1305_v42  ;;  %v1434_v50 = vmul.f32 %v1356_v40, %v1306_v22  ;;  %v1320_v22 = vld [vmem:[#allocation2 + $0x78] sm:$0xff] }
 0x2af   : > { %v1401_v52 = vpop.permute.xlu1 %1400  ;;  %v1361_v54 = vpop.permute.xlu0 %1360 }
 0x2b0   : > { %v1451_v56 = vmul.f32 %v1401_v52, %v1323_v13  ;;  %v1452_v58 = vmul.f32 %v1401_v52, %v1324_v14  ;;  %v1435_v60 = vmul.f32 %v1361_v54, %v1307_v44  ;;  %v1436_v62 = vmul.f32 %v1361_v54, %v1308_v46  ;;  %v1318_v13 = vld [vmem:[#allocation2 + $0x68] sm:$0xff]  ;;  %v1317_v52 = vld [vmem:[#allocation2 + $0x60] sm:$0xff] }
 0x2b2   : > { %v1473_v17 = vpack.c.bf16 %v1451_v56, %v1449_v48  ;;  %v1465_v18 = vpack.c.bf16 %v1435_v60, %v1433_v16  ;;  %v1466_v19 = vpack.c.bf16 %v1436_v62, %v1434_v50  ;;  %v1474_v20 = vpack.c.bf16 %v1452_v58, %v1450_v15  ;;  %v1319_v16 = vld [vmem:[#allocation2 + $0x70] sm:$0xff]  ;;  %v1336_v58 = vld [vmem:[#allocation2 + $0xf8] sm:$0xff]  ;;  %v1333_v60 = vld [vmem:[#allocation2 + $0xe0] sm:$0xff] }
 0x2b3   : > { %v1371_v21 = vpop.permute.xlu1 %1370  ;;  %v1366_v24 = vpop.permute.xlu0 %1365  ;;  %v1335_v56 = vld [vmem:[#allocation2 + $0xf0] sm:$0xff]  ;;  %v1334_v62 = vld [vmem:[#allocation2 + $0xe8] sm:$0xff] }
 0x2b4   : > { %v1440_v26 = vmul.f32 %v1371_v21, %v1312_v0  ;;  %v1438_v35 = vmul.f32 %v1366_v24, %v1310_v23  ;;  %1753 = vmatprep.mubr.bf16.mxu0 %v1466_v19  ;;  %1793 = vmatprep.mubr.bf16.mxu1 %v1474_v20  ;;  %v1439_v41 = vmul.f32 %v1371_v21, %v1311_v25 }
 0x2b5   : > { %1754 = vmatmul.mubr.bf16.vlgmr.msra.gmra.mrb[0].mxu0 %v1465_v18  ;;  %1794 = vmatmul.mubr.bf16.vlgmr.msra.gmra.mrb[0].mxu1 %v1473_v17  ;;  %v1437_v43 = vmul.f32 %v1366_v24, %v1309_v33 }
 0x2b6   : > { %v1468_v39 = vpack.c.bf16 %v1440_v26, %v1438_v35 }
 0x2b7   : > { %v1411_v30 = vpop.permute.xlu1 %1410  ;;  %v1406_v31 = vpop.permute.xlu0 %1405  ;;  %v1467_v53 = vpack.c.bf16 %v1439_v41, %v1437_v43 }
 0x2b8   : > { %v1455_v32 = vmul.f32 %v1411_v30, %v1327_v37  ;;  %v1456_v45 = vmul.f32 %v1411_v30, %v1328_v27  ;;  %v1453_v47 = vmul.f32 %v1406_v31, %v1325_v28  ;;  %v1454_v49 = vmul.f32 %v1406_v31, %v1326_v29  ;;  %1763 = vmatprep.mubr.bf16.mxu0 %v1468_v39  ;;  %v1513_v37 = vld [vmem:[%s2743_s23] sm:$0xff]  ;;  %v1514_v28 = vld [vmem:[%s2743_s23 + $0x8] sm:$0xff] }
 0x2b9   : > { %v1521_v27 = vld [vmem:[%s2743_s23 + $0x40] sm:$0xff]  ;;  %v1529_v29 = vunpack.c.l.bf16 %v1513_v37  ;;  %v1522_v39 = vld [vmem:[%s2743_s23 + $0x48] sm:$0xff]  ;;  %v1530_v43 = vunpack.c.h.bf16 %v1513_v37  ;;  %v1531_v31 = vunpack.c.l.bf16 %v1514_v28 }
 0x2ba   : > { %v1475_v3 = vpack.c.bf16 %v1455_v32, %v1453_v47  ;;  %v1476_v51 = vpack.c.bf16 %v1456_v45, %v1454_v49  ;;  %v1545_v41 = vunpack.c.l.bf16 %v1521_v27  ;;  %v1546_v30 = vunpack.c.h.bf16 %v1521_v27  ;;  %v1515_v49 = vld [vmem:[%s2743_s23 + $0x10] sm:$0xff] }
 0x2bb   : > { %v1381_v55 = vpop.permute.xlu1 %1380  ;;  %v1376_v4 = vpop.permute.xlu0 %1375  ;;  %v1547_v45 = vunpack.c.l.bf16 %v1522_v39  ;;  %v1532_v47 = vunpack.c.h.bf16 %v1514_v28 }
 0x2bc   : > { %v1444_v6 = vmul.f32 %v1381_v55, %v1316_v1  ;;  %v1442_v59 = vmul.f32 %v1376_v4, %v1314_v2  ;;  %1803 = vmatprep.mubr.bf16.mxu1 %v1476_v51  ;;  %v1443_v36 = vmul.f32 %v1381_v55, %v1315_v5  ;;  %v1441_v63 = vmul.f32 %v1376_v4, %v1313_v57 }
 0x2bd   : > { %1764 = vmatmul.mubr.bf16.gmra.mrb[4].mxu0 %v1467_v53  ;;  %1804 = vmatmul.mubr.bf16.gmra.mrb[4].mxu1 %v1475_v3  ;;  %v1548_v51 = vunpack.c.h.bf16 %v1522_v39 }
 0x2be   : > { %v1470_v34 = vpack.c.bf16 %v1444_v6, %v1442_v59  ;;  %v1469_v46 = vpack.c.bf16 %v1443_v36, %v1441_v63  ;;  %v1523_v6 = vld [vmem:[%s2743_s23 + $0x50] sm:$0xff] }
 0x2bf   : > { %v1421_v10 = vpop.permute.xlu1 %1420  ;;  %v1416_v11 = vpop.permute.xlu0 %1415 }
 0x2c0   : > { %v1459_v12 = vmul.f32 %v1421_v10, %v1331_v61  ;;  %v1460_v38 = vmul.f32 %v1421_v10, %v1332_v7  ;;  %v1457_v40 = vmul.f32 %v1416_v11, %v1329_v8  ;;  %v1458_v42 = vmul.f32 %v1416_v11, %v1330_v9  ;;  %1773 = vmatprep.mubr.bf16.mxu0 %v1470_v34 }
 0x2c1   : > { %v1533_v9 = vunpack.c.l.bf16 %v1515_v49 }
 0x2c2   : > { %v1477_v14 = vpack.c.bf16 %v1459_v12, %v1457_v40  ;;  %v1478_v44 = vpack.c.bf16 %v1460_v38, %v1458_v42  ;;  %v1516_v12 = vld [vmem:[%s2743_s23 + $0x18] sm:$0xff] }
 0x2c3   : > { %v1391_v48 = vpop.permute.xlu1 %1390  ;;  %v1386_v15 = vpop.permute.xlu0 %1385 }
 0x2c4   : > { %v1448_v50 = vmul.f32 %v1391_v48, %v1320_v22  ;;  %v1446_v54 = vmul.f32 %v1386_v15, %v1318_v13  ;;  %1813 = vmatprep.mubr.bf16.mxu1 %v1478_v44  ;;  %v1447_v23 = vmul.f32 %v1391_v48, %v1319_v16  ;;  %v1445_v17 = vmul.f32 %v1386_v15, %v1317_v52  ;;  %v1524_v13 = vld [vmem:[%s2743_s23 + $0x58] sm:$0xff] }
 0x2c5   : > { %1774 = vmatmul.mubr.bf16.gmra.mrb[8].mxu0 %v1469_v46  ;;  %1814 = vmatmul.mubr.bf16.gmra.mrb[8].mxu1 %v1477_v14  ;;  %v1549_v22 = vunpack.c.l.bf16 %v1523_v6  ;;  %v1534_v48 = vunpack.c.h.bf16 %v1515_v49  ;;  %v1535_v52 = vunpack.c.l.bf16 %v1516_v12 }
 0x2c6   : > { %v1472_v0 = vpack.c.bf16 %v1448_v50, %v1446_v54  ;;  %v1471_v35 = vpack.c.bf16 %v1447_v23, %v1445_v17  ;;  %v1550_v50 = vunpack.c.h.bf16 %v1523_v6 }
 0x2c7   : > { %v1431_v18 = vpop.permute.xlu1 %1430  ;;  %v1426_v19 = vpop.permute.xlu0 %1425 }
 0x2c8   : > { %v1463_v20 = vmul.f32 %v1431_v18, %v1335_v56  ;;  %v1464_v21 = vmul.f32 %v1431_v18, %v1336_v58  ;;  %v1461_v24 = vmul.f32 %v1426_v19, %v1333_v60  ;;  %v1462_v25 = vmul.f32 %v1426_v19, %v1334_v62  ;;  %1783 = vmatprep.mubr.bf16.mxu0 %v1472_v0  ;;  %v1517_v62 = vld [vmem:[%s2743_s23 + $0x20] sm:$0xff] }
 0x2c9   : > { %v1551_v58 = vunpack.c.l.bf16 %v1524_v13  ;;  %v1536_v60 = vunpack.c.h.bf16 %v1516_v12  ;;  %v1552_v19 = vunpack.c.h.bf16 %v1524_v13 }
 0x2ca   : > { %v1479_v26 = vpack.c.bf16 %v1463_v20, %v1461_v24  ;;  %v1480_v33 = vpack.c.bf16 %v1464_v21, %v1462_v25 }
 0x2cc   : > { %1823 = vmatprep.mubr.bf16.mxu1 %v1480_v33 }
 0x2cd   : > { %1784 = vmatmul.mubr.bf16.gmra.mrb[12].mxu0 %v1471_v35  ;;  %1824 = vmatmul.mubr.bf16.gmra.mrb[12].mxu1 %v1479_v26  ;;  %v1525_v26 = vld [vmem:[%s2743_s23 + $0x60] sm:$0xff] }
 0x2ce   : > { %v1554_v6 = vunpack.c.h.bf16 %v1525_v26 }
 0x388   : > { %v1755_v32 = vpop.f32.mrb[0].mxu0  ;;  %v1795_v2 = vpop.f32.mrb[0].mxu1 }
 0x389   : > { %v1756_v1 = vadd.f32 %v1755_v32, %v1529_v29  ;;  %v1757_v3 = vpop.f32.mrb[1].mxu0  ;;  %v1796_v53 = vadd.f32 %v1795_v2, %v1545_v41  ;;  %v1797_v4 = vpop.f32.mrb[1].mxu1  ;;  %v1537_v29 = vunpack.c.l.bf16 %v1517_v62  ;;  %v1518_v32 = vld [vmem:[%s2743_s23 + $0x28] sm:$0xff] }
 0x38a   : > { %v1758_v55 = vadd.f32 %v1757_v3, %v1530_v43  ;;  %v1759_v5 = vpop.f32.mrb[2].mxu0  ;;  %v1798_v59 = vadd.f32 %v1797_v4, %v1546_v30  ;;  %v1799_v7 = vpop.f32.mrb[2].mxu1  ;;  %v1526_v2 = vld [vmem:[%s2743_s23 + $0x68] sm:$0xff] }
 0x38b   : > { %v1834_v57 = vmax.f32 %v1756_v1, 0.0  ;;  %v1760_v61 = vadd.f32 %v1759_v5, %v1531_v31  ;;  %v1761_v8 = vpop.f32.mrb[3].mxu0  ;;  %v1850_v34 = vmax.f32 %v1796_v53, 0.0  ;;  %v1800_v63 = vadd.f32 %v1799_v7, %v1547_v45  ;;  %v1801_v11 = vpop.f32.mrb[3].mxu1 }
 0x38c   : > { %v1835_v36 = vmax.f32 %v1758_v55, 0.0  ;;  %v1762_v10 = vadd.f32 %v1761_v8, %v1532_v47  ;;  %v1851_v38 = vmax.f32 %v1798_v59, 0.0  ;;  %v1802_v42 = vadd.f32 %v1801_v11, %v1548_v51 }
 0x38d   : > { %v1836_v40 = vmax.f32 %v1760_v61, 0.0  ;;  %v1852_v44 = vmax.f32 %v1800_v63, 0.0  ;;  %v1553_v1 = vunpack.c.l.bf16 %v1525_v26  ;;  %v1538_v55 = vunpack.c.h.bf16 %v1517_v62 }
 0x38e   : > { %v2265_v14 = vpack.c.bf16 %v1835_v36, %v1834_v57  ;;  %v1837_v46 = vmax.f32 %v1762_v10, 0.0  ;;  %v2273_v15 = vpack.c.bf16 %v1851_v38, %v1850_v34  ;;  %v1853_v16 = vmax.f32 %v1802_v42, 0.0 }
 0x38f   : > { %v1539_v57 = vunpack.c.l.bf16 %v1518_v32  ;;  %v1555_v7 = vunpack.c.l.bf16 %v1526_v2  ;;  %v1540_v8 = vunpack.c.h.bf16 %v1518_v32  ;;  %v1556_v11 = vunpack.c.h.bf16 %v1526_v2 }
 0x390   : > { %1962 = vst [vmem:[%s2743_s23] sm:$0xff] %v2265_v14  ;;  %v2266_v54 = vpack.c.bf16 %v1837_v46, %v1836_v40  ;;  %v1765_v56 = vpop.f32.mrb[4].mxu0  ;;  %1970 = vst [vmem:[%s2743_s23 + $0x40] sm:$0xff] %v2273_v15  ;;  %v2274_v0 = vpack.c.bf16 %v1853_v16, %v1852_v44  ;;  %v1805_v17 = vpop.f32.mrb[4].mxu1 }
 0x391   : > { %v1766_v23 = vadd.f32 %v1765_v56, %v1533_v9  ;;  %v1767_v18 = vpop.f32.mrb[5].mxu0  ;;  %v1806_v20 = vadd.f32 %v1805_v17, %v1549_v22  ;;  %v1807_v24 = vpop.f32.mrb[5].mxu1  ;;  %v1519_v9 = vld [vmem:[%s2743_s23 + $0x30] sm:$0xff]  ;;  %v1528_v17 = vld [vmem:[%s2743_s23 + $0x78] sm:$0xff] }
 0x392   : > { %1963 = vst [vmem:[%s2743_s23 + $0x8] sm:$0xff] %v2266_v54  ;;  %v1768_v21 = vadd.f32 %v1767_v18, %v1534_v48  ;;  %v1769_v25 = vpop.f32.mrb[6].mxu0  ;;  %1971 = vst [vmem:[%s2743_s23 + $0x48] sm:$0xff] %v2274_v0  ;;  %v1808_v35 = vadd.f32 %v1807_v24, %v1550_v50  ;;  %v1809_v27 = vpop.f32.mrb[6].mxu1  ;;  %v1527_v22 = vld [vmem:[%s2743_s23 + $0x70] sm:$0xff]  ;;  %v1541_v15 = vunpack.c.l.bf16 %v1519_v9 }
 0x393   : > { %v1838_v33 = vmax.f32 %v1766_v23, 0.0  ;;  %v1770_v37 = vadd.f32 %v1769_v25, %v1535_v52  ;;  %v1771_v28 = vpop.f32.mrb[7].mxu0  ;;  %v1854_v39 = vmax.f32 %v1806_v20, 0.0  ;;  %v1810_v43 = vadd.f32 %v1809_v27, %v1551_v58  ;;  %v1811_v31 = vpop.f32.mrb[7].mxu1  ;;  %v1520_v58 = vld [vmem:[%s2743_s23 + $0x38] sm:$0xff] }
 0x394   : > { %v1839_v41 = vmax.f32 %v1768_v21, 0.0  ;;  %v1772_v30 = vadd.f32 %v1771_v28, %v1536_v60  ;;  %v1855_v45 = vmax.f32 %v1808_v35, 0.0  ;;  %v1812_v49 = vadd.f32 %v1811_v31, %v1552_v19 }
 0x395   : > { %v1840_v47 = vmax.f32 %v1770_v37, 0.0  ;;  %v1856_v51 = vmax.f32 %v1810_v43, 0.0  ;;  %v1557_v23 = vunpack.c.l.bf16 %v1527_v22  ;;  %v1542_v21 = vunpack.c.h.bf16 %v1519_v9 }
 0x396   : > { %v2267_v3 = vpack.c.bf16 %v1839_v41, %v1838_v33  ;;  %v1841_v53 = vmax.f32 %v1772_v30, 0.0  ;;  %v2275_v4 = vpack.c.bf16 %v1855_v45, %v1854_v39  ;;  %v1857_v5 = vmax.f32 %v1812_v49, 0.0 }
 0x397   : > { %v1558_v26 = vunpack.c.h.bf16 %v1527_v22  ;;  %v1543_v33 = vunpack.c.l.bf16 %v1520_v58  ;;  %v1559_v27 = vunpack.c.l.bf16 %v1528_v17  ;;  %v1544_v28 = vunpack.c.h.bf16 %v1520_v58 }
 0x398   : > { %1964 = vst [vmem:[%s2743_s23 + $0x10] sm:$0xff] %v2267_v3  ;;  %v2268_v59 = vpack.c.bf16 %v1841_v53, %v1840_v47  ;;  %v1775_v61 = vpop.f32.mrb[8].mxu0  ;;  %1972 = vst [vmem:[%s2743_s23 + $0x50] sm:$0xff] %v2275_v4  ;;  %v2276_v34 = vpack.c.bf16 %v1857_v5, %v1856_v51  ;;  %v1815_v63 = vpop.f32.mrb[8].mxu1  ;;  %v1560_v30 = vunpack.c.h.bf16 %v1528_v17 }
 0x399   : > { %v1776_v36 = vadd.f32 %v1775_v61, %v1537_v29  ;;  %v1777_v10 = vpop.f32.mrb[9].mxu0  ;;  %v1816_v12 = vadd.f32 %v1815_v63, %v1553_v1  ;;  %v1817_v40 = vpop.f32.mrb[9].mxu1 }
 0x39a   : > { %1965 = vst [vmem:[%s2743_s23 + $0x18] sm:$0xff] %v2268_v59  ;;  %v1778_v38 = vadd.f32 %v1777_v10, %v1538_v55  ;;  %v1779_v42 = vpop.f32.mrb[10].mxu0  ;;  %1973 = vst [vmem:[%s2743_s23 + $0x58] sm:$0xff] %v2276_v34  ;;  %v1818_v14 = vadd.f32 %v1817_v40, %v1554_v6  ;;  %v1819_v46 = vpop.f32.mrb[10].mxu1 }
 0x39b   : > { %v1842_v13 = vmax.f32 %v1776_v36, 0.0  ;;  %v1780_v44 = vadd.f32 %v1779_v42, %v1539_v57  ;;  %v1781_v48 = vpop.f32.mrb[11].mxu0  ;;  %v1858_v16 = vmax.f32 %v1816_v12, 0.0  ;;  %v1820_v52 = vadd.f32 %v1819_v46, %v1555_v7  ;;  %v1821_v56 = vpop.f32.mrb[11].mxu1 }
 0x39c   : > { %v1843_v50 = vmax.f32 %v1778_v38, 0.0  ;;  %v1782_v54 = vadd.f32 %v1781_v48, %v1540_v8  ;;  %v1859_v60 = vmax.f32 %v1818_v14, 0.0  ;;  %v1822_v0 = vadd.f32 %v1821_v56, %v1556_v11 }
 0x39d   : > { %v1844_v62 = vmax.f32 %v1780_v44, 0.0  ;;  %v1860_v19 = vmax.f32 %v1820_v52, 0.0 }
 0x39e   : > { %v2269_v18 = vpack.c.bf16 %v1843_v50, %v1842_v13  ;;  %v1845_v20 = vmax.f32 %v1782_v54, 0.0  ;;  %v2277_v24 = vpack.c.bf16 %v1859_v60, %v1858_v16  ;;  %v1861_v25 = vmax.f32 %v1822_v0, 0.0 }
 0x3a0   : > { %1966 = vst [vmem:[%s2743_s23 + $0x20] sm:$0xff] %v2269_v18  ;;  %v2270_v35 = vpack.c.bf16 %v1845_v20, %v1844_v62  ;;  %v1785_v37 = vpop.f32.mrb[12].mxu0  ;;  %1974 = vst [vmem:[%s2743_s23 + $0x60] sm:$0xff] %v2277_v24  ;;  %v2278_v29 = vpack.c.bf16 %v1861_v25, %v1860_v19  ;;  %v1825_v41 = vpop.f32.mrb[12].mxu1 }
 0x3a1   : > { %v1786_v39 = vadd.f32 %v1785_v37, %v1541_v15  ;;  %v1787_v43 = vpop.f32.mrb[13].mxu0  ;;  %v1826_v31 = vadd.f32 %v1825_v41, %v1557_v23  ;;  %v1827_v45 = vpop.f32.mrb[13].mxu1 }
 0x3a2   : > { %1967 = vst [vmem:[%s2743_s23 + $0x28] sm:$0xff] %v2270_v35  ;;  %v1788_v32 = vadd.f32 %v1787_v43, %v1542_v21  ;;  %v1789_v47 = vpop.f32.mrb[14].mxu0  ;;  %1975 = vst [vmem:[%s2743_s23 + $0x68] sm:$0xff] %v2278_v29  ;;  %v1828_v1 = vadd.f32 %v1827_v45, %v1558_v26  ;;  %v1829_v3 = vpop.f32.mrb[14].mxu1 }
 0x3a3   : > { %v1846_v49 = vmax.f32 %v1786_v39, 0.0  ;;  %v1790_v2 = vadd.f32 %v1789_v47, %v1543_v33  ;;  %v1791_v51 = vpop.f32.mrb[15].mxu0  ;;  %v1862_v53 = vmax.f32 %v1826_v31, 0.0  ;;  %v1830_v4 = vadd.f32 %v1829_v3, %v1559_v27  ;;  %v1831_v6 = vpop.f32.mrb[15].mxu1 }
 0x3a4   : > { %v1847_v55 = vmax.f32 %v1788_v32, 0.0  ;;  %v1792_v5 = vadd.f32 %v1791_v51, %v1544_v28  ;;  %v1863_v57 = vmax.f32 %v1828_v1, 0.0  ;;  %v1832_v61 = vadd.f32 %v1831_v6, %v1560_v30 }
 0x3a5   : > { %v1848_v59 = vmax.f32 %v1790_v2, 0.0  ;;  %v1864_v8 = vmax.f32 %v1830_v4, 0.0 }
 0x3a6   : > { %v2271_v7 = vpack.c.bf16 %v1847_v55, %v1846_v49  ;;  %v1849_v9 = vmax.f32 %v1792_v5, 0.0  ;;  %v2279_v34 = vpack.c.bf16 %v1863_v57, %v1862_v53  ;;  %v1865_v36 = vmax.f32 %v1832_v61, 0.0 }
 0x3a8   : > { %1968 = vst [vmem:[%s2743_s23 + $0x30] sm:$0xff] %v2271_v7  ;;  %v2272_v63 = vpack.c.bf16 %v1849_v9, %v1848_v59  ;;  %1976 = vst [vmem:[%s2743_s23 + $0x70] sm:$0xff] %v2279_v34  ;;  %v2280_v10 = vpack.c.bf16 %v1865_v36, %v1864_v8 }
 0x3aa   : > { %1969 = vst [vmem:[%s2743_s23 + $0x38] sm:$0xff] %v2272_v63  ;;  %1977 = vst [vmem:[%s2743_s23 + $0x78] sm:$0xff] %v2280_v10 }
 0x3ab PF: > { %s17_s30 = sadd.s32 1, %s2620_s30   ;;  %s3244_s24 = smov %s2600_s25 }
 0x3ac   : > { %p14_p2 = scmp.ge.s32.totalorder %s17_s30, 8   ;;  %s3245_s25 = smov %s2715_s14 }
 0x3ad   : > { %s3246_s26 = smov %s2612_s28  ;;  %s3247_s27 = smov %s2616_s29 }
 0x3ae   : > { %s3248_s28 = smov %s3251_s8  ;;  %s3249_s29 = smov %s3255_s9 }
 0x3af   :  { %16 = sbr.rel (!%p14_p2) target bundleno = 4 (0x4), region = 142 }

// kernel: run.6
= control target key start
LH: loop header
LB: loop body
LE: loop exit
PB: predicated region body
PF: predicated region fallthrough
CT: control target
= control target key end

     0   :  { %s883_s9 = smov 0   ;;  %s980_s0 = inlined_call_operand.vmem [shape: bf16[256,256], index: 0, kind: input, shape index: {}]   ;;  %s981_s1 = inlined_call_operand.vmem [shape: bf16[256,128], index: 1, kind: input, shape index: {}]   ;;  %s982_s2 = inlined_call_operand.vmem [shape: bf16[256,128], index: 2, kind: output, shape index: {}]  }
   0x1 LB: > { %s608_s10 = sadd.s32 4294967295, %s866_s9   ;;  %p612_p0 = scmp.ge.s32.totalorder %s866_s9, 1  ;;  %s866_s9 = sphi %s883_s9, %s12_s9  }
   0x2   : > { %p114_p1 = scmp.lt.s32.totalorder %s866_s9, 3 }
   0x4   : > { %p115_p2 = pnand %p612_p0, %p114_p1 }
   0x5   : > { %v820_v0 = vld [vmem:[%s981_s1 + $0x40] sm:$0xff] (!%p115_p2)   ;;  %s613_s13 = sshll.u32 (!%p115_p2), %s608_s10, 4  ;;  %v822_v2 = vld [vmem:[%s981_s1 + $0x48] sm:$0xff] (!%p115_p2)   ;;  %v824_v4 = vld [vmem:[%s981_s1 + $0x50] sm:$0xff] (!%p115_p2)  }
   0x6   : > { %118 = sbr.rel (%p115_p2) target bundleno = 282 (0x11a), region = 28  ;;  %v821_v1 = vld [vmem:[%s981_s1] sm:$0xff] (!%p115_p2)   ;;  %732 = vmatprep.subr.bf16.mxu0 (!%p115_p2), %v820_v0  ;;  %796 = vmatprep.subr.bf16.mxu1 (!%p115_p2), %v820_v0  ;;  %v823_v3 = vld [vmem:[%s981_s1 + $0x8] sm:$0xff] (!%p115_p2)   ;;  %p138_p3 = scmp.lt.s32.totalorder (!%p115_p2), %s613_s13, 31  ;;  %v825_v5 = vld [vmem:[%s981_s1 + $0x10] sm:$0xff] (!%p115_p2)  }
   0x7   : > { %733 = vmatpush3.bf16.msra.mxu0 (!%p115_p2), %v821_v1  ;;  %804 = vmatpush3.bf16.msra.mxu1 (!%p115_p2), %v821_v1  ;;  %v826_v6 = vld [vmem:[%s981_s1 + $0x58] sm:$0xff] (!%p115_p2)   ;;  %v828_v8 = vld [vmem:[%s981_s1 + $0x60] sm:$0xff] (!%p115_p2)   ;;  %v830_v10 = vld [vmem:[%s981_s1 + $0x68] sm:$0xff] (!%p115_p2)  }
   0x8   : > { %734 = vmatprep.subr.bf16.mxu0 (!%p115_p2), %v822_v2  ;;  %797 = vmatprep.subr.bf16.mxu1 (!%p115_p2), %v822_v2  ;;  %v827_v7 = vld [vmem:[%s981_s1 + $0x18] sm:$0xff] (!%p115_p2)   ;;  %v829_v9 = vld [vmem:[%s981_s1 + $0x20] sm:$0xff] (!%p115_p2)   ;;  %v831_v13 = vld [vmem:[%s981_s1 + $0x28] sm:$0xff] (!%p115_p2)  }
   0x9   : > { %v832_v14 = vld [vmem:[%s981_s1 + $0x70] sm:$0xff] (!%p115_p2)   ;;  %v834_v16 = vld [vmem:[%s981_s1 + $0x78] sm:$0xff] (!%p115_p2)  }
   0xa   : > { %v833_v15 = vld [vmem:[%s981_s1 + $0x30] sm:$0xff] (!%p115_p2)   ;;  %v835_v17 = vld [vmem:[%s981_s1 + $0x38] sm:$0xff] (!%p115_p2)  }
   0xb   : > { %735 = vmatpush3.bf16.msra.mxu0 (!%p115_p2), %v823_v3  ;;  %805 = vmatpush3.bf16.msra.mxu1 (!%p115_p2), %v823_v3 }
   0xc   : > { %736 = vmatprep.subr.bf16.mxu0 (!%p115_p2), %v824_v4  ;;  %798 = vmatprep.subr.bf16.mxu1 (!%p115_p2), %v824_v4 }
   0xd   : > { %s984_s13 = smov (!%p138_p3, %s613_s13), 31 }
   0xe   : > { %s668_s28 = sshll.u32 %s984_s13, 3  ;;  %s617_s22 = sshll.u32 %s984_s13, 2 }
   0xf   : > { %737 = vmatpush3.bf16.msra.mxu0 %v825_v5  ;;  %806 = vmatpush3.bf16.msra.mxu1 %v825_v5  ;;  %s924_s5 = scalar_lea.vmem %s980_s0, %s668_s28  ;;  %s967_s25 = scalar_lea.vmem %s982_s2, %s617_s22 }
  0x10   : > { %738 = vmatprep.subr.bf16.mxu0 %v826_v6  ;;  %799 = vmatprep.subr.bf16.mxu1 %v826_v6  ;;  %v838_v11 = vld [vmem:[%s924_s5 + $0x4] ss:$8 sps:$4 sm:$0xff]   ;;  %v836_v18 = vld [vmem:[%s924_s5] ss:$8 sps:$4 sm:$0xff]   ;;  %v842_v20 = vld [vmem:[%s924_s5 + $0x14] ss:$8 sps:$4 sm:$0xff]  }
  0x11   : > { %v841_v12 = vld [vmem:[%s924_s5 + $0x44] ss:$8 sps:$4 sm:$0xff]   ;;  %407 = vmatprep.mubr.bf16.mxu0 %v838_v11  ;;  %v839_v19 = vld [vmem:[%s924_s5 + $0x40] ss:$8 sps:$4 sm:$0xff]   ;;  %v844_v21 = vld [vmem:[%s924_s5 + $0x54] ss:$8 sps:$4 sm:$0xff]  }
  0x12   : > { %439 = vmatprep.mubr.bf16.mxu1 %v841_v12  ;;  %v846_v22 = vld [vmem:[%s924_s5 + $0x10] ss:$8 sps:$4 sm:$0xff]   ;;  %v848_v24 = vld [vmem:[%s924_s5 + $0x24] ss:$8 sps:$4 sm:$0xff]   ;;  %v852_v26 = vld [vmem:[%s924_s5 + $0x20] ss:$8 sps:$4 sm:$0xff]  }
  0x13   : > { %739 = vmatpush3.bf16.msra.mxu0 %v827_v7  ;;  %807 = vmatpush3.bf16.msra.mxu1 %v827_v7  ;;  %v847_v23 = vld [vmem:[%s924_s5 + $0x50] ss:$8 sps:$4 sm:$0xff]   ;;  %v850_v25 = vld [vmem:[%s924_s5 + $0x64] ss:$8 sps:$4 sm:$0xff]   ;;  %v853_v27 = vld [vmem:[%s924_s5 + $0x60] ss:$8 sps:$4 sm:$0xff]  }
  0x14   : > { %740 = vmatprep.subr.bf16.mxu0 %v828_v8  ;;  %800 = vmatprep.subr.bf16.mxu1 %v828_v8  ;;  %v854_v28 = vld [vmem:[%s924_s5 + $0x34] ss:$8 sps:$4 sm:$0xff]   ;;  %v858_v30 = vld [vmem:[%s924_s5 + $0x30] ss:$8 sps:$4 sm:$0xff]  }
  0x15   : > { %v856_v29 = vld [vmem:[%s924_s5 + $0x74] ss:$8 sps:$4 sm:$0xff]   ;;  %v859_v31 = vld [vmem:[%s924_s5 + $0x70] ss:$8 sps:$4 sm:$0xff]  }
  0x17   : > { %741 = vmatpush3.bf16.msra.mxu0 %v829_v9  ;;  %808 = vmatpush3.bf16.msra.mxu1 %v829_v9 }
  0x18   : > { %742 = vmatprep.subr.bf16.mxu0 %v830_v10  ;;  %801 = vmatprep.subr.bf16.mxu1 %v830_v10 }
  0x1b   : > { %743 = vmatpush3.bf16.msra.mxu0 %v831_v13  ;;  %809 = vmatpush3.bf16.msra.mxu1 %v831_v13 }
  0x1c   : > { %744 = vmatprep.subr.bf16.mxu0 %v832_v14  ;;  %802 = vmatprep.subr.bf16.mxu1 %v832_v14 }
  0x1f   : > { %745 = vmatpush3.bf16.msra.mxu0 %v833_v15  ;;  %810 = vmatpush3.bf16.msra.mxu1 %v833_v15 }
  0x20   : > { %746 = vmatprep.subr.bf16.mxu0 %v834_v16  ;;  %803 = vmatprep.subr.bf16.mxu1 %v834_v16 }
  0x23   : > { %747 = vmatpush3.bf16.msra.mxu0 %v835_v17  ;;  %811 = vmatpush3.bf16.msra.mxu1 %v835_v17 }
  0x26   : > { %408 = vmatmul.mubr.bf16.vlgmr.msra.gmra.mrb[0].mxu0 %v836_v18  ;;  %440 = vmatmul.mubr.bf16.vlgmr.msra.gmra.mrb[0].mxu1 %v839_v19 }
  0x27   : > { %415 = vmatprep.mubr.bf16.mxu0 %v842_v20  ;;  %447 = vmatprep.mubr.bf16.mxu1 %v844_v21 }
  0x2e   : > { %416 = vmatmul.mubr.bf16.gmra.mrb[4].mxu0 %v846_v22  ;;  %448 = vmatmul.mubr.bf16.gmra.mrb[4].mxu1 %v847_v23 }
  0x2f   : > { %423 = vmatprep.mubr.bf16.mxu0 %v848_v24  ;;  %455 = vmatprep.mubr.bf16.mxu1 %v850_v25 }
  0x36   : > { %424 = vmatmul.mubr.bf16.gmra.mrb[8].mxu0 %v852_v26  ;;  %456 = vmatmul.mubr.bf16.gmra.mrb[8].mxu1 %v853_v27 }
  0x37   : > { %431 = vmatprep.mubr.bf16.mxu0 %v854_v28  ;;  %463 = vmatprep.mubr.bf16.mxu1 %v856_v29 }
  0x3e   : > { %432 = vmatmul.mubr.bf16.gmra.mrb[12].mxu0 %v858_v30  ;;  %464 = vmatmul.mubr.bf16.gmra.mrb[12].mxu1 %v859_v31 }
  0xf9   : > { %v748_v32 = vpop.f32.mrb[0].mxu0  ;;  %v772_v33 = vpop.f32.mrb[0].mxu1 }
  0xfa   : > { %v749_v34 = vpop.f32.mrb[1].mxu0  ;;  %v773_v35 = vpop.f32.mrb[1].mxu1 }
  0xfb   : > { %v750_v36 = vadd.f32 %v749_v34, %v748_v32  ;;  %v774_v37 = vadd.f32 %v773_v35, %v772_v33  ;;  %v751_v38 = vpop.f32.mrb[2].mxu0  ;;  %v775_v39 = vpop.f32.mrb[2].mxu1 }
  0xfc   : > { %v752_v40 = vpop.f32.mrb[3].mxu0  ;;  %v776_v41 = vpop.f32.mrb[3].mxu1 }
  0xfd   : > { %v753_v42 = vadd.f32 %v752_v40, %v751_v38  ;;  %v777_v43 = vadd.f32 %v776_v41, %v775_v39 }
  0xff   : > { %v688_v44 = vpack.c.bf16 %v753_v42, %v750_v36  ;;  %v708_v45 = vpack.c.bf16 %v777_v43, %v774_v37 }
 0x101   : > { %689 = vst [vmem:[%s967_s25] sm:$0xff] %v688_v44   ;;  %728 = vst [vmem:[%s967_s25 + $0x20] sm:$0xff] %v708_v45   ;;  %v754_v46 = vpop.f32.mrb[4].mxu0  ;;  %v778_v47 = vpop.f32.mrb[4].mxu1 }
 0x102   : > { %v755_v48 = vpop.f32.mrb[5].mxu0  ;;  %v779_v49 = vpop.f32.mrb[5].mxu1 }
 0x103   : > { %v756_v50 = vadd.f32 %v755_v48, %v754_v46  ;;  %v780_v51 = vadd.f32 %v779_v49, %v778_v47  ;;  %v757_v52 = vpop.f32.mrb[6].mxu0  ;;  %v781_v53 = vpop.f32.mrb[6].mxu1 }
 0x104   : > { %v758_v54 = vpop.f32.mrb[7].mxu0  ;;  %v782_v55 = vpop.f32.mrb[7].mxu1 }
 0x105   : > { %v759_v56 = vadd.f32 %v758_v54, %v757_v52  ;;  %v783_v57 = vadd.f32 %v782_v55, %v781_v53 }
 0x107   : > { %v693_v58 = vpack.c.bf16 %v759_v56, %v756_v50  ;;  %v713_v59 = vpack.c.bf16 %v783_v57, %v780_v51 }
 0x109   : > { %725 = vst [vmem:[%s967_s25 + $0x8] sm:$0xff] %v693_v58   ;;  %729 = vst [vmem:[%s967_s25 + $0x28] sm:$0xff] %v713_v59   ;;  %v760_v60 = vpop.f32.mrb[8].mxu0  ;;  %v784_v61 = vpop.f32.mrb[8].mxu1 }
 0x10a   : > { %v761_v62 = vpop.f32.mrb[9].mxu0  ;;  %v785_v63 = vpop.f32.mrb[9].mxu1 }
 0x10b   : > { %v762_v0 = vadd.f32 %v761_v62, %v760_v60  ;;  %v786_v1 = vadd.f32 %v785_v63, %v784_v61  ;;  %v763_v2 = vpop.f32.mrb[10].mxu0  ;;  %v787_v3 = vpop.f32.mrb[10].mxu1 }
 0x10c   : > { %v764_v4 = vpop.f32.mrb[11].mxu0  ;;  %v788_v5 = vpop.f32.mrb[11].mxu1 }
 0x10d   : > { %v765_v6 = vadd.f32 %v764_v4, %v763_v2  ;;  %v789_v7 = vadd.f32 %v788_v5, %v787_v3 }
 0x10f   : > { %v698_v8 = vpack.c.bf16 %v765_v6, %v762_v0  ;;  %v718_v9 = vpack.c.bf16 %v789_v7, %v786_v1 }
 0x111   : > { %726 = vst [vmem:[%s967_s25 + $0x10] sm:$0xff] %v698_v8   ;;  %730 = vst [vmem:[%s967_s25 + $0x30] sm:$0xff] %v718_v9   ;;  %v766_v10 = vpop.f32.mrb[12].mxu0  ;;  %v790_v11 = vpop.f32.mrb[12].mxu1 }
 0x112   : > { %v767_v12 = vpop.f32.mrb[13].mxu0  ;;  %v791_v13 = vpop.f32.mrb[13].mxu1 }
 0x113   : > { %v768_v14 = vadd.f32 %v767_v12, %v766_v10  ;;  %v792_v15 = vadd.f32 %v791_v13, %v790_v11  ;;  %v769_v16 = vpop.f32.mrb[14].mxu0  ;;  %v793_v17 = vpop.f32.mrb[14].mxu1 }
 0x114   : > { %v770_v18 = vpop.f32.mrb[15].mxu0  ;;  %v794_v19 = vpop.f32.mrb[15].mxu1 }
 0x115   : > { %v771_v20 = vadd.f32 %v770_v18, %v769_v16  ;;  %v795_v21 = vadd.f32 %v794_v19, %v793_v17 }
 0x117   : > { %v703_v22 = vpack.c.bf16 %v771_v20, %v768_v14  ;;  %v723_v23 = vpack.c.bf16 %v795_v21, %v792_v15 }
 0x119   : > { %727 = vst [vmem:[%s967_s25 + $0x18] sm:$0xff] %v703_v22   ;;  %731 = vst [vmem:[%s967_s25 + $0x38] sm:$0xff] %v723_v23  }
 0x11a PF: > { %s12_s9 = sadd.s32 1, %s866_s9  }
 0x11b   : > { %p9_p4 = scmp.ge.s32.totalorder %s12_s9, 4  }
 0x11d   :  { %11 = sbr.rel (!%p9_p4) target bundleno = 1 (0x1), region = 58 }

// kernel: run.7
= control target key start
LH: loop header
LB: loop body
LE: loop exit
PB: predicated region body
PF: predicated region fallthrough
CT: control target
= control target key end

     0   :  { %s1881_s21 = smov 0   ;;  %s1883_s22 = smov 0   ;;  %s2501_s0 = inlined_call_operand.vmem [shape: s8[128,256], index: 0, kind: input, shape index: {}]   ;;  %s2502_s1 = inlined_call_operand.vmem [shape: bf16[256,128], index: 1, kind: input, shape index: {}]   ;;  %s2503_s2 = inlined_call_operand.vmem [shape: f32[128,1], index: 2, kind: input, shape index: {}]   ;;  %s2504_s3 = inlined_call_operand.vmem [shape: bf16[256,256], index: 3, kind: input, shape index: {}]   ;;  %s2505_s4 = inlined_call_operand.vmem [shape: bf16[256,128], index: 4, kind: input, shape index: {}]   ;;  %s2506_s5 = inlined_call_operand.vmem [shape: f32[1,128], index: 5, kind: input, shape index: {}]   ;;  %s2507_s6 = inlined_call_operand.vmem [shape: f32[128,128], index: 6, kind: output, shape index: {}]  }
   0x1   :  { %s1885_s23 = smov 0   ;;  %s1887_s24 = smov 0  }
   0x2   :  { %s1889_s25 = smov 0  }
   0x3 LB: > { %s25_s26 = sadd.s32 1, %s1839_s24  ;;  %p44_p1 = scmp.ne.s32.totalorder %s1831_s22, %s1827_s21  ;;  %s1843_s25 = sphi %s1889_s25, %s16_s25   ;;  %s1839_s24 = sphi %s1887_s24, %s2511_s24   ;;  %s1835_s23 = sphi %s1885_s23, %s2510_s23   ;;  %s1831_s22 = sphi %s1883_s22, %s2509_s22   ;;  %s1827_s21 = sphi %s1881_s21, %s2508_s21  }
   0x4   : > { %p26_p0 = scmp.ge.s32.totalorder %s25_s26, 2  ;;  %p45_p2 = scmp.eq.s32.totalorder %s1843_s25, 0 }
   0x5   : > { %s37_s28 = sadd.s32 1, %s1831_s22  ;;  %p1451_p5 = scmp.ge.s32.totalorder %s1843_s25, 2 }
   0x6   : > { %s2513_s26 = smov (%p26_p0, %s25_s26), 0  ;;  %p46_p3 = por %p45_p2, %p44_p1 }
   0x7   : > { %s33_s27 = ssub.s32 %s1839_s24, %s2513_s26  ;;  %241 = sbr.rel (%p1451_p5) target bundleno = 21 (0x15), region = 32 }
   0x8   : > { %p35_p4 = scmp.eq.s32.totalorder %s33_s27, 0 }
   0xa   : > { %s1916_s29 = scalar_select %p35_p4, %s1831_s22, %s37_s28  }
   0xe   : > { %244 = sbr.rel (!%p46_p3) target bundleno = 21 (0x15), region = 36  ;;  %s246_s30 = sand.u32 (%p46_p3), 1, %s1831_s22  }
   0xf   : > { %s1453_s7 = sshll.u32 (%p46_p3), %s1839_s24, 3  ;;  %s1452_s8 = sshll.u32 (%p46_p3), %s246_s30, 5 }
  0x10   : > { %s253_s11 = scalar_lea.vmem (%p46_p3), %s2501_s0, %s1453_s7  ;;  %s248_s12 = scalar_lea.vmem (%p46_p3), [#allocation3], %s1452_s8 }
  0x11   : > { %v287_v0 = vld [vmem:[%s253_s11] sm:$0xff] (%p46_p3)  ;;  %v289_v1 = vld [vmem:[%s253_s11 + $0x10] sm:$0xff] (%p46_p3) }
  0x12   : > { %v291_v2 = vld [vmem:[%s253_s11 + $0x20] sm:$0xff] (%p46_p3)  ;;  %288 = vst [vmem:[%s248_s12] sm:$0xff] (%p46_p3), %v287_v0  ;;  %290 = vst [vmem:[%s248_s12 + $0x8] sm:$0xff] (%p46_p3), %v289_v1  ;;  %v293_v3 = vld [vmem:[%s253_s11 + $0x30] sm:$0xff] (%p46_p3) }
  0x13   : > { %292 = vst [vmem:[%s248_s12 + $0x10] sm:$0xff] (%p46_p3), %v291_v2  ;;  %294 = vst [vmem:[%s248_s12 + $0x18] sm:$0xff] (%p46_p3), %v293_v3 }
  0x15 PF: > { %p1454_p6 = scmp.ge.s32.totalorder %s1843_s25, 1  ;;  %p308_p7 = scmp.lt.s32.totalorder %s1843_s25, 3 }
  0x17   : > { %p309_p8 = pnand %p1454_p6, %p308_p7 }
  0x18   : > { %s1456_s13 = sshll.u32 (!%p309_p8), %s1835_s23, 4  ;;  %s315_s14 = sand.u32 (!%p309_p8), 1, %s1827_s21  }
  0x19   : > { %312 = sbr.rel (%p309_p8) target bundleno = 1024 (0x400), region = 78  ;;  %p362_p9 = scmp.lt.s32.totalorder (!%p309_p8), %s1456_s13, 31 }
  0x1a   : > { %s1455_s15 = sshll.u32 (!%p309_p8), %s315_s14, 5  ;;  %p1466_p10 = scmp.ne.s32.totalorder (!%p309_p8), %s1835_s23, 0 }
  0x1b   : > { %s1928_s16 = scalar_lea.vmem (!%p309_p8), [#allocation3], %s1455_s15 }
  0x1c   : > { %v387_v4 = vld [vmem:[%s1928_s16] sm:$0xff] (!%p309_p8)  ;;  %v389_v5 = vld [vmem:[%s1928_s16 + $0x10] sm:$0xff] (!%p309_p8)  ;;  %v388_v16 = vld [vmem:[%s1928_s16 + $0x8] sm:$0xff] (!%p309_p8) }
  0x1d   : > { %v391_v6 = vunpack.c.l.s8.bf16 (!%p309_p8), %v387_v4  ;;  %v395_v7 = vunpack.c.l.s8.bf16 (!%p309_p8), %v389_v5  ;;  %v390_v17 = vld [vmem:[%s1928_s16 + $0x18] sm:$0xff] (!%p309_p8)  ;;  %v392_v18 = vunpack.c.h.s8.bf16 (!%p309_p8), %v387_v4  ;;  %v396_v19 = vunpack.c.h.s8.bf16 (!%p309_p8), %v389_v5 }
  0x1e   : > { %v393_v20 = vunpack.c.l.s8.bf16 (!%p309_p8), %v388_v16  ;;  %v397_v21 = vunpack.c.l.s8.bf16 (!%p309_p8), %v390_v17  ;;  %v394_v22 = vunpack.c.h.s8.bf16 (!%p309_p8), %v388_v16  ;;  %v398_v23 = vunpack.c.h.s8.bf16 (!%p309_p8), %v390_v17 }
  0x1f   : > { %1602 = vmatprep.mubr.bf16.mxu0 (!%p309_p8), %v391_v6  ;;  %1610 = vmatprep.mubr.bf16.mxu1 (!%p309_p8), %v395_v7 }
  0x20   : > { %s2515_s13 = smov (!%p362_p9, %s1456_s13), 31  ;;  %v1699_v40 = vld [vmem:[%s2505_s4 + $0x40] sm:$0xff] (!%p1466_p10)   ;;  %v1701_v42 = vld [vmem:[%s2505_s4 + $0x48] sm:$0xff] (!%p1466_p10)   ;;  %v1703_v44 = vld [vmem:[%s2505_s4 + $0x50] sm:$0xff] (!%p1466_p10)  }
  0x21   : > { %s1457_s17 = sshll.u32 %s2515_s13, 2  ;;  %v1700_v41 = vld [vmem:[%s2505_s4] sm:$0xff] (!%p1466_p10)   ;;  %v1702_v43 = vld [vmem:[%s2505_s4 + $0x8] sm:$0xff] (!%p1466_p10)   ;;  %v1704_v45 = vld [vmem:[%s2505_s4 + $0x10] sm:$0xff] (!%p1466_p10)  }
  0x22   : > { %s1935_s20 = scalar_lea.vmem %s2502_s1, %s1457_s17  ;;  %v1705_v46 = vld [vmem:[%s2505_s4 + $0x58] sm:$0xff] (!%p1466_p10)   ;;  %v1707_v48 = vld [vmem:[%s2505_s4 + $0x60] sm:$0xff] (!%p1466_p10)   ;;  %v1709_v50 = vld [vmem:[%s2505_s4 + $0x68] sm:$0xff] (!%p1466_p10)  }
  0x23   : > { %v1691_v8 = vld [vmem:[%s1935_s20] sm:$0xff]   ;;  %v1692_v9 = vld [vmem:[%s1935_s20 + $0x8] sm:$0xff]   ;;  %v1693_v10 = vld [vmem:[%s1935_s20 + $0x10] sm:$0xff]  }
  0x24   : > { %1586 = vmatprep.subr.bf16.mxu0 %v1691_v8  ;;  %1618 = vmatprep.subr.bf16.mxu1 %v1691_v8  ;;  %v1694_v11 = vld [vmem:[%s1935_s20 + $0x18] sm:$0xff]   ;;  %v1695_v12 = vld [vmem:[%s1935_s20 + $0x20] sm:$0xff]   ;;  %v1696_v13 = vld [vmem:[%s1935_s20 + $0x28] sm:$0xff]  }
  0x25   : > { %1587 = vmatpush3.bf16.msra.mxu0 %v1691_v8  ;;  %1626 = vmatpush3.bf16.msra.mxu1 %v1691_v8  ;;  %v1697_v14 = vld [vmem:[%s1935_s20 + $0x30] sm:$0xff]   ;;  %v1698_v15 = vld [vmem:[%s1935_s20 + $0x38] sm:$0xff]   ;;  %v1708_v49 = vld [vmem:[%s2505_s4 + $0x20] sm:$0xff] (!%p1466_p10)  }
  0x26   : > { %1588 = vmatprep.subr.bf16.mxu0 %v1692_v9  ;;  %1619 = vmatprep.subr.bf16.mxu1 %v1692_v9  ;;  %v1706_v47 = vld [vmem:[%s2505_s4 + $0x18] sm:$0xff] (!%p1466_p10)   ;;  %v1717_v51 = vld [vmem:[%s2504_s3 + $0x4] ss:$8 sps:$4 sm:$0xff] (!%p1466_p10)   ;;  %v1711_v54 = vld [vmem:[%s2505_s4 + $0x70] sm:$0xff] (!%p1466_p10)  }
  0x27   : > { %v1720_v52 = vld [vmem:[%s2504_s3 + $0x44] ss:$8 sps:$4 sm:$0xff] (!%p1466_p10)   ;;  %v1712_v55 = vld [vmem:[%s2505_s4 + $0x30] sm:$0xff] (!%p1466_p10)   ;;  %v1713_v56 = vld [vmem:[%s2505_s4 + $0x78] sm:$0xff] (!%p1466_p10)  }
  0x28   : > { %v1710_v53 = vld [vmem:[%s2505_s4 + $0x28] sm:$0xff] (!%p1466_p10)   ;;  %v1714_v57 = vld [vmem:[%s2505_s4 + $0x38] sm:$0xff] (!%p1466_p10)  }
  0x29   : > { %1589 = vmatpush3.bf16.msra.mxu0 %v1692_v9  ;;  %1627 = vmatpush3.bf16.msra.mxu1 %v1692_v9  ;;  %v1715_v58 = vld [vmem:[%s2504_s3] ss:$8 sps:$4 sm:$0xff] (!%p1466_p10)   ;;  %v1721_v60 = vld [vmem:[%s2504_s3 + $0x14] ss:$8 sps:$4 sm:$0xff] (!%p1466_p10)   ;;  %v1725_v62 = vld [vmem:[%s2504_s3 + $0x10] ss:$8 sps:$4 sm:$0xff] (!%p1466_p10)  }
  0x2a   : > { %1590 = vmatprep.subr.bf16.mxu0 %v1693_v10  ;;  %1620 = vmatprep.subr.bf16.mxu1 %v1693_v10  ;;  %v1718_v59 = vld [vmem:[%s2504_s3 + $0x40] ss:$8 sps:$4 sm:$0xff] (!%p1466_p10)   ;;  %v1723_v61 = vld [vmem:[%s2504_s3 + $0x54] ss:$8 sps:$4 sm:$0xff] (!%p1466_p10)   ;;  %v1726_v63 = vld [vmem:[%s2504_s3 + $0x50] ss:$8 sps:$4 sm:$0xff] (!%p1466_p10)  }
  0x2b   : > { %v1727_v0 = vld [vmem:[%s2504_s3 + $0x24] ss:$8 sps:$4 sm:$0xff] (!%p1466_p10)   ;;  %v1731_v2 = vld [vmem:[%s2504_s3 + $0x20] ss:$8 sps:$4 sm:$0xff] (!%p1466_p10)   ;;  %v1733_v4 = vld [vmem:[%s2504_s3 + $0x34] ss:$8 sps:$4 sm:$0xff] (!%p1466_p10)  }
  0x2c   : > { %v1729_v1 = vld [vmem:[%s2504_s3 + $0x64] ss:$8 sps:$4 sm:$0xff] (!%p1466_p10)   ;;  %v1732_v3 = vld [vmem:[%s2504_s3 + $0x60] ss:$8 sps:$4 sm:$0xff] (!%p1466_p10)   ;;  %v1735_v5 = vld [vmem:[%s2504_s3 + $0x74] ss:$8 sps:$4 sm:$0xff] (!%p1466_p10)  }
  0x2d   : > { %1591 = vmatpush3.bf16.msra.mxu0 %v1693_v10  ;;  %1628 = vmatpush3.bf16.msra.mxu1 %v1693_v10  ;;  %v1737_v6 = vld [vmem:[%s2504_s3 + $0x30] ss:$8 sps:$4 sm:$0xff] (!%p1466_p10)   ;;  %v2095_v10 = vld [vmem:[%s2506_s5] ss:$0 sm:$0xff] (!%p1466_p10) }
  0x2e   : > { %1592 = vmatprep.subr.bf16.mxu0 %v1694_v11  ;;  %1621 = vmatprep.subr.bf16.mxu1 %v1694_v11  ;;  %v1738_v7 = vld [vmem:[%s2504_s3 + $0x70] ss:$8 sps:$4 sm:$0xff] (!%p1466_p10)  }
  0x31   : > { %1593 = vmatpush3.bf16.msra.mxu0 %v1694_v11  ;;  %1629 = vmatpush3.bf16.msra.mxu1 %v1694_v11 }
  0x32   : > { %1594 = vmatprep.subr.bf16.mxu0 %v1695_v12  ;;  %1622 = vmatprep.subr.bf16.mxu1 %v1695_v12 }
  0x35   : > { %1595 = vmatpush3.bf16.msra.mxu0 %v1695_v12  ;;  %1630 = vmatpush3.bf16.msra.mxu1 %v1695_v12 }
  0x36   : > { %1596 = vmatprep.subr.bf16.mxu0 %v1696_v13  ;;  %1623 = vmatprep.subr.bf16.mxu1 %v1696_v13 }
  0x39   : > { %1597 = vmatpush3.bf16.msra.mxu0 %v1696_v13  ;;  %1631 = vmatpush3.bf16.msra.mxu1 %v1696_v13 }
  0x3a   : > { %1598 = vmatprep.subr.bf16.mxu0 %v1697_v14  ;;  %1624 = vmatprep.subr.bf16.mxu1 %v1697_v14 }
  0x3d   : > { %1599 = vmatpush3.bf16.msra.mxu0 %v1697_v14  ;;  %1632 = vmatpush3.bf16.msra.mxu1 %v1697_v14 }
  0x3e   : > { %1600 = vmatprep.subr.bf16.mxu0 %v1698_v15  ;;  %1625 = vmatprep.subr.bf16.mxu1 %v1698_v15 }
  0x41   : > { %1601 = vmatpush3.bf16.msra.mxu0 %v1698_v15  ;;  %1633 = vmatpush3.bf16.msra.mxu1 %v1698_v15 }
  0x42   : > { %1522 = vmatprep.subr.bf16.mxu0 (!%p1466_p10), %v1699_v40  ;;  %1634 = vmatprep.subr.bf16.mxu1 (!%p1466_p10), %v1699_v40 }
  0x44   : > { %1603 = vmatmul.mubr.bf16.vlgmr.msra.gmra.mrb[0].mxu0 %v392_v18  ;;  %1611 = vmatmul.mubr.bf16.vlgmr.msra.gmra.mrb[0].mxu1 %v396_v19 }
  0x45   : > { %1606 = vmatprep.mubr.bf16.mxu0 %v393_v20  ;;  %1614 = vmatprep.mubr.bf16.mxu1 %v397_v21 }
  0x46   : > { %1523 = vmatpush3.bf16.msra.mxu0 (!%p1466_p10), %v1700_v41  ;;  %1642 = vmatpush3.bf16.msra.mxu1 (!%p1466_p10), %v1700_v41 }
  0x47   : > { %1524 = vmatprep.subr.bf16.mxu0 (!%p1466_p10), %v1701_v42  ;;  %1635 = vmatprep.subr.bf16.mxu1 (!%p1466_p10), %v1701_v42 }
  0x4a   : > { %1525 = vmatpush3.bf16.msra.mxu0 (!%p1466_p10), %v1702_v43  ;;  %1643 = vmatpush3.bf16.msra.mxu1 (!%p1466_p10), %v1702_v43 }
  0x4b   : > { %1526 = vmatprep.subr.bf16.mxu0 (!%p1466_p10), %v1703_v44  ;;  %1636 = vmatprep.subr.bf16.mxu1 (!%p1466_p10), %v1703_v44 }
  0x4c   : > { %1607 = vmatmul.mubr.bf16.gmra.mrb[4].mxu0 %v394_v22  ;;  %1615 = vmatmul.mubr.bf16.gmra.mrb[4].mxu1 %v398_v23 }
  0x4d   : > { %843 = vmatprep.mubr.bf16.mxu0 (!%p1466_p10), %v1717_v51  ;;  %875 = vmatprep.mubr.bf16.mxu1 (!%p1466_p10), %v1720_v52 }
  0x4e   : > { %1527 = vmatpush3.bf16.msra.mxu0 (!%p1466_p10), %v1704_v45  ;;  %1644 = vmatpush3.bf16.msra.mxu1 (!%p1466_p10), %v1704_v45 }
  0x4f   : > { %1528 = vmatprep.subr.bf16.mxu0 (!%p1466_p10), %v1705_v46  ;;  %1637 = vmatprep.subr.bf16.mxu1 (!%p1466_p10), %v1705_v46 }
  0x52   : > { %1529 = vmatpush3.bf16.msra.mxu0 (!%p1466_p10), %v1706_v47  ;;  %1645 = vmatpush3.bf16.msra.mxu1 (!%p1466_p10), %v1706_v47 }
  0x53   : > { %1530 = vmatprep.subr.bf16.mxu0 (!%p1466_p10), %v1707_v48  ;;  %1638 = vmatprep.subr.bf16.mxu1 (!%p1466_p10), %v1707_v48 }
  0x56   : > { %1531 = vmatpush3.bf16.msra.mxu0 (!%p1466_p10), %v1708_v49  ;;  %1646 = vmatpush3.bf16.msra.mxu1 (!%p1466_p10), %v1708_v49 }
  0x57   : > { %1532 = vmatprep.subr.bf16.mxu0 (!%p1466_p10), %v1709_v50  ;;  %1639 = vmatprep.subr.bf16.mxu1 (!%p1466_p10), %v1709_v50 }
  0x5a   : > { %1533 = vmatpush3.bf16.msra.mxu0 (!%p1466_p10), %v1710_v53  ;;  %1647 = vmatpush3.bf16.msra.mxu1 (!%p1466_p10), %v1710_v53 }
  0x5b   : > { %1534 = vmatprep.subr.bf16.mxu0 (!%p1466_p10), %v1711_v54  ;;  %1640 = vmatprep.subr.bf16.mxu1 (!%p1466_p10), %v1711_v54 }
  0x5e   : > { %1535 = vmatpush3.bf16.msra.mxu0 (!%p1466_p10), %v1712_v55  ;;  %1648 = vmatpush3.bf16.msra.mxu1 (!%p1466_p10), %v1712_v55 }
  0x5f   : > { %1536 = vmatprep.subr.bf16.mxu0 (!%p1466_p10), %v1713_v56  ;;  %1641 = vmatprep.subr.bf16.mxu1 (!%p1466_p10), %v1713_v56 }
  0x62   : > { %1537 = vmatpush3.bf16.msra.mxu0 (!%p1466_p10), %v1714_v57  ;;  %1649 = vmatpush3.bf16.msra.mxu1 (!%p1466_p10), %v1714_v57 }
 0x117   : > { %v1947_v24 = vpop.f32.mrb[0].mxu0  ;;  %v1949_v25 = vpop.f32.mrb[0].mxu1 }
 0x118   : > { %v1951_v26 = vpop.f32.mrb[1].mxu0  ;;  %v1953_v27 = vpop.f32.mrb[1].mxu1  ;;  %566 = vst [vmem:[#allocation2 + $0x10] sm:$0xff] (!%p1466_p10), %v1947_v24  ;;  %574 = vst [vmem:[#allocation2 + $0x50] sm:$0xff] (!%p1466_p10), %v1949_v25 }
 0x119   : > { %v1955_v28 = vpop.f32.mrb[2].mxu0  ;;  %v1957_v29 = vpop.f32.mrb[2].mxu1  ;;  %564 = vst [vmem:[#allocation2] sm:$0xff] (!%p1466_p10), %v1951_v26  ;;  %572 = vst [vmem:[#allocation2 + $0x40] sm:$0xff] (!%p1466_p10), %v1953_v27 }
 0x11a   : > { %v1959_v30 = vpop.f32.mrb[3].mxu0  ;;  %v1961_v31 = vpop.f32.mrb[3].mxu1  ;;  %567 = vst [vmem:[#allocation2 + $0x18] sm:$0xff] (!%p1466_p10), %v1955_v28  ;;  %575 = vst [vmem:[#allocation2 + $0x58] sm:$0xff] (!%p1466_p10), %v1957_v29  ;;  %844 = vmatmul.mubr.bf16.vlgmr.msra.gmra.mrb[0].mxu0 (!%p1466_p10), %v1715_v58  ;;  %876 = vmatmul.mubr.bf16.vlgmr.msra.gmra.mrb[0].mxu1 (!%p1466_p10), %v1718_v59 }
 0x11b   : > { %565 = vst [vmem:[#allocation2 + $0x8] sm:$0xff] (!%p1466_p10), %v1959_v30  ;;  %573 = vst [vmem:[#allocation2 + $0x48] sm:$0xff] (!%p1466_p10), %v1961_v31  ;;  %851 = vmatprep.mubr.bf16.mxu0 (!%p1466_p10), %v1721_v60  ;;  %883 = vmatprep.mubr.bf16.mxu1 (!%p1466_p10), %v1723_v61 }
 0x11c   : > { %563 = sbr.rel (%p1466_p10) target bundleno = 526 (0x20e), region = 86 }
 0x11f   : > { %v1963_v32 = vpop.f32.mrb[4].mxu0  ;;  %v1965_v33 = vpop.f32.mrb[4].mxu1 }
 0x120   : > { %v1967_v34 = vpop.f32.mrb[5].mxu0  ;;  %v1969_v35 = vpop.f32.mrb[5].mxu1  ;;  %570 = vst [vmem:[#allocation2 + $0x30] sm:$0xff] (!%p1466_p10), %v1963_v32  ;;  %578 = vst [vmem:[#allocation2 + $0x70] sm:$0xff] (!%p1466_p10), %v1965_v33 }
 0x121   : > { %v1971_v36 = vpop.f32.mrb[6].mxu0  ;;  %v1973_v37 = vpop.f32.mrb[6].mxu1  ;;  %568 = vst [vmem:[#allocation2 + $0x20] sm:$0xff] (!%p1466_p10), %v1967_v34  ;;  %576 = vst [vmem:[#allocation2 + $0x60] sm:$0xff] (!%p1466_p10), %v1969_v35 }
 0x122   : > { %v1975_v38 = vpop.f32.mrb[7].mxu0  ;;  %v1977_v39 = vpop.f32.mrb[7].mxu1  ;;  %571 = vst [vmem:[#allocation2 + $0x38] sm:$0xff] (!%p1466_p10), %v1971_v36  ;;  %579 = vst [vmem:[#allocation2 + $0x78] sm:$0xff] (!%p1466_p10), %v1973_v37  ;;  %852 = vmatmul.mubr.bf16.gmra.mrb[4].mxu0 (!%p1466_p10), %v1725_v62  ;;  %884 = vmatmul.mubr.bf16.gmra.mrb[4].mxu1 (!%p1466_p10), %v1726_v63 }
 0x123   : > { %569 = vst [vmem:[#allocation2 + $0x28] sm:$0xff] %v1975_v38  ;;  %577 = vst [vmem:[#allocation2 + $0x68] sm:$0xff] %v1977_v39  ;;  %859 = vmatprep.mubr.bf16.mxu0 %v1727_v0  ;;  %891 = vmatprep.mubr.bf16.mxu1 %v1729_v1 }
 0x12a   : > { %860 = vmatmul.mubr.bf16.gmra.mrb[8].mxu0 %v1731_v2  ;;  %892 = vmatmul.mubr.bf16.gmra.mrb[8].mxu1 %v1732_v3 }
 0x12b   : > { %867 = vmatprep.mubr.bf16.mxu0 %v1733_v4  ;;  %899 = vmatprep.mubr.bf16.mxu1 %v1735_v5 }
 0x132   : > { %868 = vmatmul.mubr.bf16.gmra.mrb[12].mxu0 %v1737_v6  ;;  %900 = vmatmul.mubr.bf16.gmra.mrb[12].mxu1 %v1738_v7 }
 0x1ed   : > { %v1538_v8 = vpop.f32.mrb[0].mxu0  ;;  %v1562_v9 = vpop.f32.mrb[0].mxu1 }
 0x1ee   : > { %v1539_v11 = vpop.f32.mrb[1].mxu0  ;;  %v1563_v12 = vpop.f32.mrb[1].mxu1 }
 0x1ef   : > { %v1540_v13 = vadd.f32 %v1539_v11, %v1538_v8  ;;  %v1564_v14 = vadd.f32 %v1563_v12, %v1562_v9  ;;  %v1541_v15 = vpop.f32.mrb[2].mxu0  ;;  %v1565_v16 = vpop.f32.mrb[2].mxu1 }
 0x1f0   : > { %v1542_v17 = vpop.f32.mrb[3].mxu0  ;;  %v1566_v18 = vpop.f32.mrb[3].mxu1 }
 0x1f1   : > { %v846_v19 = vadd.f32 %v1540_v13, %v2095_v10  ;;  %v878_v20 = vadd.f32 %v1564_v14, %v2095_v10  ;;  %v1543_v21 = vadd.f32 %v1542_v17, %v1541_v15  ;;  %v1567_v22 = vadd.f32 %v1566_v18, %v1565_v16 }
 0x1f3   : > { %908 = vst [vmem:[%s2507_s6] sm:$0xff] %v846_v19  ;;  %916 = vst [vmem:[%s2507_s6 + $0x40] sm:$0xff] %v878_v20  ;;  %v849_v23 = vadd.f32 %v1543_v21, %v2095_v10  ;;  %v881_v40 = vadd.f32 %v1567_v22, %v2095_v10 }
 0x1f5   : > { %909 = vst [vmem:[%s2507_s6 + $0x8] sm:$0xff] %v849_v23  ;;  %917 = vst [vmem:[%s2507_s6 + $0x48] sm:$0xff] %v881_v40  ;;  %v1544_v41 = vpop.f32.mrb[4].mxu0  ;;  %v1568_v42 = vpop.f32.mrb[4].mxu1 }
 0x1f6   : > { %v1545_v43 = vpop.f32.mrb[5].mxu0  ;;  %v1569_v44 = vpop.f32.mrb[5].mxu1 }
 0x1f7   : > { %v1546_v45 = vadd.f32 %v1545_v43, %v1544_v41  ;;  %v1570_v46 = vadd.f32 %v1569_v44, %v1568_v42  ;;  %v1547_v47 = vpop.f32.mrb[6].mxu0  ;;  %v1571_v48 = vpop.f32.mrb[6].mxu1 }
 0x1f8   : > { %v1548_v49 = vpop.f32.mrb[7].mxu0  ;;  %v1572_v50 = vpop.f32.mrb[7].mxu1 }
 0x1f9   : > { %v854_v51 = vadd.f32 %v1546_v45, %v2095_v10  ;;  %v886_v52 = vadd.f32 %v1570_v46, %v2095_v10  ;;  %v1549_v53 = vadd.f32 %v1548_v49, %v1547_v47  ;;  %v1573_v54 = vadd.f32 %v1572_v50, %v1571_v48 }
 0x1fb   : > { %910 = vst [vmem:[%s2507_s6 + $0x10] sm:$0xff] %v854_v51  ;;  %918 = vst [vmem:[%s2507_s6 + $0x50] sm:$0xff] %v886_v52  ;;  %v857_v55 = vadd.f32 %v1549_v53, %v2095_v10  ;;  %v889_v56 = vadd.f32 %v1573_v54, %v2095_v10 }
 0x1fd   : > { %911 = vst [vmem:[%s2507_s6 + $0x18] sm:$0xff] %v857_v55  ;;  %919 = vst [vmem:[%s2507_s6 + $0x58] sm:$0xff] %v889_v56  ;;  %v1550_v57 = vpop.f32.mrb[8].mxu0  ;;  %v1574_v58 = vpop.f32.mrb[8].mxu1 }
 0x1fe   : > { %v1551_v59 = vpop.f32.mrb[9].mxu0  ;;  %v1575_v60 = vpop.f32.mrb[9].mxu1 }
 0x1ff   : > { %v1552_v61 = vadd.f32 %v1551_v59, %v1550_v57  ;;  %v1576_v62 = vadd.f32 %v1575_v60, %v1574_v58  ;;  %v1553_v63 = vpop.f32.mrb[10].mxu0  ;;  %v1577_v0 = vpop.f32.mrb[10].mxu1 }
 0x200   : > { %v1554_v1 = vpop.f32.mrb[11].mxu0  ;;  %v1578_v2 = vpop.f32.mrb[11].mxu1 }
 0x201   : > { %v862_v3 = vadd.f32 %v1552_v61, %v2095_v10  ;;  %v894_v4 = vadd.f32 %v1576_v62, %v2095_v10  ;;  %v1555_v5 = vadd.f32 %v1554_v1, %v1553_v63  ;;  %v1579_v6 = vadd.f32 %v1578_v2, %v1577_v0 }
 0x203   : > { %912 = vst [vmem:[%s2507_s6 + $0x20] sm:$0xff] %v862_v3  ;;  %920 = vst [vmem:[%s2507_s6 + $0x60] sm:$0xff] %v894_v4  ;;  %v865_v7 = vadd.f32 %v1555_v5, %v2095_v10  ;;  %v897_v8 = vadd.f32 %v1579_v6, %v2095_v10 }
 0x205   : > { %913 = vst [vmem:[%s2507_s6 + $0x28] sm:$0xff] %v865_v7  ;;  %921 = vst [vmem:[%s2507_s6 + $0x68] sm:$0xff] %v897_v8  ;;  %v1556_v9 = vpop.f32.mrb[12].mxu0  ;;  %v1580_v11 = vpop.f32.mrb[12].mxu1 }
 0x206   : > { %v1557_v12 = vpop.f32.mrb[13].mxu0  ;;  %v1581_v13 = vpop.f32.mrb[13].mxu1 }
 0x207   : > { %v1558_v14 = vadd.f32 %v1557_v12, %v1556_v9  ;;  %v1582_v15 = vadd.f32 %v1581_v13, %v1580_v11  ;;  %v1559_v16 = vpop.f32.mrb[14].mxu0  ;;  %v1583_v17 = vpop.f32.mrb[14].mxu1 }
 0x208   : > { %v1560_v18 = vpop.f32.mrb[15].mxu0  ;;  %v1584_v19 = vpop.f32.mrb[15].mxu1 }
 0x209   : > { %v870_v20 = vadd.f32 %v1558_v14, %v2095_v10  ;;  %v902_v21 = vadd.f32 %v1582_v15, %v2095_v10  ;;  %v1561_v22 = vadd.f32 %v1560_v18, %v1559_v16  ;;  %v1585_v23 = vadd.f32 %v1584_v19, %v1583_v17 }
 0x20b   : > { %914 = vst [vmem:[%s2507_s6 + $0x30] sm:$0xff] %v870_v20  ;;  %922 = vst [vmem:[%s2507_s6 + $0x70] sm:$0xff] %v902_v21  ;;  %v873_v40 = vadd.f32 %v1561_v22, %v2095_v10  ;;  %v905_v41 = vadd.f32 %v1585_v23, %v2095_v10 }
 0x20d   : > { %915 = vst [vmem:[%s2507_s6 + $0x38] sm:$0xff] %v873_v40  ;;  %923 = vst [vmem:[%s2507_s6 + $0x78] sm:$0xff] %v905_v41 }
 0x20e PF: > { %p1500_p11 = scmp.le.s32.totalorder %s1835_s23, 0 }
 0x20f   : > { %v928_v42 = vld [vmem:[#allocation2] sm:$0xff] (!%p1500_p11)  ;;  %v929_v43 = vld [vmem:[#allocation2 + $0x8] sm:$0xff] (!%p1500_p11)  ;;  %v930_v44 = vld [vmem:[#allocation2 + $0x10] sm:$0xff] (!%p1500_p11) }
 0x210   : > { %927 = sbr.rel (%p1500_p11) target bundleno = 539 (0x21b), region = 90  ;;  %v944_v45 = vadd.f32 (!%p1500_p11), %v928_v42, %v1951_v26  ;;  %v945_v46 = vadd.f32 (!%p1500_p11), %v929_v43, %v1959_v30  ;;  %v946_v10 = vadd.f32 (!%p1500_p11), %v1947_v24, %v930_v44  ;;  %v931_v47 = vld [vmem:[#allocation2 + $0x18] sm:$0xff] (!%p1500_p11)  ;;  %v936_v55 = vld [vmem:[#allocation2 + $0x40] sm:$0xff] (!%p1500_p11)  ;;  %v937_v56 = vld [vmem:[#allocation2 + $0x48] sm:$0xff] (!%p1500_p11) }
 0x211   : > { %v947_v50 = vadd.f32 (!%p1500_p11), %v1955_v28, %v931_v47  ;;  %v952_v24 = vadd.f32 (!%p1500_p11), %v936_v55, %v1953_v27  ;;  %v938_v57 = vld [vmem:[#allocation2 + $0x50] sm:$0xff] (!%p1500_p11)  ;;  %v939_v58 = vld [vmem:[#allocation2 + $0x58] sm:$0xff] (!%p1500_p11)  ;;  %v953_v28 = vadd.f32 (!%p1500_p11), %v937_v56, %v1961_v31 }
 0x212   : > { %v934_v53 = vld [vmem:[#allocation2 + $0x30] sm:$0xff] (!%p1500_p11)  ;;  %960 = vst [vmem:[#allocation2] sm:$0xff] (!%p1500_p11), %v944_v45  ;;  %961 = vst [vmem:[#allocation2 + $0x8] sm:$0xff] (!%p1500_p11), %v945_v46 }
 0x213   : > { %v932_v48 = vld [vmem:[#allocation2 + $0x20] sm:$0xff] (!%p1500_p11)  ;;  %962 = vst [vmem:[#allocation2 + $0x10] sm:$0xff] (!%p1500_p11), %v946_v10  ;;  %v950_v26 = vadd.f32 (!%p1500_p11), %v1963_v32, %v934_v53  ;;  %963 = vst [vmem:[#allocation2 + $0x18] sm:$0xff] (!%p1500_p11), %v947_v50  ;;  %v942_v61 = vld [vmem:[#allocation2 + $0x70] sm:$0xff] (!%p1500_p11) }
 0x214   : > { %v948_v51 = vadd.f32 (!%p1500_p11), %v932_v48, %v1967_v34  ;;  %v935_v54 = vld [vmem:[#allocation2 + $0x38] sm:$0xff] (!%p1500_p11)  ;;  %v954_v34 = vadd.f32 (!%p1500_p11), %v1949_v25, %v938_v57  ;;  %v940_v59 = vld [vmem:[#allocation2 + $0x60] sm:$0xff] (!%p1500_p11)  ;;  %968 = vst [vmem:[#allocation2 + $0x40] sm:$0xff] (!%p1500_p11), %v952_v24  ;;  %969 = vst [vmem:[#allocation2 + $0x48] sm:$0xff] (!%p1500_p11), %v953_v28 }
 0x215   : > { %v933_v49 = vld [vmem:[#allocation2 + $0x28] sm:$0xff] (!%p1500_p11)  ;;  %v951_v30 = vadd.f32 (!%p1500_p11), %v1971_v36, %v935_v54  ;;  %966 = vst [vmem:[#allocation2 + $0x30] sm:$0xff] (!%p1500_p11), %v950_v26  ;;  %v956_v27 = vadd.f32 (!%p1500_p11), %v940_v59, %v1969_v35  ;;  %v958_v36 = vadd.f32 (!%p1500_p11), %v1965_v33, %v942_v61  ;;  %v943_v62 = vld [vmem:[#allocation2 + $0x78] sm:$0xff] (!%p1500_p11) }
 0x216   : > { %v949_v52 = vadd.f32 (!%p1500_p11), %v933_v49, %v1975_v38  ;;  %964 = vst [vmem:[#allocation2 + $0x20] sm:$0xff] (!%p1500_p11), %v948_v51  ;;  %v955_v38 = vadd.f32 (!%p1500_p11), %v1957_v29, %v939_v58  ;;  %v941_v60 = vld [vmem:[#allocation2 + $0x68] sm:$0xff] (!%p1500_p11)  ;;  %970 = vst [vmem:[#allocation2 + $0x50] sm:$0xff] (!%p1500_p11), %v954_v34  ;;  %v959_v25 = vadd.f32 (!%p1500_p11), %v1973_v37, %v943_v62 }
 0x217   : > { %967 = vst [vmem:[#allocation2 + $0x38] sm:$0xff] %v951_v30  ;;  %v957_v32 = vadd.f32 %v941_v60, %v1977_v39  ;;  %972 = vst [vmem:[#allocation2 + $0x60] sm:$0xff] %v956_v27 }
 0x218   : > { %965 = vst [vmem:[#allocation2 + $0x28] sm:$0xff] %v949_v52  ;;  %971 = vst [vmem:[#allocation2 + $0x58] sm:$0xff] %v955_v38 }
 0x219   : > { %973 = vst [vmem:[#allocation2 + $0x68] sm:$0xff] %v957_v32  ;;  %974 = vst [vmem:[#allocation2 + $0x70] sm:$0xff] %v958_v36 }
 0x21a   : > { %975 = vst [vmem:[#allocation2 + $0x78] sm:$0xff] %v959_v25 }
 0x21b PF: > { %p1501_p12 = scmp.ne.s32.totalorder %s1835_s23, 1 }
 0x21c   : > { %v998_v29 = vld [vmem:[%s2503_s2 + $0x10] sm:$0xff] (!%p1501_p12)  ;;  %v996_v31 = vld [vmem:[%s2503_s2] sm:$0xff] (!%p1501_p12)  ;;  %v1845_v33 = vmov (!%p1501_p12), 0   ;;  %v999_v35 = vld [vmem:[%s2503_s2 + $0x18] sm:$0xff] (!%p1501_p12)  ;;  %v1140_v11 = vlaneseq (!%p1501_p12) }
 0x21d   : > { %979 = sbr.rel (%p1501_p12) target bundleno = 1024 (0x400), region = 94  ;;  %1740 = vset.pattern.permute.xlu1 (!%p1501_p12), %v1845_v33  ;;  %1739 = vset.pattern.permute.xlu0 (!%p1501_p12), %v1845_v33  ;;  %v997_v37 = vld [vmem:[%s2503_s2 + $0x8] sm:$0xff] (!%p1501_p12)  ;;  %v1000_v63 = vld [vmem:[%s2503_s2 + $0x20] sm:$0xff] (!%p1501_p12)  ;;  %v1003_v0 = vld [vmem:[%s2503_s2 + $0x38] sm:$0xff] (!%p1501_p12) }
 0x21e   : > { %1024 = vperm.xlu1 (!%p1501_p12), %1740, %v998_v29   ;;  %1014 = vperm.xlu0 (!%p1501_p12), %1739, %v996_v31   ;;  %v1001_v39 = vld [vmem:[%s2503_s2 + $0x28] sm:$0xff] (!%p1501_p12)  ;;  %v1002_v1 = vld [vmem:[%s2503_s2 + $0x30] sm:$0xff] (!%p1501_p12)  ;;  %v1004_v3 = vld [vmem:[%s2503_s2 + $0x40] sm:$0xff] (!%p1501_p12)  ;;  %v2227_v14 = vand.u32 (!%p1501_p12), 127, %v1140_v11 }
 0x21f   : > { %v1005_v2 = vld [vmem:[%s2503_s2 + $0x48] sm:$0xff] (!%p1501_p12)  ;;  %v1007_v4 = vld [vmem:[%s2503_s2 + $0x58] sm:$0xff] (!%p1501_p12)  ;;  %v1006_v5 = vld [vmem:[%s2503_s2 + $0x50] sm:$0xff] (!%p1501_p12) }
 0x220   : > { %v1009_v6 = vld [vmem:[%s2503_s2 + $0x68] sm:$0xff] (!%p1501_p12)  ;;  %v1008_v7 = vld [vmem:[%s2503_s2 + $0x60] sm:$0xff] (!%p1501_p12)  ;;  %v1011_v8 = vld [vmem:[%s2503_s2 + $0x78] sm:$0xff] (!%p1501_p12)  ;;  %vm1142_vm0 = vcmp.lt.s32.totalorder (!%p1501_p12), %v2227_v14, 8 }
 0x221   : > { %v1010_v9 = vld [vmem:[%s2503_s2 + $0x70] sm:$0xff] (!%p1501_p12)  ;;  %v980_v13 = vld [vmem:[#allocation2] sm:$0xff] (!%p1501_p12)  ;;  %v983_v21 = vld [vmem:[#allocation2 + $0x18] sm:$0xff] (!%p1501_p12) }
 0x222   : > { %1029 = vperm.xlu1 (!%p1501_p12), %1740, %v999_v35   ;;  %1019 = vperm.xlu0 (!%p1501_p12), %1739, %v997_v37   ;;  %v982_v12 = vld [vmem:[#allocation2 + $0x10] sm:$0xff] (!%p1501_p12)  ;;  %v1108_v17 = vld [vmem:[%s2507_s6] sm:$0xff] (!%p1501_p12)  ;;  %v981_v22 = vld [vmem:[#allocation2 + $0x8] sm:$0xff] (!%p1501_p12) }
 0x223   : > { %v1110_v18 = vld [vmem:[%s2507_s6 + $0x10] sm:$0xff] (!%p1501_p12)  ;;  %v1109_v43 = vld [vmem:[%s2507_s6 + $0x8] sm:$0xff] (!%p1501_p12)  ;;  %v1111_v10 = vld [vmem:[%s2507_s6 + $0x18] sm:$0xff] (!%p1501_p12) }
 0x224   : > { %v985_v47 = vld [vmem:[#allocation2 + $0x28] sm:$0xff]  ;;  %v984_v48 = vld [vmem:[#allocation2 + $0x20] sm:$0xff]  ;;  %v987_v24 = vld [vmem:[#allocation2 + $0x38] sm:$0xff] }
 0x225   : > { %v1112_v53 = vld [vmem:[%s2507_s6 + $0x20] sm:$0xff]  ;;  %v986_v56 = vld [vmem:[#allocation2 + $0x30] sm:$0xff]  ;;  %v1113_v57 = vld [vmem:[%s2507_s6 + $0x28] sm:$0xff] }
 0x226   : > { %1039 = vperm.xlu1 %1740, %v1001_v39   ;;  %1034 = vperm.xlu0 %1739, %v1000_v63   ;;  %v1114_v59 = vld [vmem:[%s2507_s6 + $0x30] sm:$0xff]  ;;  %v1115_v36 = vld [vmem:[%s2507_s6 + $0x38] sm:$0xff]  ;;  %v989_v62 = vld [vmem:[#allocation2 + $0x48] sm:$0xff] }
 0x227   : > { %v988_v25 = vld [vmem:[#allocation2 + $0x40] sm:$0xff] }
 0x228   : > { %v1116_v35 = vld [vmem:[%s2507_s6 + $0x40] sm:$0xff] }
 0x22a   : > { %1049 = vperm.xlu1 %1740, %v1003_v0   ;;  %1044 = vperm.xlu0 %1739, %v1002_v1  }
 0x22e   : > { %1059 = vperm.xlu1 %1740, %v1005_v2   ;;  %1054 = vperm.xlu0 %1739, %v1004_v3   ;;  %v991_v2 = vld [vmem:[#allocation2 + $0x58] sm:$0xff]  ;;  %v990_v3 = vld [vmem:[#allocation2 + $0x50] sm:$0xff] }
 0x232   : > { %1069 = vperm.xlu1 %1740, %v1007_v4   ;;  %1064 = vperm.xlu0 %1739, %v1006_v5   ;;  %v1117_v4 = vld [vmem:[%s2507_s6 + $0x48] sm:$0xff] }
 0x236   : > { %1079 = vperm.xlu1 %1740, %v1009_v6   ;;  %1074 = vperm.xlu0 %1739, %v1008_v7  }
 0x23a   : > { %1089 = vperm.xlu1 %1740, %v1011_v8   ;;  %1084 = vperm.xlu0 %1739, %v1010_v9   ;;  %v1118_v9 = vld [vmem:[%s2507_s6 + $0x50] sm:$0xff] }
 0x29d   : > { %v1025_v15 = vpop.permute.xlu1 %1024  ;;  %v1015_v16 = vpop.permute.xlu0 %1014 }
 0x29e   : > { %v1094_v19 = vmul.f32 %v1025_v15, %v982_v12  ;;  %v1092_v20 = vmul.f32 %v1015_v16, %v980_v13  ;;  %v1119_v16 = vld [vmem:[%s2507_s6 + $0x58] sm:$0xff] }
 0x2a0   : > { %v1124_v23 = vadd.f32 %v1108_v17, %v1092_v20  ;;  %v1126_v40 = vadd.f32 %v1110_v18, %v1094_v19  ;;  %v993_v17 = vld [vmem:[#allocation2 + $0x68] sm:$0xff]  ;;  %v992_v18 = vld [vmem:[#allocation2 + $0x60] sm:$0xff] }
 0x2a1   : > { %v1030_v41 = vpop.permute.xlu1 %1029  ;;  %v1020_v42 = vpop.permute.xlu0 %1019 }
 0x2a2   : > { %v1095_v44 = vmul.f32 %v1030_v41, %v983_v21  ;;  %v1093_v45 = vmul.f32 %v1020_v42, %v981_v22  ;;  %v2241_v46 = vsel %vm1142_vm0, %v1124_v23, -inf  ;;  %v2249_v50 = vsel %vm1142_vm0, %v1126_v40, -inf  ;;  %v1120_v22 = vld [vmem:[%s2507_s6 + $0x60] sm:$0xff] }
 0x2a3   : > { %1159 = vmax.xlane.f32.xlu0 %v2241_v46 }
 0x2a4   : > { %v1125_v49 = vadd.f32 %v1109_v43, %v1093_v45  ;;  %v1127_v54 = vadd.f32 %v1111_v10, %v1095_v44  ;;  %v995_v44 = vld [vmem:[#allocation2 + $0x78] sm:$0xff]  ;;  %v994_v45 = vld [vmem:[#allocation2 + $0x70] sm:$0xff]  ;;  %v1121_v10 = vld [vmem:[%s2507_s6 + $0x68] sm:$0xff] }
 0x2a5   : > { %v1040_v51 = vpop.permute.xlu1 %1039  ;;  %v1035_v52 = vpop.permute.xlu0 %1034 }
 0x2a6   : > { %v1097_v55 = vmul.f32 %v1040_v51, %v985_v47  ;;  %v1096_v26 = vmul.f32 %v1035_v52, %v984_v48  ;;  %v2256_v30 = vsel %vm1142_vm0, %v1125_v49, -inf  ;;  %v2265_v38 = vsel %vm1142_vm0, %v1127_v54, -inf  ;;  %v1122_v52 = vld [vmem:[%s2507_s6 + $0x70] sm:$0xff] }
 0x2a7   : > { %1161 = vmax.xlane.f32.xlu1 %v2256_v30  ;;  %1163 = vmax.xlane.f32.xlu0 %v2249_v50 }
 0x2a8   : > { %v1128_v58 = vadd.f32 %v1112_v53, %v1096_v26  ;;  %v1129_v32 = vadd.f32 %v1113_v57, %v1097_v55 }
 0x2a9   : > { %v1050_v28 = vpop.permute.xlu1 %1049  ;;  %v1045_v34 = vpop.permute.xlu0 %1044 }
 0x2aa   : > { %v1099_v60 = vmul.f32 %v1050_v28, %v987_v24  ;;  %v1098_v61 = vmul.f32 %v1045_v34, %v986_v56  ;;  %v2272_v27 = vsel %vm1142_vm0, %v1128_v58, -inf  ;;  %v2288_v1 = vsel %vm1142_vm0, %v1129_v32, -inf  ;;  %v1123_v24 = vld [vmem:[%s2507_s6 + $0x78] sm:$0xff] }
 0x2ab   : > { %1167 = vmax.xlane.f32.xlu1 %v2272_v27  ;;  %1165 = vmax.xlane.f32.xlu0 %v2265_v38 }
 0x2ac   : > { %v1130_v29 = vadd.f32 %v1114_v59, %v1098_v61  ;;  %v1131_v37 = vadd.f32 %v1115_v36, %v1099_v60 }
 0x2ad   : > { %v1060_v31 = vpop.permute.xlu1 %1059  ;;  %v1055_v33 = vpop.permute.xlu0 %1054 }
 0x2ae   : > { %v1101_v39 = vmul.f32 %v1060_v31, %v989_v62  ;;  %v1100_v63 = vmul.f32 %v1055_v33, %v988_v25  ;;  %v2284_v0 = vsel %vm1142_vm0, %v1130_v29, -inf  ;;  %v2297_v8 = vsel %vm1142_vm0, %v1131_v37, -inf }
 0x2af   : > { %1171 = vmax.xlane.f32.xlu1 %v2284_v0  ;;  %1169 = vmax.xlane.f32.xlu0 %v2288_v1 }
 0x2b0   : > { %v1132_v5 = vadd.f32 %v1116_v35, %v1100_v63  ;;  %v1133_v15 = vadd.f32 %v1117_v4, %v1101_v39 }
 0x2b1   : > { %v1070_v6 = vpop.permute.xlu1 %1069  ;;  %v1065_v7 = vpop.permute.xlu0 %1064 }
 0x2b2   : > { %v1103_v11 = vmul.f32 %v1070_v6, %v991_v2  ;;  %v1102_v12 = vmul.f32 %v1065_v7, %v990_v3  ;;  %v2304_v13 = vsel %vm1142_vm0, %v1132_v5, -inf  ;;  %v2320_v43 = vsel %vm1142_vm0, %v1133_v15, -inf }
 0x2b3   : > { %1175 = vmax.xlane.f32.xlu1 %v2304_v13  ;;  %1173 = vmax.xlane.f32.xlu0 %v2297_v8 }
 0x2b4   : > { %v1134_v19 = vadd.f32 %v1118_v9, %v1102_v12  ;;  %v1135_v23 = vadd.f32 %v1119_v16, %v1103_v11 }
 0x2b5   : > { %v1080_v20 = vpop.permute.xlu1 %1079  ;;  %v1075_v21 = vpop.permute.xlu0 %1074 }
 0x2b6   : > { %v1105_v40 = vmul.f32 %v1080_v20, %v993_v17  ;;  %v1104_v41 = vmul.f32 %v1075_v21, %v992_v18  ;;  %v2316_v42 = vsel %vm1142_vm0, %v1134_v19, -inf  ;;  %v2329_v51 = vsel %vm1142_vm0, %v1135_v23, -inf }
 0x2b7   : > { %1179 = vmax.xlane.f32.xlu1 %v2316_v42  ;;  %1177 = vmax.xlane.f32.xlu0 %v2320_v43 }
 0x2b8   : > { %v1136_v47 = vadd.f32 %v1120_v22, %v1104_v41  ;;  %v1137_v26 = vadd.f32 %v1121_v10, %v1105_v40 }
 0x2b9   : > { %v1090_v48 = vpop.permute.xlu1 %1089  ;;  %v1085_v49 = vpop.permute.xlu0 %1084 }
 0x2ba   : > { %v1107_v53 = vmul.f32 %v1090_v48, %v995_v44  ;;  %v1106_v54 = vmul.f32 %v1085_v49, %v994_v45  ;;  %v2336_v55 = vsel %vm1142_vm0, %v1136_v47, -inf  ;;  %v2349_v58 = vsel %vm1142_vm0, %v1137_v26, -inf }
 0x2bb   : > { %1183 = vmax.xlane.f32.xlu1 %v2336_v55  ;;  %1181 = vmax.xlane.f32.xlu0 %v2329_v51 }
 0x2bc   : > { %v1138_v56 = vadd.f32 %v1122_v52, %v1106_v54  ;;  %v1139_v28 = vadd.f32 %v1123_v24, %v1107_v53 }
 0x2be   : > { %v2345_v57 = vsel %vm1142_vm0, %v1138_v56, -inf  ;;  %v2355_v34 = vsel %vm1142_vm0, %v1139_v28, -inf }
 0x2bf   : > { %1187 = vmax.xlane.f32.xlu1 %v2345_v57  ;;  %1185 = vmax.xlane.f32.xlu0 %v2349_v58 }
 0x2c3   : > { %1189 = vmax.xlane.f32.xlu0 %v2355_v34 }
 0x330   : > { %v1160_v59 = vpop.xlane.xlu0 %1159 }
 0x331   : > { %v2359_v60 = vsub.f32 %v2241_v46, %v1160_v59 }
 0x333   : > { %v1207_v61 = vmul.f32 1.442695, %v2359_v60 }
 0x334   : > { %v1162_v32 = vpop.xlane.xlu1 %1161  ;;  %v1164_v36 = vpop.xlane.xlu0 %1163 }
 0x335   : > { %1741 = vpow2.f32 %v1207_v61  ;;  %v2363_v62 = vsub.f32 %v2256_v30, %v1162_v32  ;;  %v2366_v25 = vsub.f32 %v2249_v50, %v1164_v36 }
 0x337   : > { %v1209_v14 = vmul.f32 1.442695, %v2363_v62  ;;  %v1211_v29 = vmul.f32 1.442695, %v2366_v25 }
 0x338   : > { %v1168_v31 = vpop.xlane.xlu1 %1167  ;;  %v1166_v33 = vpop.xlane.xlu0 %1165 }
 0x339   : > { %1743 = vpow2.f32 %v1209_v14  ;;  %v2371_v46 = vsub.f32 %v2272_v27, %v1168_v31  ;;  %v2374_v35 = vsub.f32 %v2265_v38, %v1166_v33 }
 0x33a   : > { %1745 = vpow2.f32 %v1211_v29 }
 0x33b   : > { %v1215_v30 = vmul.f32 1.442695, %v2371_v46  ;;  %v1213_v37 = vmul.f32 1.442695, %v2374_v35 }
 0x33c   : > { %v1172_v50 = vpop.xlane.xlu1 %1171  ;;  %v1170_v39 = vpop.xlane.xlu0 %1169 }
 0x33d   : > { %1747 = vpow2.f32 %v1215_v30  ;;  %v2379_v63 = vsub.f32 %v2284_v0, %v1172_v50  ;;  %v2382_v2 = vsub.f32 %v2288_v1, %v1170_v39 }
 0x33e   : > { %1749 = vpow2.f32 %v1213_v37 }
 0x33f   : > { %v1742_v27 = vpop.eup %1741  ;;  %v1219_v3 = vmul.f32 1.442695, %v2379_v63  ;;  %v1217_v38 = vmul.f32 1.442695, %v2382_v2 }
 0x340   : > { %v1176_v4 = vpop.xlane.xlu1 %1175  ;;  %1239 = vadd.xlane.f32.xlu1 %v1742_v27  ;;  %v1174_v5 = vpop.xlane.xlu0 %1173 }
 0x341   : > { %1751 = vpow2.f32 %v1219_v3  ;;  %v2387_v6 = vsub.f32 %v2304_v13, %v1176_v4  ;;  %v2390_v7 = vsub.f32 %v2297_v8, %v1174_v5 }
 0x342   : > { %1753 = vpow2.f32 %v1217_v38 }
 0x343   : > { %v1744_v0 = vpop.eup %1743  ;;  %v1223_v1 = vmul.f32 1.442695, %v2387_v6  ;;  %v1221_v9 = vmul.f32 1.442695, %v2390_v7 }
 0x344   : > { %v1746_v11 = vpop.eup %1745  ;;  %v1180_v12 = vpop.xlane.xlu1 %1179  ;;  %1241 = vadd.xlane.f32.xlu0 %v1744_v0 }
 0x345   : > { %v1178_v15 = vpop.xlane.xlu0 %1177  ;;  %1755 = vpow2.f32 %v1223_v1  ;;  %v2395_v16 = vsub.f32 %v2316_v42, %v1180_v12  ;;  %1243 = vadd.xlane.f32.xlu1 %v1746_v11 }
 0x346   : > { %v2398_v13 = vsub.f32 %v2320_v43, %v1178_v15  ;;  %1757 = vpow2.f32 %v1221_v9 }
 0x347   : > { %v1748_v8 = vpop.eup %1747  ;;  %v1227_v17 = vmul.f32 1.442695, %v2395_v16 }
 0x348   : > { %v1225_v18 = vmul.f32 1.442695, %v2398_v13  ;;  %v1750_v19 = vpop.eup %1749  ;;  %v1184_v20 = vpop.xlane.xlu1 %1183 }
 0x349   : > { %v1182_v21 = vpop.xlane.xlu0 %1181  ;;  %1759 = vpow2.f32 %v1227_v17  ;;  %v2403_v22 = vsub.f32 %v2336_v55, %v1184_v20  ;;  %1247 = vadd.xlane.f32.xlu1 %v1748_v8  ;;  %1245 = vadd.xlane.f32.xlu0 %v1750_v19 }
 0x34a   : > { %v2406_v23 = vsub.f32 %v2329_v51, %v1182_v21  ;;  %1761 = vpow2.f32 %v1225_v18 }
 0x34b   : > { %v1752_v40 = vpop.eup %1751  ;;  %v1231_v41 = vmul.f32 1.442695, %v2403_v22 }
 0x34c   : > { %v1229_v42 = vmul.f32 1.442695, %v2406_v23  ;;  %v1754_v43 = vpop.eup %1753  ;;  %v1188_v44 = vpop.xlane.xlu1 %1187 }
 0x34d   : > { %v1186_v45 = vpop.xlane.xlu0 %1185  ;;  %1763 = vpow2.f32 %v1231_v41  ;;  %v2411_v10 = vsub.f32 %v2345_v57, %v1188_v44  ;;  %1251 = vadd.xlane.f32.xlu1 %v1752_v40  ;;  %1249 = vadd.xlane.f32.xlu0 %v1754_v43 }
 0x34e   : > { %v2414_v47 = vsub.f32 %v2349_v58, %v1186_v45  ;;  %1765 = vpow2.f32 %v1229_v42 }
 0x34f   : > { %v1756_v48 = vpop.eup %1755  ;;  %v1235_v49 = vmul.f32 1.442695, %v2411_v10 }
 0x350   : > { %v1233_v51 = vmul.f32 1.442695, %v2414_v47  ;;  %v1758_v52 = vpop.eup %1757 }
 0x351   : > { %v1190_v53 = vpop.xlane.xlu0 %1189  ;;  %1767 = vpow2.f32 %v1235_v49  ;;  %1255 = vadd.xlane.f32.xlu1 %v1756_v48  ;;  %1253 = vadd.xlane.f32.xlu0 %v1758_v52 }
 0x352   : > { %v2419_v54 = vsub.f32 %v2355_v34, %v1190_v53  ;;  %1769 = vpow2.f32 %v1233_v51 }
 0x353   : > { %v1760_v55 = vpop.eup %1759 }
 0x354   : > { %v1237_v26 = vmul.f32 1.442695, %v2419_v54  ;;  %v1762_v24 = vpop.eup %1761 }
 0x355   : > { %1259 = vadd.xlane.f32.xlu1 %v1760_v55  ;;  %1257 = vadd.xlane.f32.xlu0 %v1762_v24 }
 0x356   : > { %1771 = vpow2.f32 %v1237_v26 }
 0x357   : > { %v1764_v56 = vpop.eup %1763 }
 0x358   : > { %v1766_v57 = vpop.eup %1765 }
 0x359   : > { %1263 = vadd.xlane.f32.xlu1 %v1764_v56  ;;  %1261 = vadd.xlane.f32.xlu0 %v1766_v57 }
 0x35b   : > { %v1768_v58 = vpop.eup %1767 }
 0x35c   : > { %v1770_v28 = vpop.eup %1769 }
 0x35d   : > { %1267 = vadd.xlane.f32.xlu1 %v1768_v58  ;;  %1265 = vadd.xlane.f32.xlu0 %v1770_v28 }
 0x360   : > { %v1772_v59 = vpop.eup %1771 }
 0x361   : > { %1269 = vadd.xlane.f32.xlu0 %v1772_v59 }
 0x3cd   : > { %v1240_v34 = vpop.xlane.xlu1 %1239 }
 0x3ce   : > { %1773 = vlog2.f32 %v1240_v34 }
 0x3d1   : > { %v1242_v61 = vpop.xlane.xlu0 %1241 }
 0x3d2   : > { %v1244_v32 = vpop.xlane.xlu1 %1243  ;;  %1775 = vlog2.f32 %v1242_v61 }
 0x3d3   : > { %1777 = vlog2.f32 %v1244_v32 }
 0x3d6   : > { %v1248_v36 = vpop.xlane.xlu1 %1247  ;;  %v1246_v14 = vpop.xlane.xlu0 %1245 }
 0x3d7   : > { %1779 = vlog2.f32 %v1248_v36 }
 0x3d8   : > { %v1774_v29 = vpop.eup %1773  ;;  %1781 = vlog2.f32 %v1246_v14 }
 0x3d9   : > { %v1272_v31 = vmul.f32 0.6931472, %v1774_v29 }
 0x3da   : > { %v1252_v33 = vpop.xlane.xlu1 %1251  ;;  %v1250_v30 = vpop.xlane.xlu0 %1249 }
 0x3db   : > { %v1303_v37 = vsub.f32 %v2359_v60, %v1272_v31  ;;  %1783 = vlog2.f32 %v1252_v33 }
 0x3dc   : > { %v1776_v50 = vpop.eup %1775  ;;  %1785 = vlog2.f32 %v1250_v30 }
 0x3dd   : > { %v1778_v39 = vpop.eup %1777  ;;  %1319 = vst [vmem:[%s2507_s6] sm:$0xff] %v1303_v37  ;;  %v1274_v27 = vmul.f32 0.6931472, %v1776_v50 }
 0x3de   : > { %v1276_v3 = vmul.f32 0.6931472, %v1778_v39  ;;  %v1256_v38 = vpop.xlane.xlu1 %1255  ;;  %v1254_v4 = vpop.xlane.xlu0 %1253 }
 0x3df   : > { %v1304_v5 = vsub.f32 %v2363_v62, %v1274_v27  ;;  %1787 = vlog2.f32 %v1256_v38 }
 0x3e0   : > { %v1305_v0 = vsub.f32 %v2366_v25, %v1276_v3  ;;  %1789 = vlog2.f32 %v1254_v4 }
 0x3e1   : > { %v1780_v1 = vpop.eup %1779  ;;  %1320 = vst [vmem:[%s2507_s6 + $0x8] sm:$0xff] %v1304_v5 }
 0x3e2   : > { %v1782_v60 = vpop.eup %1781  ;;  %1321 = vst [vmem:[%s2507_s6 + $0x10] sm:$0xff] %v1305_v0  ;;  %v1280_v9 = vmul.f32 0.6931472, %v1780_v1  ;;  %v1260_v11 = vpop.xlane.xlu1 %1259 }
 0x3e3   : > { %v1258_v12 = vpop.xlane.xlu0 %1257  ;;  %v1278_v15 = vmul.f32 0.6931472, %v1782_v60  ;;  %1791 = vlog2.f32 %v1260_v11 }
 0x3e4   : > { %v1307_v62 = vsub.f32 %v2371_v46, %v1280_v9  ;;  %1793 = vlog2.f32 %v1258_v12 }
 0x3e5   : > { %v1784_v25 = vpop.eup %1783  ;;  %v1306_v8 = vsub.f32 %v2374_v35, %v1278_v15 }
 0x3e6   : > { %v1786_v17 = vpop.eup %1785  ;;  %1323 = vst [vmem:[%s2507_s6 + $0x20] sm:$0xff] %v1307_v62  ;;  %v1284_v18 = vmul.f32 0.6931472, %v1784_v25  ;;  %v1264_v19 = vpop.xlane.xlu1 %1263 }
 0x3e7   : > { %v1262_v20 = vpop.xlane.xlu0 %1261  ;;  %1322 = vst [vmem:[%s2507_s6 + $0x18] sm:$0xff] %v1306_v8  ;;  %v1282_v21 = vmul.f32 0.6931472, %v1786_v17  ;;  %1795 = vlog2.f32 %v1264_v19 }
 0x3e8   : > { %v1309_v46 = vsub.f32 %v2379_v63, %v1284_v18  ;;  %1797 = vlog2.f32 %v1262_v20 }
 0x3e9   : > { %v1788_v40 = vpop.eup %1787  ;;  %v1308_v35 = vsub.f32 %v2382_v2, %v1282_v21 }
 0x3ea   : > { %v1790_v41 = vpop.eup %1789  ;;  %1325 = vst [vmem:[%s2507_s6 + $0x30] sm:$0xff] %v1309_v46  ;;  %v1288_v42 = vmul.f32 0.6931472, %v1788_v40  ;;  %v1268_v43 = vpop.xlane.xlu1 %1267 }
 0x3eb   : > { %v1266_v44 = vpop.xlane.xlu0 %1265  ;;  %1324 = vst [vmem:[%s2507_s6 + $0x28] sm:$0xff] %v1308_v35  ;;  %v1286_v45 = vmul.f32 0.6931472, %v1790_v41  ;;  %1799 = vlog2.f32 %v1268_v43 }
 0x3ec   : > { %v1311_v63 = vsub.f32 %v2387_v6, %v1288_v42  ;;  %1801 = vlog2.f32 %v1266_v44 }
 0x3ed   : > { %v1792_v48 = vpop.eup %1791  ;;  %v1310_v2 = vsub.f32 %v2390_v7, %v1286_v45 }
 0x3ee   : > { %v1794_v49 = vpop.eup %1793  ;;  %1327 = vst [vmem:[%s2507_s6 + $0x40] sm:$0xff] %v1311_v63  ;;  %v1292_v51 = vmul.f32 0.6931472, %v1792_v48 }
 0x3ef   : > { %v1270_v52 = vpop.xlane.xlu0 %1269  ;;  %1326 = vst [vmem:[%s2507_s6 + $0x38] sm:$0xff] %v1310_v2  ;;  %v1290_v53 = vmul.f32 0.6931472, %v1794_v49 }
 0x3f0   : > { %1803 = vlog2.f32 %v1270_v52  ;;  %v1313_v55 = vsub.f32 %v2395_v16, %v1292_v51 }
 0x3f1   : > { %v1796_v6 = vpop.eup %1795  ;;  %v1312_v26 = vsub.f32 %v2398_v13, %v1290_v53 }
 0x3f2   : > { %v1798_v24 = vpop.eup %1797  ;;  %1329 = vst [vmem:[%s2507_s6 + $0x50] sm:$0xff] %v1313_v55  ;;  %v1296_v7 = vmul.f32 0.6931472, %v1796_v6 }
 0x3f3   : > { %1328 = vst [vmem:[%s2507_s6 + $0x48] sm:$0xff] %v1312_v26  ;;  %v1294_v56 = vmul.f32 0.6931472, %v1798_v24 }
 0x3f4   : > { %v1315_v57 = vsub.f32 %v2403_v22, %v1296_v7 }
 0x3f5   : > { %v1800_v58 = vpop.eup %1799  ;;  %v1314_v28 = vsub.f32 %v2406_v23, %v1294_v56 }
 0x3f6   : > { %v1802_v16 = vpop.eup %1801  ;;  %1331 = vst [vmem:[%s2507_s6 + $0x60] sm:$0xff] %v1315_v57  ;;  %v1300_v13 = vmul.f32 0.6931472, %v1800_v58 }
 0x3f7   : > { %1330 = vst [vmem:[%s2507_s6 + $0x58] sm:$0xff] %v1314_v28  ;;  %v1298_v59 = vmul.f32 0.6931472, %v1802_v16 }
 0x3f8   : > { %v1317_v34 = vsub.f32 %v2411_v10, %v1300_v13 }
 0x3f9   : > { %v1316_v32 = vsub.f32 %v2414_v47, %v1298_v59 }
 0x3fa   : > { %v1804_v61 = vpop.eup %1803  ;;  %1333 = vst [vmem:[%s2507_s6 + $0x70] sm:$0xff] %v1317_v34 }
 0x3fb   : > { %v1302_v22 = vmul.f32 0.6931472, %v1804_v61  ;;  %1332 = vst [vmem:[%s2507_s6 + $0x68] sm:$0xff] %v1316_v32 }
 0x3fd   : > { %v1318_v23 = vsub.f32 %v2419_v54, %v1302_v22 }
 0x3ff   : > { %1334 = vst [vmem:[%s2507_s6 + $0x78] sm:$0xff] %v1318_v23 }
 0x400 PF: > { %s16_s25 = sadd.s32 1, %s1843_s25   ;;  %s2508_s21 = smov %s1831_s22 }
 0x401   : > { %p13_p13 = scmp.ge.s32.totalorder %s16_s25, 4   ;;  %s2509_s22 = smov %s1916_s29 }
 0x402   : > { %s2510_s23 = smov %s1839_s24  ;;  %s2511_s24 = smov %s2513_s26 }
 0x403   :  { %15 = sbr.rel (!%p13_p13) target bundleno = 3 (0x3), region = 138 }

</bundles_post_ra>
